<compile_context>
chip_gen: v7x
topology: tpu7x:2x2x1
jax: 0.10.0
libtpu: 0.0.40
codegen_flags: <defaults>
</compile_context>

<pallas_src>
import functools

import jax
import jax.numpy as jnp
from jax.experimental import pallas as pl
from jax.experimental.pallas import tpu as pltpu

LANE = 128


def _round_up(x, m):
    return (x + m - 1) // m * m


# ----------------------------------------------------------------------------
# Pallas kernel
# ----------------------------------------------------------------------------
def _layer_norm(x, gamma, beta, eps=1e-5):
    mean = jnp.mean(x, axis=-1, keepdims=True)
    var = jnp.mean(jnp.square(x - mean), axis=-1, keepdims=True)
    return (x - mean) * jax.lax.rsqrt(var + eps) * gamma + beta


def _gelu_exact(x):
    # nn.GELU() default: exact erf-based GELU
    return 0.5 * x * (1.0 + jax.lax.erf(x * 0.7071067811865476))


def cross_attention_kernel(
    kv_ref,      # (TB, M, C)
    q_ref,       # (TB, N, D)
    vec_ref,     # (11, PAD)  packed 1-D params (LN gammas/betas + biases)
    wq_ref,      # (D, H*pad_qk)             head-major, lane-padded Q weight
    wkv_ref,     # (C, H*pad_qk + H*pad_v)   fused, head-major, lane-padded K|V
    wo_ref,      # (H*pad_v, D)              output projection (zero rows in pads)
    w1_ref,      # (D, hid)                  MLP fc1
    w2_ref,      # (hid, D)                  MLP fc2
    out_ref,     # (TB, N, D)
    attn_ref,    # (TB*N, D) f32 VMEM scratch for the attention output
    *, num_heads, pad_qk, pad_v, scale,
    kv_dim, q_dim, hid_dim, seq_kv, seq_q, tb, mxu_dtype,
):
    TB, M, N, C, D = tb, seq_kv, seq_q, kv_dim, q_dim
    qk_out_p = num_heads * pad_qk
    v_out_p = num_heads * pad_v

    # Fold the batch block into the row (sublane) dimension for all per-row ops.
    kv = kv_ref[...].reshape(TB * M, C).astype(jnp.float32)
    q_in = q_ref[...].reshape(TB * N, D).astype(jnp.float32)

    # Packed 1-D parameters (each row zero-padded to PAD lanes) -- kept f32.
    vecs = vec_ref[...]
    g_kv, b_kv = vecs[0:1, :C], vecs[1:2, :C]
    g_q, b_q = vecs[2:3, :D], vecs[3:4, :D]
    g_x, b_x = vecs[4:5, :D], vecs[5:6, :D]
    bq = vecs[6:7, :qk_out_p]
    bkv = vecs[7:8, :qk_out_p + v_out_p]
    bo = vecs[8:9, :D]
    b1 = vecs[9:10, :hid_dim]
    b2 = vecs[10:11, :D]

    # --- pre-LayerNorms (f32 VPU math) ---------------------------------------
    ln_kv = _layer_norm(kv, g_kv, b_kv)     # (TB*M, C)
    ln_q = _layer_norm(q_in, g_q, b_q)      # (TB*N, D)

    # --- fused K|V projection and Q projection (single MXU pushes) -----------
    # MXU operands cast to mxu_dtype; accumulation stays f32.
    kv_all = jnp.dot(ln_kv.astype(mxu_dtype), wkv_ref[...],
                     preferred_element_type=jnp.float32) + bkv
    q_all = jnp.dot(ln_q.astype(mxu_dtype), wq_ref[...],
                    preferred_element_type=jnp.float32) + bq

    # --- multi-head scaled-dot-product attention -----------------------------
    # Per-head slices are whole 128-lane tiles (head-major, zero-padded layout),
    # and each head's output is pushed straight through its (sublane-aligned)
    # slice of wo and accumulated into the attn VMEM scratch.
    wo = wo_ref[...]                         # (H*pad_v, D)
    dg_dims = (((1,), (1,)), ((), ()))       # contract last dim of both operands
    for b in range(TB):
        q_b = q_all[b * N:(b + 1) * N, :]     # (N, H*pad_qk)
        kv_b = kv_all[b * M:(b + 1) * M, :]   # (M, H*pad_qk + H*pad_v)
        acc = jnp.zeros((N, D), jnp.float32)
        for h in range(num_heads):
            qh = q_b[:, h * pad_qk:(h + 1) * pad_qk]                       # (N, pad_qk)
            kh = kv_b[:, h * pad_qk:(h + 1) * pad_qk]                      # (M, pad_qk)
            vh = kv_b[:, qk_out_p + h * pad_v:
                         qk_out_p + (h + 1) * pad_v]                       # (M, pad_v)
            s = jax.lax.dot_general(qh.astype(mxu_dtype), kh.astype(mxu_dtype),
                                    dg_dims,
                                    preferred_element_type=jnp.float32) * scale
            s = s - jnp.max(s, axis=-1, keepdims=True)
            p = jnp.exp(s)
            p = p / jnp.sum(p, axis=-1, keepdims=True)       # exact softmax denom
            hout = jnp.dot(p.astype(mxu_dtype), vh.astype(mxu_dtype),
                           preferred_element_type=jnp.float32)             # (N, pad_v)
            acc = acc + jnp.dot(hout.astype(mxu_dtype),
                                wo[h * pad_v:(h + 1) * pad_v, :],
                                preferred_element_type=jnp.float32)        # (N, D)
        attn_ref[b * N:(b + 1) * N, :] = acc

    attn_out = attn_ref[...] + bo                                          # (TB*N, D)

    # --- query residual ------------------------------------------------------
    x = q_in + attn_out

    # --- post-LayerNorm + MLP (Linear -> GELU -> Linear) + residual ----------
    ln_x = _layer_norm(x, g_x, b_x)
    h1 = jnp.dot(ln_x.astype(mxu_dtype), w1_ref[...],
                 preferred_element_type=jnp.float32) + b1
    h1 = _gelu_exact(h1)
    h2 = jnp.dot(h1.astype(mxu_dtype), w2_ref[...],
                 preferred_element_type=jnp.float32) + b2
    x = x + h2

    out_ref[...] = x.reshape(tb, N, D).astype(out_ref.dtype)


# ----------------------------------------------------------------------------
# Wrapper
# ----------------------------------------------------------------------------
def _tpu_generation_info():
    """(physical VMEM bytes per core, TensorCores per chip) -- defensive heuristics."""
    kind = ""
    try:
        kind = jax.devices()[0].device_kind.lower()
    except Exception:
        pass
    if "v7" in kind:
        return 64 << 20, 2            # v7x: 64 MiB VMEM per TC, 2 TensorCores
    if "v4" in kind or "v5p" in kind:
        return 128 << 20, 2           # megacore generations
    vmem = 128 << 20                  # v5e / v6e: 128 MiB, single TensorCore
    try:
        info = pltpu.get_tpu_info()
        vmem = int(getattr(info, "vmem_capacity_bytes", vmem))
    except Exception:
        pass
    return vmem, 1


def _pick_batch_block(batch, fits, num_cores):
    """Largest batch block that fits the VMEM budget.

    Single-TC chips: prefer one grid step (the grid is a serial loop there).
    Multi-TC chips: prefer a grid length that is a multiple of the core count
    so the 'parallel' axis shards evenly across TensorCores.
    """
    divisors = [d for d in range(batch, 0, -1) if batch % d == 0]
    if num_cores > 1:
        for tb in divisors:
            steps = batch // tb
            if steps >= num_cores and steps % num_cores == 0 and fits(tb):
                return tb
    for tb in divisors:
        if fits(tb):
            return tb
    return 1


def cross_attention_pallas(inputs_kv, inputs_q, params, *, num_heads,
                           mxu_dtype=jnp.bfloat16):
    B, M, C = inputs_kv.shape
    _, N, D = inputs_q.shape
    qk_out = params["wq"].shape[1]
    v_out = params["wv"].shape[1]
    hid = params["w1"].shape[1]
    qk_hd = qk_out // num_heads
    v_hd = v_out // num_heads
    scale = qk_hd ** (-0.5)

    # Head-major, lane-padded packing: head h's Q/K columns live in
    # [h*pad_qk, h*pad_qk + qk_hd) (zeros elsewhere), V columns likewise, and wo
    # gets matching zero rows.  Every per-head slice in the kernel is then a
    # whole 128-lane tile; the zero padding is exact through the attention math.
    pad_qk = _round_up(qk_hd, LANE)
    pad_v = _round_up(v_hd, LANE)
    qk_out_p = num_heads * pad_qk
    v_out_p = num_heads * pad_v

    def pad_head_cols(w, hd, pad):    # (in, H*hd) -> (in, H*pad)
        fan_in = w.shape[0]
        w = w.reshape(fan_in, num_heads, hd)
        w = jnp.pad(w, ((0, 0), (0, 0), (0, pad - hd)))
        return w.reshape(fan_in, num_heads * pad)

    def pad_head_vec(v, hd, pad):     # (H*hd,) -> (H*pad,)
        v = v.reshape(num_heads, hd)
        v = jnp.pad(v, ((0, 0), (0, pad - hd)))
        return v.reshape(num_heads * pad)

    wq_p = pad_head_cols(params["wq"], qk_hd, pad_qk)
    wk_p = pad_head_cols(params["wk"], qk_hd, pad_qk)
    wv_p = pad_head_cols(params["wv"], v_hd, pad_v)
    wkv_p = jnp.concatenate([wk_p, wv_p], axis=1)          # (C, qk_out_p + v_out_p)
    bq_p = pad_head_vec(params["bq"], qk_hd, pad_qk)
    bkv_p = jnp.concatenate([pad_head_vec(params["bk"], qk_hd, pad_qk),
                             pad_head_vec(params["bv"], v_hd, pad_v)], axis=0)
    wo_p = params["wo"].reshape(num_heads, v_hd, D)
    wo_p = jnp.pad(wo_p, ((0, 0), (0, pad_v - v_hd), (0, 0))).reshape(v_out_p, D)

    # MXU-side weights (bf16 by default -> half the weight VMEM / DMA traffic).
    weights = [w.astype(mxu_dtype)
               for w in (wq_p, wkv_p, wo_p, params["w1"], params["w2"])]

    # Pack all 1-D params into a single (n_vec, pad) f32 ref (one DMA, one buffer).
    vec_list = [
        params["g_kv"], params["b_kv"],
        params["g_q"], params["b_q"],
        params["g_x"], params["b_x"],
        bq_p, bkv_p,
        params["bo"], params["b1"], params["b2"],
    ]
    vpad = max(int(v.shape[0]) for v in vec_list)
    vecs = jnp.stack(
        [jnp.pad(v.astype(jnp.float32), (0, vpad - v.shape[0])) for v in vec_list],
        axis=0)

    # ---- VMEM-budget-aware batch blocking ------------------------------------
    w_item = jnp.dtype(mxu_dtype).itemsize
    weight_bytes = sum(int(w.size) * w_item for w in weights) + int(vecs.size) * 4

    def est_bytes(tb):
        io = 2 * tb * (M * C + 2 * N * D) * 4                     # dbl-buffered kv/q/out
        inter = tb * 4 * (M * (C + qk_out_p + v_out_p)            # ln_kv, kv_all
                          + N * (4 * D + qk_out_p + hid)          # ln_q/q_all/x/mlp/scratch
                          + N * M)                                # scores
        return io + inter + 2 * weight_bytes                      # x2: worst-case weight bufs

    vmem_cap, num_cores = _tpu_generation_info()
    budget = int(min(vmem_cap * 0.7, 100 << 20))
    if num_cores > 1:
        budget = min(budget, 48 << 20)                            # v7x: 64 MiB physical
    TB = _pick_batch_block(B, lambda tb: est_bytes(tb) <= budget, num_cores)
    grid = (B // TB,)
    vmem_limit = int(min(vmem_cap - (8 << 20),
                         max(32 << 20, 2 * est_bytes(TB))))

    kernel = functools.partial(
        cross_attention_kernel,
        num_heads=num_heads, pad_qk=pad_qk, pad_v=pad_v, scale=scale,
        kv_dim=C, q_dim=D, hid_dim=hid, seq_kv=M, seq_q=N, tb=TB,
        mxu_dtype=mxu_dtype)

    def data_spec(shape):
        return pl.BlockSpec(shape, lambda i: (i, 0, 0))

    def invariant_spec(shape, single_buffer):
        nd = len(shape)
        idx = lambda i: (0,) * nd
        if single_buffer:
            # Constant index_map across the grid -> one buffer is enough.
            return pl.BlockSpec(shape, idx, pipeline_mode=pl.Buffered(1))
        return pl.BlockSpec(shape, idx)

    def build(single_buffer):
        single_buffer = single_buffer and hasattr(pl, "Buffered")
        in_specs = ([data_spec((TB, M, C)), data_spec((TB, N, D)),
                     invariant_spec(vecs.shape, single_buffer)]
                    + [invariant_spec(w.shape, single_buffer) for w in weights])
        return pl.pallas_call(
            kernel,
            out_shape=jax.ShapeDtypeStruct((B, N, D), jnp.float32),
            grid_spec=pltpu.PrefetchScalarGridSpec(
                num_scalar_prefetch=0,
                grid=grid,
                in_specs=in_specs,
                out_specs=pl.BlockSpec((TB, N, D), lambda i: (i, 0, 0)),
                scratch_shapes=[pltpu.VMEM((TB * N, D), jnp.float32)]),
            compiler_params=pltpu.CompilerParams(
                dimension_semantics=("parallel",),
                vmem_limit_bytes=vmem_limit),
        )

    args = (inputs_kv, inputs_q, vecs, *weights)
    try:
        return build(True)(*args)
    except Exception:
        # Fallback: double-buffered invariant operands (functionally identical).
        return build(False)(*args)


# ----------------------------------------------------------------------------
# Pure-JAX reference (mirrors the PyTorch module, eval mode)
# ----------------------------------------------------------------------------
def cross_attention_ref(inputs_kv, inputs_q, params, *, num_heads):
    def ln(x, g, b, eps=1e-5):
        mu = jnp.mean(x, -1, keepdims=True)
        var = jnp.mean((x - mu) ** 2, -1, keepdims=True)
        return (x - mu) / jnp.sqrt(var + eps) * g + b

    qk_out = params["wq"].shape[1]
    v_out = params["wv"].shape[1]
    qk_hd = qk_out // num_heads
    v_hd = v_out // num_heads
    scale = qk_hd ** (-0.5)

    kvn = ln(inputs_kv, params["g_kv"], params["b_kv"])
    qn = ln(inputs_q, params["g_q"], params["b_q"])
    k = kvn @ params["wk"] + params["bk"]
    q = qn @ params["wq"] + params["bq"]
    v = kvn @ params["wv"] + params["bv"]

    def split(x, hd):  # (B, S, H*hd) -> (B, H, S, hd)
        B, S, _ = x.shape
        return x.reshape(B, S, num_heads, hd).transpose(0, 2, 1, 3)

    k, q, v = split(k, qk_hd), split(q, qk_hd), split(v, v_hd)
    att = (q @ jnp.swapaxes(k, -1, -2)) * scale
    att = jax.nn.softmax(att, axis=-1)
    w = att @ v                                   # (B, H, N, v_hd)
    B, H, N, hd = w.shape
    w = w.transpose(0, 2, 1, 3).reshape(B, N, H * hd)
    attn_out = w @ params["wo"] + params["bo"]

    x = inputs_q + attn_out
    xn = ln(x, params["g_x"], params["b_x"])
    h = xn @ params["w1"] + params["b1"]
    h = 0.5 * h * (1.0 + jax.lax.erf(h / jnp.sqrt(2.0)))
    h = h @ params["w2"] + params["b2"]
    return x + h


# ----------------------------------------------------------------------------
# Main
# ----------------------------------------------------------------------------
if __name__ == "__main__":
    # Small shapes consistent with the module
    B, M, N = 2, 16, 8
    kv_dim, q_dim = 32, 32
    qk_out, v_out = 32, 32
    num_heads = 2
    widening_factor = 1          # CrossAttention default
    hid = q_dim * widening_factor

    key = jax.random.PRNGKey(0)
    keys = jax.random.split(key, 16)

    def linear_init(k, fan_in, shape):
        bound = 1.0 / jnp.sqrt(fan_in)
        return jax.random.uniform(k, shape, jnp.float32, -bound, bound)

    params = {
        # LayerNorms (PyTorch default init: gamma=1, beta=0)
        "g_kv": jnp.ones((kv_dim,), jnp.float32), "b_kv": jnp.zeros((kv_dim,), jnp.float32),
        "g_q": jnp.ones((q_dim,), jnp.float32), "b_q": jnp.zeros((q_dim,), jnp.float32),
        "g_x": jnp.ones((q_dim,), jnp.float32), "b_x": jnp.zeros((q_dim,), jnp.float32),
        # Linear weights stored already transposed: (in, out)
        "wk": linear_init(keys[0], kv_dim, (kv_dim, qk_out)),
        "bk": linear_init(keys[1], kv_dim, (qk_out,)),
        "wq": linear_init(keys[2], q_dim, (q_dim, qk_out)),
        "bq": linear_init(keys[3], q_dim, (qk_out,)),
        "wv": linear_init(keys[4], kv_dim, (kv_dim, v_out)),
        "bv": linear_init(keys[5], kv_dim, (v_out,)),
        "wo": linear_init(keys[6], v_out, (v_out, q_dim)),
        "bo": linear_init(keys[7], v_out, (q_dim,)),
        "w1": linear_init(keys[8], q_dim, (q_dim, hid)),
        "b1": linear_init(keys[9], q_dim, (hid,)),
        "w2": linear_init(keys[10], hid, (hid, q_dim)),
        "b2": linear_init(keys[11], hid, (q_dim,)),
    }

    inputs_kv = jax.random.normal(keys[12], (B, M, kv_dim), jnp.float32)
    inputs_q = jax.random.normal(keys[13], (B, N, q_dim), jnp.float32)

    # Two references: XLA's default f32 matmul precision on TPU rounds operands to
    # bf16; the Mosaic MXU path may use either rounding mode, so accept whichever
    # the kernel's dots actually match (at tight tolerance).
    ref_def = cross_attention_ref(inputs_kv, inputs_q, params, num_heads=num_heads)
    with jax.default_matmul_precision("float32"):
        ref_hi = cross_attention_ref(inputs_kv, inputs_q, params, num_heads=num_heads)
    ref_def = jax.block_until_ready(ref_def)
    ref_hi = jax.block_until_ready(ref_hi)

    # 1) f32 MXU operands: tight parity (approx softmax reciprocal removed).
    out_f32 = cross_attention_pallas(inputs_kv, inputs_q, params,
                                     num_heads=num_heads, mxu_dtype=jnp.float32)
    out_f32 = jax.block_until_ready(out_f32)
    assert out_f32.shape == (B, N, q_dim)
    ok_def = bool(jnp.allclose(out_f32, ref_def, atol=2e-4, rtol=2e-4))
    ok_hi = bool(jnp.allclose(out_f32, ref_hi, atol=2e-4, rtol=2e-4))
    assert ok_def or ok_hi, (
        "f32 path mismatch: "
        f"max|diff| vs default-precision ref = {float(jnp.max(jnp.abs(out_f32 - ref_def)))}, "
        f"vs float32-precision ref = {float(jnp.max(jnp.abs(out_f32 - ref_hi)))}")

    # 2) Default bf16-MXU path (f32 accumulation, f32 LN/softmax/GELU/residuals).
    out_bf16 = cross_attention_pallas(inputs_kv, inputs_q, params, num_heads=num_heads)
    out_bf16 = jax.block_until_ready(out_bf16)
    assert out_bf16.shape == (B, N, q_dim)
    assert jnp.allclose(out_bf16, ref_def, atol=5e-2, rtol=5e-2), (
        f"bf16 path mismatch: max|diff| = {float(jnp.max(jnp.abs(out_bf16 - ref_def)))}")

    print("KERNEL_OK")
</pallas_src>

<mosaic_0001>
module attributes {stable_mosaic.version = 11 : i64} {
  func.func @cross_attention_kernel(%arg0: i32, %arg1: memref<2x16x32xf32, #tpu.memory_space<vmem>>, %arg2: memref<2x8x32xf32, #tpu.memory_space<vmem>>, %arg3: memref<11x512xf32, #tpu.memory_space<vmem>>, %arg4: memref<32x256xf32, #tpu.memory_space<vmem>>, %arg5: memref<32x512xf32, #tpu.memory_space<vmem>>, %arg6: memref<256x32xf32, #tpu.memory_space<vmem>>, %arg7: memref<32x32xf32, #tpu.memory_space<vmem>>, %arg8: memref<32x32xf32, #tpu.memory_space<vmem>>, %arg9: memref<2x8x32xf32, #tpu.memory_space<vmem>>, %arg10: memref<16x32xf32, #tpu.memory_space<vmem>>) attributes {dimension_semantics = [#tpu.dimension_semantics<parallel>], iteration_bounds = array<i64: 1>, scalar_prefetch = 0 : i64, scratch_operands = 1 : i64, tpu.core_type = #tpu.core_type<tc>, window_params = [{transform_indices = @transform_0, window_bounds = array<i64: 2, 16, 32>}, {transform_indices = @transform_1, window_bounds = array<i64: 2, 8, 32>}, {pipeline_mode = #tpu.pipeline_mode<synchronous>, transform_indices = @transform_2, window_bounds = array<i64: 11, 512>}, {pipeline_mode = #tpu.pipeline_mode<synchronous>, transform_indices = @transform_3, window_bounds = array<i64: 32, 256>}, {pipeline_mode = #tpu.pipeline_mode<synchronous>, transform_indices = @transform_4, window_bounds = array<i64: 32, 512>}, {pipeline_mode = #tpu.pipeline_mode<synchronous>, transform_indices = @transform_5, window_bounds = array<i64: 256, 32>}, {pipeline_mode = #tpu.pipeline_mode<synchronous>, transform_indices = @transform_6, window_bounds = array<i64: 32, 32>}, {pipeline_mode = #tpu.pipeline_mode<synchronous>, transform_indices = @transform_7, window_bounds = array<i64: 32, 32>}, {transform_indices = @transform_8, window_bounds = array<i64: 2, 8, 32>}]} {
    %c0 = arith.constant 0 : index
    %c0_0 = arith.constant 0 : index
    %c0_1 = arith.constant 0 : index
    %0 = vector.load %arg1[%c0, %c0_0, %c0_1] : memref<2x16x32xf32, #tpu.memory_space<vmem>>, vector<2x16x32xf32>
    %1 = vector.shape_cast %0 : vector<2x16x32xf32> to vector<32x32xf32>
    %c0_2 = arith.constant 0 : index
    %c0_3 = arith.constant 0 : index
    %c0_4 = arith.constant 0 : index
    %2 = vector.load %arg2[%c0_2, %c0_3, %c0_4] : memref<2x8x32xf32, #tpu.memory_space<vmem>>, vector<2x8x32xf32>
    %3 = vector.shape_cast %2 : vector<2x8x32xf32> to vector<16x32xf32>
    %c0_5 = arith.constant 0 : index
    %c0_6 = arith.constant 0 : index
    %4 = vector.load %arg3[%c0_5, %c0_6] : memref<11x512xf32, #tpu.memory_space<vmem>>, vector<11x512xf32>
    %5 = vector.extract_strided_slice %4 {offsets = [0, 0], sizes = [1, 32], strides = [1, 1]} : vector<11x512xf32> to vector<1x32xf32>
    %6 = vector.extract_strided_slice %4 {offsets = [1, 0], sizes = [1, 32], strides = [1, 1]} : vector<11x512xf32> to vector<1x32xf32>
    %7 = vector.extract_strided_slice %4 {offsets = [2, 0], sizes = [1, 32], strides = [1, 1]} : vector<11x512xf32> to vector<1x32xf32>
    %8 = vector.extract_strided_slice %4 {offsets = [3, 0], sizes = [1, 32], strides = [1, 1]} : vector<11x512xf32> to vector<1x32xf32>
    %9 = vector.extract_strided_slice %4 {offsets = [4, 0], sizes = [1, 32], strides = [1, 1]} : vector<11x512xf32> to vector<1x32xf32>
    %10 = vector.extract_strided_slice %4 {offsets = [5, 0], sizes = [1, 32], strides = [1, 1]} : vector<11x512xf32> to vector<1x32xf32>
    %11 = vector.extract_strided_slice %4 {offsets = [6, 0], sizes = [1, 256], strides = [1, 1]} : vector<11x512xf32> to vector<1x256xf32>
    %12 = vector.extract_strided_slice %4 {offsets = [7, 0], sizes = [1, 512], strides = [1, 1]} : vector<11x512xf32> to vector<1x512xf32>
    %13 = vector.extract_strided_slice %4 {offsets = [8, 0], sizes = [1, 32], strides = [1, 1]} : vector<11x512xf32> to vector<1x32xf32>
    %14 = vector.extract_strided_slice %4 {offsets = [9, 0], sizes = [1, 32], strides = [1, 1]} : vector<11x512xf32> to vector<1x32xf32>
    %15 = vector.extract_strided_slice %4 {offsets = [10, 0], sizes = [1, 32], strides = [1, 1]} : vector<11x512xf32> to vector<1x32xf32>
    %cst = arith.constant dense<0.000000e+00> : vector<32xf32>
    %16 = vector.multi_reduction <add>, %1, %cst [1] : vector<32x32xf32> to vector<32xf32>
    %17 = vector.shape_cast %16 : vector<32xf32> to vector<32x1xf32>
    %cst_7 = arith.constant 3.200000e+01 : f32
    %18 = vector.broadcast %cst_7 : f32 to vector<32x1xf32>
    %19 = arith.divf %17, %18 : vector<32x1xf32>
    %20 = vector.broadcast %19 : vector<32x1xf32> to vector<32x32xf32>
    %21 = arith.subf %1, %20 : vector<32x32xf32>
    %22 = arith.mulf %21, %21 : vector<32x32xf32>
    %cst_8 = arith.constant dense<0.000000e+00> : vector<32xf32>
    %23 = vector.multi_reduction <add>, %22, %cst_8 [1] : vector<32x32xf32> to vector<32xf32>
    %24 = vector.shape_cast %23 : vector<32xf32> to vector<32x1xf32>
    %cst_9 = arith.constant 3.200000e+01 : f32
    %25 = vector.broadcast %cst_9 : f32 to vector<32x1xf32>
    %26 = arith.divf %24, %25 : vector<32x1xf32>
    %27 = vector.broadcast %19 : vector<32x1xf32> to vector<32x32xf32>
    %28 = arith.subf %1, %27 : vector<32x32xf32>
    %cst_10 = arith.constant 9.99999974E-6 : f32
    %29 = vector.broadcast %cst_10 : f32 to vector<32x1xf32>
    %30 = arith.addf %26, %29 : vector<32x1xf32>
    %31 = math.rsqrt %30 : vector<32x1xf32>
    %32 = vector.broadcast %31 : vector<32x1xf32> to vector<32x32xf32>
    %33 = arith.mulf %28, %32 : vector<32x32xf32>
    %34 = vector.broadcast %5 : vector<1x32xf32> to vector<32x32xf32>
    %35 = arith.mulf %33, %34 : vector<32x32xf32>
    %36 = vector.broadcast %6 : vector<1x32xf32> to vector<32x32xf32>
    %37 = arith.addf %35, %36 : vector<32x32xf32>
    %cst_11 = arith.constant dense<0.000000e+00> : vector<16xf32>
    %38 = vector.multi_reduction <add>, %3, %cst_11 [1] : vector<16x32xf32> to vector<16xf32>
    %39 = vector.shape_cast %38 : vector<16xf32> to vector<16x1xf32>
    %cst_12 = arith.constant 3.200000e+01 : f32
    %40 = vector.broadcast %cst_12 : f32 to vector<16x1xf32>
    %41 = arith.divf %39, %40 : vector<16x1xf32>
    %42 = vector.broadcast %41 : vector<16x1xf32> to vector<16x32xf32>
    %43 = arith.subf %3, %42 : vector<16x32xf32>
    %44 = arith.mulf %43, %43 : vector<16x32xf32>
    %cst_13 = arith.constant dense<0.000000e+00> : vector<16xf32>
    %45 = vector.multi_reduction <add>, %44, %cst_13 [1] : vector<16x32xf32> to vector<16xf32>
    %46 = vector.shape_cast %45 : vector<16xf32> to vector<16x1xf32>
    %cst_14 = arith.constant 3.200000e+01 : f32
    %47 = vector.broadcast %cst_14 : f32 to vector<16x1xf32>
    %48 = arith.divf %46, %47 : vector<16x1xf32>
    %49 = vector.broadcast %41 : vector<16x1xf32> to vector<16x32xf32>
    %50 = arith.subf %3, %49 : vector<16x32xf32>
    %cst_15 = arith.constant 9.99999974E-6 : f32
    %51 = vector.broadcast %cst_15 : f32 to vector<16x1xf32>
    %52 = arith.addf %48, %51 : vector<16x1xf32>
    %53 = math.rsqrt %52 : vector<16x1xf32>
    %54 = vector.broadcast %53 : vector<16x1xf32> to vector<16x32xf32>
    %55 = arith.mulf %50, %54 : vector<16x32xf32>
    %56 = vector.broadcast %7 : vector<1x32xf32> to vector<16x32xf32>
    %57 = arith.mulf %55, %56 : vector<16x32xf32>
    %58 = vector.broadcast %8 : vector<1x32xf32> to vector<16x32xf32>
    %59 = arith.addf %57, %58 : vector<16x32xf32>
    %c0_16 = arith.constant 0 : index
    %c0_17 = arith.constant 0 : index
    %60 = vector.load %arg5[%c0_16, %c0_17] : memref<32x512xf32, #tpu.memory_space<vmem>>, vector<32x512xf32>
    %cst_18 = arith.constant dense<0.000000e+00> : vector<32x512xf32>
    %61 = tpu.matmul %37, %60, %cst_18 {dimension_numbers = #tpu.dot_dimension_numbers<[1], [0], [0], [1], [0, 0, 1, 1], [], []>} : vector<32x32xf32>, vector<32x512xf32>, vector<32x512xf32> -> vector<32x512xf32>
    %62 = vector.broadcast %12 : vector<1x512xf32> to vector<32x512xf32>
    %63 = arith.addf %61, %62 : vector<32x512xf32>
    %c0_19 = arith.constant 0 : index
    %c0_20 = arith.constant 0 : index
    %64 = vector.load %arg4[%c0_19, %c0_20] : memref<32x256xf32, #tpu.memory_space<vmem>>, vector<32x256xf32>
    %cst_21 = arith.constant dense<0.000000e+00> : vector<16x256xf32>
    %65 = tpu.matmul %59, %64, %cst_21 {dimension_numbers = #tpu.dot_dimension_numbers<[1], [0], [0], [1], [0, 0, 1, 1], [], []>} : vector<16x32xf32>, vector<32x256xf32>, vector<16x256xf32> -> vector<16x256xf32>
    %66 = vector.broadcast %11 : vector<1x256xf32> to vector<16x256xf32>
    %67 = arith.addf %65, %66 : vector<16x256xf32>
    %c0_22 = arith.constant 0 : index
    %c0_23 = arith.constant 0 : index
    %68 = vector.load %arg6[%c0_22, %c0_23] : memref<256x32xf32, #tpu.memory_space<vmem>>, vector<256x32xf32>
    %69 = vector.extract_strided_slice %67 {offsets = [0, 0], sizes = [8, 256], strides = [1, 1]} : vector<16x256xf32> to vector<8x256xf32>
    %70 = vector.extract_strided_slice %63 {offsets = [0, 0], sizes = [16, 512], strides = [1, 1]} : vector<32x512xf32> to vector<16x512xf32>
    %cst_24 = arith.constant 0.000000e+00 : f32
    %71 = vector.broadcast %cst_24 : f32 to vector<8x32xf32>
    %72 = vector.extract_strided_slice %69 {offsets = [0, 0], sizes = [8, 128], strides = [1, 1]} : vector<8x256xf32> to vector<8x128xf32>
    %73 = vector.extract_strided_slice %70 {offsets = [0, 0], sizes = [16, 128], strides = [1, 1]} : vector<16x512xf32> to vector<16x128xf32>
    %74 = vector.extract_strided_slice %70 {offsets = [0, 256], sizes = [16, 128], strides = [1, 1]} : vector<16x512xf32> to vector<16x128xf32>
    %cst_25 = arith.constant dense<0.000000e+00> : vector<8x16xf32>
    %75 = tpu.matmul %72, %73, %cst_25 {dimension_numbers = #tpu.dot_dimension_numbers<[1], [1], [0], [0], [0, 0, 1, 0], [], []>} : vector<8x128xf32>, vector<16x128xf32>, vector<8x16xf32> -> vector<8x16xf32>
    %cst_26 = arith.constant 2.500000e-01 : f32
    %76 = vector.broadcast %cst_26 : f32 to vector<8x16xf32>
    %77 = arith.mulf %75, %76 : vector<8x16xf32>
    %cst_27 = arith.constant dense<0xFF800000> : vector<8xf32>
    %78 = vector.multi_reduction <maximumf>, %77, %cst_27 [1] : vector<8x16xf32> to vector<8xf32>
    %79 = vector.shape_cast %78 : vector<8xf32> to vector<8x1xf32>
    %80 = vector.broadcast %79 : vector<8x1xf32> to vector<8x16xf32>
    %81 = arith.subf %77, %80 : vector<8x16xf32>
    %82 = math.exp %81 : vector<8x16xf32>
    %cst_28 = arith.constant dense<0.000000e+00> : vector<8xf32>
    %83 = vector.multi_reduction <add>, %82, %cst_28 [1] : vector<8x16xf32> to vector<8xf32>
    %84 = vector.shape_cast %83 : vector<8xf32> to vector<8x1xf32>
    %85 = vector.broadcast %84 : vector<8x1xf32> to vector<8x16xf32>
    %86 = arith.divf %82, %85 : vector<8x16xf32>
    %cst_29 = arith.constant dense<0.000000e+00> : vector<8x128xf32>
    %87 = tpu.matmul %86, %74, %cst_29 {dimension_numbers = #tpu.dot_dimension_numbers<[1], [0], [0], [1], [0, 0, 1, 1], [], []>} : vector<8x16xf32>, vector<16x128xf32>, vector<8x128xf32> -> vector<8x128xf32>
    %88 = vector.extract_strided_slice %68 {offsets = [0, 0], sizes = [128, 32], strides = [1, 1]} : vector<256x32xf32> to vector<128x32xf32>
    %cst_30 = arith.constant dense<0.000000e+00> : vector<8x32xf32>
    %89 = tpu.matmul %87, %88, %cst_30 {dimension_numbers = #tpu.dot_dimension_numbers<[1], [0], [0], [1], [0, 0, 1, 1], [], []>} : vector<8x128xf32>, vector<128x32xf32>, vector<8x32xf32> -> vector<8x32xf32>
    %90 = arith.addf %71, %89 : vector<8x32xf32>
    %91 = vector.extract_strided_slice %69 {offsets = [0, 128], sizes = [8, 128], strides = [1, 1]} : vector<8x256xf32> to vector<8x128xf32>
    %92 = vector.extract_strided_slice %70 {offsets = [0, 128], sizes = [16, 128], strides = [1, 1]} : vector<16x512xf32> to vector<16x128xf32>
    %93 = vector.extract_strided_slice %70 {offsets = [0, 384], sizes = [16, 128], strides = [1, 1]} : vector<16x512xf32> to vector<16x128xf32>
    %cst_31 = arith.constant dense<0.000000e+00> : vector<8x16xf32>
    %94 = tpu.matmul %91, %92, %cst_31 {dimension_numbers = #tpu.dot_dimension_numbers<[1], [1], [0], [0], [0, 0, 1, 0], [], []>} : vector<8x128xf32>, vector<16x128xf32>, vector<8x16xf32> -> vector<8x16xf32>
    %cst_32 = arith.constant 2.500000e-01 : f32
    %95 = vector.broadcast %cst_32 : f32 to vector<8x16xf32>
    %96 = arith.mulf %94, %95 : vector<8x16xf32>
    %cst_33 = arith.constant dense<0xFF800000> : vector<8xf32>
    %97 = vector.multi_reduction <maximumf>, %96, %cst_33 [1] : vector<8x16xf32> to vector<8xf32>
    %98 = vector.shape_cast %97 : vector<8xf32> to vector<8x1xf32>
    %99 = vector.broadcast %98 : vector<8x1xf32> to vector<8x16xf32>
    %100 = arith.subf %96, %99 : vector<8x16xf32>
    %101 = math.exp %100 : vector<8x16xf32>
    %cst_34 = arith.constant dense<0.000000e+00> : vector<8xf32>
    %102 = vector.multi_reduction <add>, %101, %cst_34 [1] : vector<8x16xf32> to vector<8xf32>
    %103 = vector.shape_cast %102 : vector<8xf32> to vector<8x1xf32>
    %104 = vector.broadcast %103 : vector<8x1xf32> to vector<8x16xf32>
    %105 = arith.divf %101, %104 : vector<8x16xf32>
    %cst_35 = arith.constant dense<0.000000e+00> : vector<8x128xf32>
    %106 = tpu.matmul %105, %93, %cst_35 {dimension_numbers = #tpu.dot_dimension_numbers<[1], [0], [0], [1], [0, 0, 1, 1], [], []>} : vector<8x16xf32>, vector<16x128xf32>, vector<8x128xf32> -> vector<8x128xf32>
    %107 = vector.extract_strided_slice %68 {offsets = [128, 0], sizes = [128, 32], strides = [1, 1]} : vector<256x32xf32> to vector<128x32xf32>
    %cst_36 = arith.constant dense<0.000000e+00> : vector<8x32xf32>
    %108 = tpu.matmul %106, %107, %cst_36 {dimension_numbers = #tpu.dot_dimension_numbers<[1], [0], [0], [1], [0, 0, 1, 1], [], []>} : vector<8x128xf32>, vector<128x32xf32>, vector<8x32xf32> -> vector<8x32xf32>
    %109 = arith.addf %90, %108 : vector<8x32xf32>
    %c0_37 = arith.constant 0 : index
    %c0_38 = arith.constant 0 : index
    %110 = vector.load %arg10[%c0_37, %c0_38] : memref<16x32xf32, #tpu.memory_space<vmem>>, vector<8x32xf32>
    tpu.vector_store %arg10[%c0_37, %c0_38], %109 {strides = array<i32>} : memref<16x32xf32, #tpu.memory_space<vmem>>, vector<8x32xf32>,
    %111 = vector.extract_strided_slice %67 {offsets = [8, 0], sizes = [8, 256], strides = [1, 1]} : vector<16x256xf32> to vector<8x256xf32>
    %112 = vector.extract_strided_slice %63 {offsets = [16, 0], sizes = [16, 512], strides = [1, 1]} : vector<32x512xf32> to vector<16x512xf32>
    %cst_39 = arith.constant 0.000000e+00 : f32
    %113 = vector.broadcast %cst_39 : f32 to vector<8x32xf32>
    %114 = vector.extract_strided_slice %111 {offsets = [0, 0], sizes = [8, 128], strides = [1, 1]} : vector<8x256xf32> to vector<8x128xf32>
    %115 = vector.extract_strided_slice %112 {offsets = [0, 0], sizes = [16, 128], strides = [1, 1]} : vector<16x512xf32> to vector<16x128xf32>
    %116 = vector.extract_strided_slice %112 {offsets = [0, 256], sizes = [16, 128], strides = [1, 1]} : vector<16x512xf32> to vector<16x128xf32>
    %cst_40 = arith.constant dense<0.000000e+00> : vector<8x16xf32>
    %117 = tpu.matmul %114, %115, %cst_40 {dimension_numbers = #tpu.dot_dimension_numbers<[1], [1], [0], [0], [0, 0, 1, 0], [], []>} : vector<8x128xf32>, vector<16x128xf32>, vector<8x16xf32> -> vector<8x16xf32>
    %cst_41 = arith.constant 2.500000e-01 : f32
    %118 = vector.broadcast %cst_41 : f32 to vector<8x16xf32>
    %119 = arith.mulf %117, %118 : vector<8x16xf32>
    %cst_42 = arith.constant dense<0xFF800000> : vector<8xf32>
    %120 = vector.multi_reduction <maximumf>, %119, %cst_42 [1] : vector<8x16xf32> to vector<8xf32>
    %121 = vector.shape_cast %120 : vector<8xf32> to vector<8x1xf32>
    %122 = vector.broadcast %121 : vector<8x1xf32> to vector<8x16xf32>
    %123 = arith.subf %119, %122 : vector<8x16xf32>
    %124 = math.exp %123 : vector<8x16xf32>
    %cst_43 = arith.constant dense<0.000000e+00> : vector<8xf32>
    %125 = vector.multi_reduction <add>, %124, %cst_43 [1] : vector<8x16xf32> to vector<8xf32>
    %126 = vector.shape_cast %125 : vector<8xf32> to vector<8x1xf32>
    %127 = vector.broadcast %126 : vector<8x1xf32> to vector<8x16xf32>
    %128 = arith.divf %124, %127 : vector<8x16xf32>
    %cst_44 = arith.constant dense<0.000000e+00> : vector<8x128xf32>
    %129 = tpu.matmul %128, %116, %cst_44 {dimension_numbers = #tpu.dot_dimension_numbers<[1], [0], [0], [1], [0, 0, 1, 1], [], []>} : vector<8x16xf32>, vector<16x128xf32>, vector<8x128xf32> -> vector<8x128xf32>
    %130 = vector.extract_strided_slice %68 {offsets = [0, 0], sizes = [128, 32], strides = [1, 1]} : vector<256x32xf32> to vector<128x32xf32>
    %cst_45 = arith.constant dense<0.000000e+00> : vector<8x32xf32>
    %131 = tpu.matmul %129, %130, %cst_45 {dimension_numbers = #tpu.dot_dimension_numbers<[1], [0], [0], [1], [0, 0, 1, 1], [], []>} : vector<8x128xf32>, vector<128x32xf32>, vector<8x32xf32> -> vector<8x32xf32>
    %132 = arith.addf %113, %131 : vector<8x32xf32>
    %133 = vector.extract_strided_slice %111 {offsets = [0, 128], sizes = [8, 128], strides = [1, 1]} : vector<8x256xf32> to vector<8x128xf32>
    %134 = vector.extract_strided_slice %112 {offsets = [0, 128], sizes = [16, 128], strides = [1, 1]} : vector<16x512xf32> to vector<16x128xf32>
    %135 = vector.extract_strided_slice %112 {offsets = [0, 384], sizes = [16, 128], strides = [1, 1]} : vector<16x512xf32> to vector<16x128xf32>
    %cst_46 = arith.constant dense<0.000000e+00> : vector<8x16xf32>
    %136 = tpu.matmul %133, %134, %cst_46 {dimension_numbers = #tpu.dot_dimension_numbers<[1], [1], [0], [0], [0, 0, 1, 0], [], []>} : vector<8x128xf32>, vector<16x128xf32>, vector<8x16xf32> -> vector<8x16xf32>
    %cst_47 = arith.constant 2.500000e-01 : f32
    %137 = vector.broadcast %cst_47 : f32 to vector<8x16xf32>
    %138 = arith.mulf %136, %137 : vector<8x16xf32>
    %cst_48 = arith.constant dense<0xFF800000> : vector<8xf32>
    %139 = vector.multi_reduction <maximumf>, %138, %cst_48 [1] : vector<8x16xf32> to vector<8xf32>
    %140 = vector.shape_cast %139 : vector<8xf32> to vector<8x1xf32>
    %141 = vector.broadcast %140 : vector<8x1xf32> to vector<8x16xf32>
    %142 = arith.subf %138, %141 : vector<8x16xf32>
    %143 = math.exp %142 : vector<8x16xf32>
    %cst_49 = arith.constant dense<0.000000e+00> : vector<8xf32>
    %144 = vector.multi_reduction <add>, %143, %cst_49 [1] : vector<8x16xf32> to vector<8xf32>
    %145 = vector.shape_cast %144 : vector<8xf32> to vector<8x1xf32>
    %146 = vector.broadcast %145 : vector<8x1xf32> to vector<8x16xf32>
    %147 = arith.divf %143, %146 : vector<8x16xf32>
    %cst_50 = arith.constant dense<0.000000e+00> : vector<8x128xf32>
    %148 = tpu.matmul %147, %135, %cst_50 {dimension_numbers = #tpu.dot_dimension_numbers<[1], [0], [0], [1], [0, 0, 1, 1], [], []>} : vector<8x16xf32>, vector<16x128xf32>, vector<8x128xf32> -> vector<8x128xf32>
    %149 = vector.extract_strided_slice %68 {offsets = [128, 0], sizes = [128, 32], strides = [1, 1]} : vector<256x32xf32> to vector<128x32xf32>
    %cst_51 = arith.constant dense<0.000000e+00> : vector<8x32xf32>
    %150 = tpu.matmul %148, %149, %cst_51 {dimension_numbers = #tpu.dot_dimension_numbers<[1], [0], [0], [1], [0, 0, 1, 1], [], []>} : vector<8x128xf32>, vector<128x32xf32>, vector<8x32xf32> -> vector<8x32xf32>
    %151 = arith.addf %132, %150 : vector<8x32xf32>
    %c8 = arith.constant 8 : index
    %c0_52 = arith.constant 0 : index
    %152 = vector.load %arg10[%c8, %c0_52] : memref<16x32xf32, #tpu.memory_space<vmem>>, vector<8x32xf32>
    tpu.vector_store %arg10[%c8, %c0_52], %151 {strides = array<i32>} : memref<16x32xf32, #tpu.memory_space<vmem>>, vector<8x32xf32>,
    %c0_53 = arith.constant 0 : index
    %c0_54 = arith.constant 0 : index
    %153 = vector.load %arg10[%c0_53, %c0_54] : memref<16x32xf32, #tpu.memory_space<vmem>>, vector<16x32xf32>
    %154 = vector.broadcast %13 : vector<1x32xf32> to vector<16x32xf32>
    %155 = arith.addf %153, %154 : vector<16x32xf32>
    %156 = arith.addf %3, %155 : vector<16x32xf32>
    %cst_55 = arith.constant dense<0.000000e+00> : vector<16xf32>
    %157 = vector.multi_reduction <add>, %156, %cst_55 [1] : vector<16x32xf32> to vector<16xf32>
    %158 = vector.shape_cast %157 : vector<16xf32> to vector<16x1xf32>
    %cst_56 = arith.constant 3.200000e+01 : f32
    %159 = vector.broadcast %cst_56 : f32 to vector<16x1xf32>
    %160 = arith.divf %158, %159 : vector<16x1xf32>
    %161 = vector.broadcast %160 : vector<16x1xf32> to vector<16x32xf32>
    %162 = arith.subf %156, %161 : vector<16x32xf32>
    %163 = arith.mulf %162, %162 : vector<16x32xf32>
    %cst_57 = arith.constant dense<0.000000e+00> : vector<16xf32>
    %164 = vector.multi_reduction <add>, %163, %cst_57 [1] : vector<16x32xf32> to vector<16xf32>
    %165 = vector.shape_cast %164 : vector<16xf32> to vector<16x1xf32>
    %cst_58 = arith.constant 3.200000e+01 : f32
    %166 = vector.broadcast %cst_58 : f32 to vector<16x1xf32>
    %167 = arith.divf %165, %166 : vector<16x1xf32>
    %168 = vector.broadcast %160 : vector<16x1xf32> to vector<16x32xf32>
    %169 = arith.subf %156, %168 : vector<16x32xf32>
    %cst_59 = arith.constant 9.99999974E-6 : f32
    %170 = vector.broadcast %cst_59 : f32 to vector<16x1xf32>
    %171 = arith.addf %167, %170 : vector<16x1xf32>
    %172 = math.rsqrt %171 : vector<16x1xf32>
    %173 = vector.broadcast %172 : vector<16x1xf32> to vector<16x32xf32>
    %174 = arith.mulf %169, %173 : vector<16x32xf32>
    %175 = vector.broadcast %9 : vector<1x32xf32> to vector<16x32xf32>
    %176 = arith.mulf %174, %175 : vector<16x32xf32>
    %177 = vector.broadcast %10 : vector<1x32xf32> to vector<16x32xf32>
    %178 = arith.addf %176, %177 : vector<16x32xf32>
    %c0_60 = arith.constant 0 : index
    %c0_61 = arith.constant 0 : index
    %179 = vector.load %arg7[%c0_60, %c0_61] : memref<32x32xf32, #tpu.memory_space<vmem>>, vector<32x32xf32>
    %cst_62 = arith.constant dense<0.000000e+00> : vector<16x32xf32>
    %180 = tpu.matmul %178, %179, %cst_62 {dimension_numbers = #tpu.dot_dimension_numbers<[1], [0], [0], [1], [0, 0, 1, 1], [], []>} : vector<16x32xf32>, vector<32x32xf32>, vector<16x32xf32> -> vector<16x32xf32>
    %181 = vector.broadcast %14 : vector<1x32xf32> to vector<16x32xf32>
    %182 = arith.addf %180, %181 : vector<16x32xf32>
    %cst_63 = arith.constant 5.000000e-01 : f32
    %183 = vector.broadcast %cst_63 : f32 to vector<16x32xf32>
    %184 = arith.mulf %183, %182 : vector<16x32xf32>
    %cst_64 = arith.constant 0.707106769 : f32
    %185 = vector.broadcast %cst_64 : f32 to vector<16x32xf32>
    %186 = arith.mulf %182, %185 : vector<16x32xf32>
    %187 = math.erf %186 : vector<16x32xf32>
    %cst_65 = arith.constant 1.000000e+00 : f32
    %188 = vector.broadcast %cst_65 : f32 to vector<16x32xf32>
    %189 = arith.addf %188, %187 : vector<16x32xf32>
    %190 = arith.mulf %184, %189 : vector<16x32xf32>
    %c0_66 = arith.constant 0 : index
    %c0_67 = arith.constant 0 : index
    %191 = vector.load %arg8[%c0_66, %c0_67] : memref<32x32xf32, #tpu.memory_space<vmem>>, vector<32x32xf32>
    %cst_68 = arith.constant dense<0.000000e+00> : vector<16x32xf32>
    %192 = tpu.matmul %190, %191, %cst_68 {dimension_numbers = #tpu.dot_dimension_numbers<[1], [0], [0], [1], [0, 0, 1, 1], [], []>} : vector<16x32xf32>, vector<32x32xf32>, vector<16x32xf32> -> vector<16x32xf32>
    %193 = vector.broadcast %15 : vector<1x32xf32> to vector<16x32xf32>
    %194 = arith.addf %192, %193 : vector<16x32xf32>
    %195 = arith.addf %156, %194 : vector<16x32xf32>
    %196 = vector.shape_cast %195 : vector<16x32xf32> to vector<2x8x32xf32>
    %c0_69 = arith.constant 0 : index
    %c0_70 = arith.constant 0 : index
    %c0_71 = arith.constant 0 : index
    %197 = vector.load %arg9[%c0_69, %c0_70, %c0_71] : memref<2x8x32xf32, #tpu.memory_space<vmem>>, vector<2x8x32xf32>
    tpu.vector_store %arg9[%c0_69, %c0_70, %c0_71], %196 {strides = array<i32>} : memref<2x8x32xf32, #tpu.memory_space<vmem>>, vector<2x8x32xf32>,
    return
  }
  func.func @transform_0(%arg0: i32) -> (i32, i32, i32) {
    %c0_i32 = arith.constant 0 : i32
    %c0_i32_0 = arith.constant 0 : i32
    %c0_i32_1 = arith.constant 0 : i32
    return %arg0, %c0_i32, %c0_i32_0 : i32, i32, i32
  }
  func.func @transform_1(%arg0: i32) -> (i32, i32, i32) {
    %c0_i32 = arith.constant 0 : i32
    %c0_i32_0 = arith.constant 0 : i32
    %c0_i32_1 = arith.constant 0 : i32
    return %arg0, %c0_i32, %c0_i32_0 : i32, i32, i32
  }
  func.func @transform_2(%arg0: i32) -> (i32, i32) {
    %c0_i32 = arith.constant 0 : i32
    %c0_i32_0 = arith.constant 0 : i32
    %c0_i32_1 = arith.constant 0 : i32
    return %c0_i32, %c0_i32_0 : i32, i32
  }
  func.func @transform_3(%arg0: i32) -> (i32, i32) {
    %c0_i32 = arith.constant 0 : i32
    %c0_i32_0 = arith.constant 0 : i32
    %c0_i32_1 = arith.constant 0 : i32
    return %c0_i32, %c0_i32_0 : i32, i32
  }
  func.func @transform_4(%arg0: i32) -> (i32, i32) {
    %c0_i32 = arith.constant 0 : i32
    %c0_i32_0 = arith.constant 0 : i32
    %c0_i32_1 = arith.constant 0 : i32
    return %c0_i32, %c0_i32_0 : i32, i32
  }
  func.func @transform_5(%arg0: i32) -> (i32, i32) {
    %c0_i32 = arith.constant 0 : i32
    %c0_i32_0 = arith.constant 0 : i32
    %c0_i32_1 = arith.constant 0 : i32
    return %c0_i32, %c0_i32_0 : i32, i32
  }
  func.func @transform_6(%arg0: i32) -> (i32, i32) {
    %c0_i32 = arith.constant 0 : i32
    %c0_i32_0 = arith.constant 0 : i32
    %c0_i32_1 = arith.constant 0 : i32
    return %c0_i32, %c0_i32_0 : i32, i32
  }
  func.func @transform_7(%arg0: i32) -> (i32, i32) {
    %c0_i32 = arith.constant 0 : i32
    %c0_i32_0 = arith.constant 0 : i32
    %c0_i32_1 = arith.constant 0 : i32
    return %c0_i32, %c0_i32_0 : i32, i32
  }
  func.func @transform_8(%arg0: i32) -> (i32, i32, i32) {
    %c0_i32 = arith.constant 0 : i32
    %c0_i32_0 = arith.constant 0 : i32
    %c0_i32_1 = arith.constant 0 : i32
    return %arg0, %c0_i32, %c0_i32_0 : i32, i32, i32
  }
}

module attributes {stable_mosaic.version = 11 : i64} {
  func.func @cross_attention_kernel(%arg0: i32, %arg1: memref<2x16x32xf32, #tpu.memory_space<vmem>>, %arg2: memref<2x8x32xf32, #tpu.memory_space<vmem>>, %arg3: memref<11x512xf32, #tpu.memory_space<vmem>>, %arg4: memref<32x256xf32, #tpu.memory_space<vmem>>, %arg5: memref<32x512xf32, #tpu.memory_space<vmem>>, %arg6: memref<256x32xf32, #tpu.memory_space<vmem>>, %arg7: memref<32x32xf32, #tpu.memory_space<vmem>>, %arg8: memref<32x32xf32, #tpu.memory_space<vmem>>, %arg9: memref<2x8x32xf32, #tpu.memory_space<vmem>>, %arg10: memref<16x32xf32, #tpu.memory_space<vmem>>) attributes {dimension_semantics = [#tpu.dimension_semantics<parallel>], iteration_bounds = array<i64: 1>, scalar_prefetch = 0 : i64, scratch_operands = 1 : i64, tpu.core_type = #tpu.core_type<tc>, window_params = [{transform_indices = @transform_0, window_bounds = array<i64: 2, 16, 32>}, {transform_indices = @transform_1, window_bounds = array<i64: 2, 8, 32>}, {pipeline_mode = #tpu.pipeline_mode<synchronous>, transform_indices = @transform_2, window_bounds = array<i64: 11, 512>}, {pipeline_mode = #tpu.pipeline_mode<synchronous>, transform_indices = @transform_3, window_bounds = array<i64: 32, 256>}, {pipeline_mode = #tpu.pipeline_mode<synchronous>, transform_indices = @transform_4, window_bounds = array<i64: 32, 512>}, {pipeline_mode = #tpu.pipeline_mode<synchronous>, transform_indices = @transform_5, window_bounds = array<i64: 256, 32>}, {pipeline_mode = #tpu.pipeline_mode<synchronous>, transform_indices = @transform_6, window_bounds = array<i64: 32, 32>}, {pipeline_mode = #tpu.pipeline_mode<synchronous>, transform_indices = @transform_7, window_bounds = array<i64: 32, 32>}, {transform_indices = @transform_8, window_bounds = array<i64: 2, 8, 32>}]} {
    %c0 = arith.constant 0 : index
    %c0_0 = arith.constant 0 : index
    %c0_1 = arith.constant 0 : index
    %0 = vector.load %arg1[%c0, %c0_0, %c0_1] : memref<2x16x32xf32, #tpu.memory_space<vmem>>, vector<2x16x32xf32>
    %1 = vector.shape_cast %0 : vector<2x16x32xf32> to vector<32x32xf32>
    %c0_2 = arith.constant 0 : index
    %c0_3 = arith.constant 0 : index
    %c0_4 = arith.constant 0 : index
    %2 = vector.load %arg2[%c0_2, %c0_3, %c0_4] : memref<2x8x32xf32, #tpu.memory_space<vmem>>, vector<2x8x32xf32>
    %3 = vector.shape_cast %2 : vector<2x8x32xf32> to vector<16x32xf32>
    %c0_5 = arith.constant 0 : index
    %c0_6 = arith.constant 0 : index
    %4 = vector.load %arg3[%c0_5, %c0_6] : memref<11x512xf32, #tpu.memory_space<vmem>>, vector<11x512xf32>
    %5 = vector.extract_strided_slice %4 {offsets = [0, 0], sizes = [1, 32], strides = [1, 1]} : vector<11x512xf32> to vector<1x32xf32>
    %6 = vector.extract_strided_slice %4 {offsets = [1, 0], sizes = [1, 32], strides = [1, 1]} : vector<11x512xf32> to vector<1x32xf32>
    %7 = vector.extract_strided_slice %4 {offsets = [2, 0], sizes = [1, 32], strides = [1, 1]} : vector<11x512xf32> to vector<1x32xf32>
    %8 = vector.extract_strided_slice %4 {offsets = [3, 0], sizes = [1, 32], strides = [1, 1]} : vector<11x512xf32> to vector<1x32xf32>
    %9 = vector.extract_strided_slice %4 {offsets = [4, 0], sizes = [1, 32], strides = [1, 1]} : vector<11x512xf32> to vector<1x32xf32>
    %10 = vector.extract_strided_slice %4 {offsets = [5, 0], sizes = [1, 32], strides = [1, 1]} : vector<11x512xf32> to vector<1x32xf32>
    %11 = vector.extract_strided_slice %4 {offsets = [6, 0], sizes = [1, 256], strides = [1, 1]} : vector<11x512xf32> to vector<1x256xf32>
    %12 = vector.extract_strided_slice %4 {offsets = [7, 0], sizes = [1, 512], strides = [1, 1]} : vector<11x512xf32> to vector<1x512xf32>
    %13 = vector.extract_strided_slice %4 {offsets = [8, 0], sizes = [1, 32], strides = [1, 1]} : vector<11x512xf32> to vector<1x32xf32>
    %14 = vector.extract_strided_slice %4 {offsets = [9, 0], sizes = [1, 32], strides = [1, 1]} : vector<11x512xf32> to vector<1x32xf32>
    %15 = vector.extract_strided_slice %4 {offsets = [10, 0], sizes = [1, 32], strides = [1, 1]} : vector<11x512xf32> to vector<1x32xf32>
    %cst = arith.constant dense<0.000000e+00> : vector<32xf32>
    %16 = vector.multi_reduction <add>, %1, %cst [1] : vector<32x32xf32> to vector<32xf32>
    %17 = vector.shape_cast %16 : vector<32xf32> to vector<32x1xf32>
    %cst_7 = arith.constant 3.200000e+01 : f32
    %18 = vector.broadcast %cst_7 : f32 to vector<32x1xf32>
    %19 = arith.divf %17, %18 : vector<32x1xf32>
    %20 = vector.broadcast %19 : vector<32x1xf32> to vector<32x32xf32>
    %21 = arith.subf %1, %20 : vector<32x32xf32>
    %22 = arith.mulf %21, %21 : vector<32x32xf32>
    %cst_8 = arith.constant dense<0.000000e+00> : vector<32xf32>
    %23 = vector.multi_reduction <add>, %22, %cst_8 [1] : vector<32x32xf32> to vector<32xf32>
    %24 = vector.shape_cast %23 : vector<32xf32> to vector<32x1xf32>
    %cst_9 = arith.constant 3.200000e+01 : f32
    %25 = vector.broadcast %cst_9 : f32 to vector<32x1xf32>
    %26 = arith.divf %24, %25 : vector<32x1xf32>
    %27 = vector.broadcast %19 : vector<32x1xf32> to vector<32x32xf32>
    %28 = arith.subf %1, %27 : vector<32x32xf32>
    %cst_10 = arith.constant 9.99999974E-6 : f32
    %29 = vector.broadcast %cst_10 : f32 to vector<32x1xf32>
    %30 = arith.addf %26, %29 : vector<32x1xf32>
    %31 = math.rsqrt %30 : vector<32x1xf32>
    %32 = vector.broadcast %31 : vector<32x1xf32> to vector<32x32xf32>
    %33 = arith.mulf %28, %32 : vector<32x32xf32>
    %34 = vector.broadcast %5 : vector<1x32xf32> to vector<32x32xf32>
    %35 = arith.mulf %33, %34 : vector<32x32xf32>
    %36 = vector.broadcast %6 : vector<1x32xf32> to vector<32x32xf32>
    %37 = arith.addf %35, %36 : vector<32x32xf32>
    %cst_11 = arith.constant dense<0.000000e+00> : vector<16xf32>
    %38 = vector.multi_reduction <add>, %3, %cst_11 [1] : vector<16x32xf32> to vector<16xf32>
    %39 = vector.shape_cast %38 : vector<16xf32> to vector<16x1xf32>
    %cst_12 = arith.constant 3.200000e+01 : f32
    %40 = vector.broadcast %cst_12 : f32 to vector<16x1xf32>
    %41 = arith.divf %39, %40 : vector<16x1xf32>
    %42 = vector.broadcast %41 : vector<16x1xf32> to vector<16x32xf32>
    %43 = arith.subf %3, %42 : vector<16x32xf32>
    %44 = arith.mulf %43, %43 : vector<16x32xf32>
    %cst_13 = arith.constant dense<0.000000e+00> : vector<16xf32>
    %45 = vector.multi_reduction <add>, %44, %cst_13 [1] : vector<16x32xf32> to vector<16xf32>
    %46 = vector.shape_cast %45 : vector<16xf32> to vector<16x1xf32>
    %cst_14 = arith.constant 3.200000e+01 : f32
    %47 = vector.broadcast %cst_14 : f32 to vector<16x1xf32>
    %48 = arith.divf %46, %47 : vector<16x1xf32>
    %49 = vector.broadcast %41 : vector<16x1xf32> to vector<16x32xf32>
    %50 = arith.subf %3, %49 : vector<16x32xf32>
    %cst_15 = arith.constant 9.99999974E-6 : f32
    %51 = vector.broadcast %cst_15 : f32 to vector<16x1xf32>
    %52 = arith.addf %48, %51 : vector<16x1xf32>
    %53 = math.rsqrt %52 : vector<16x1xf32>
    %54 = vector.broadcast %53 : vector<16x1xf32> to vector<16x32xf32>
    %55 = arith.mulf %50, %54 : vector<16x32xf32>
    %56 = vector.broadcast %7 : vector<1x32xf32> to vector<16x32xf32>
    %57 = arith.mulf %55, %56 : vector<16x32xf32>
    %58 = vector.broadcast %8 : vector<1x32xf32> to vector<16x32xf32>
    %59 = arith.addf %57, %58 : vector<16x32xf32>
    %c0_16 = arith.constant 0 : index
    %c0_17 = arith.constant 0 : index
    %60 = vector.load %arg5[%c0_16, %c0_17] : memref<32x512xf32, #tpu.memory_space<vmem>>, vector<32x512xf32>
    %cst_18 = arith.constant dense<0.000000e+00> : vector<32x512xf32>
    %61 = tpu.matmul %37, %60, %cst_18 {dimension_numbers = #tpu.dot_dimension_numbers<[1], [0], [0], [1], [0, 0, 1, 1], [], []>} : vector<32x32xf32>, vector<32x512xf32>, vector<32x512xf32> -> vector<32x512xf32>
    %62 = vector.broadcast %12 : vector<1x512xf32> to vector<32x512xf32>
    %63 = arith.addf %61, %62 : vector<32x512xf32>
    %c0_19 = arith.constant 0 : index
    %c0_20 = arith.constant 0 : index
    %64 = vector.load %arg4[%c0_19, %c0_20] : memref<32x256xf32, #tpu.memory_space<vmem>>, vector<32x256xf32>
    %cst_21 = arith.constant dense<0.000000e+00> : vector<16x256xf32>
    %65 = tpu.matmul %59, %64, %cst_21 {dimension_numbers = #tpu.dot_dimension_numbers<[1], [0], [0], [1], [0, 0, 1, 1], [], []>} : vector<16x32xf32>, vector<32x256xf32>, vector<16x256xf32> -> vector<16x256xf32>
    %66 = vector.broadcast %11 : vector<1x256xf32> to vector<16x256xf32>
    %67 = arith.addf %65, %66 : vector<16x256xf32>
    %c0_22 = arith.constant 0 : index
    %c0_23 = arith.constant 0 : index
    %68 = vector.load %arg6[%c0_22, %c0_23] : memref<256x32xf32, #tpu.memory_space<vmem>>, vector<256x32xf32>
    %69 = vector.extract_strided_slice %67 {offsets = [0, 0], sizes = [8, 256], strides = [1, 1]} : vector<16x256xf32> to vector<8x256xf32>
    %70 = vector.extract_strided_slice %63 {offsets = [0, 0], sizes = [16, 512], strides = [1, 1]} : vector<32x512xf32> to vector<16x512xf32>
    %cst_24 = arith.constant 0.000000e+00 : f32
    %71 = vector.broadcast %cst_24 : f32 to vector<8x32xf32>
    %72 = vector.extract_strided_slice %69 {offsets = [0, 0], sizes = [8, 128], strides = [1, 1]} : vector<8x256xf32> to vector<8x128xf32>
    %73 = vector.extract_strided_slice %70 {offsets = [0, 0], sizes = [16, 128], strides = [1, 1]} : vector<16x512xf32> to vector<16x128xf32>
    %74 = vector.extract_strided_slice %70 {offsets = [0, 256], sizes = [16, 128], strides = [1, 1]} : vector<16x512xf32> to vector<16x128xf32>
    %cst_25 = arith.constant dense<0.000000e+00> : vector<8x16xf32>
    %75 = tpu.matmul %72, %73, %cst_25 {dimension_numbers = #tpu.dot_dimension_numbers<[1], [1], [0], [0], [0, 0, 1, 0], [], []>} : vector<8x128xf32>, vector<16x128xf32>, vector<8x16xf32> -> vector<8x16xf32>
    %cst_26 = arith.constant 2.500000e-01 : f32
    %76 = vector.broadcast %cst_26 : f32 to vector<8x16xf32>
    %77 = arith.mulf %75, %76 : vector<8x16xf32>
    %cst_27 = arith.constant dense<0xFF800000> : vector<8xf32>
    %78 = vector.multi_reduction <maximumf>, %77, %cst_27 [1] : vector<8x16xf32> to vector<8xf32>
    %79 = vector.shape_cast %78 : vector<8xf32> to vector<8x1xf32>
    %80 = vector.broadcast %79 : vector<8x1xf32> to vector<8x16xf32>
    %81 = arith.subf %77, %80 : vector<8x16xf32>
    %82 = math.exp %81 : vector<8x16xf32>
    %cst_28 = arith.constant dense<0.000000e+00> : vector<8xf32>
    %83 = vector.multi_reduction <add>, %82, %cst_28 [1] : vector<8x16xf32> to vector<8xf32>
    %84 = vector.shape_cast %83 : vector<8xf32> to vector<8x1xf32>
    %85 = vector.broadcast %84 : vector<8x1xf32> to vector<8x16xf32>
    %86 = arith.divf %82, %85 : vector<8x16xf32>
    %cst_29 = arith.constant dense<0.000000e+00> : vector<8x128xf32>
    %87 = tpu.matmul %86, %74, %cst_29 {dimension_numbers = #tpu.dot_dimension_numbers<[1], [0], [0], [1], [0, 0, 1, 1], [], []>} : vector<8x16xf32>, vector<16x128xf32>, vector<8x128xf32> -> vector<8x128xf32>
    %88 = vector.extract_strided_slice %68 {offsets = [0, 0], sizes = [128, 32], strides = [1, 1]} : vector<256x32xf32> to vector<128x32xf32>
    %cst_30 = arith.constant dense<0.000000e+00> : vector<8x32xf32>
    %89 = tpu.matmul %87, %88, %cst_30 {dimension_numbers = #tpu.dot_dimension_numbers<[1], [0], [0], [1], [0, 0, 1, 1], [], []>} : vector<8x128xf32>, vector<128x32xf32>, vector<8x32xf32> -> vector<8x32xf32>
    %90 = arith.addf %71, %89 : vector<8x32xf32>
    %91 = vector.extract_strided_slice %69 {offsets = [0, 128], sizes = [8, 128], strides = [1, 1]} : vector<8x256xf32> to vector<8x128xf32>
    %92 = vector.extract_strided_slice %70 {offsets = [0, 128], sizes = [16, 128], strides = [1, 1]} : vector<16x512xf32> to vector<16x128xf32>
    %93 = vector.extract_strided_slice %70 {offsets = [0, 384], sizes = [16, 128], strides = [1, 1]} : vector<16x512xf32> to vector<16x128xf32>
    %cst_31 = arith.constant dense<0.000000e+00> : vector<8x16xf32>
    %94 = tpu.matmul %91, %92, %cst_31 {dimension_numbers = #tpu.dot_dimension_numbers<[1], [1], [0], [0], [0, 0, 1, 0], [], []>} : vector<8x128xf32>, vector<16x128xf32>, vector<8x16xf32> -> vector<8x16xf32>
    %cst_32 = arith.constant 2.500000e-01 : f32
    %95 = vector.broadcast %cst_32 : f32 to vector<8x16xf32>
    %96 = arith.mulf %94, %95 : vector<8x16xf32>
    %cst_33 = arith.constant dense<0xFF800000> : vector<8xf32>
    %97 = vector.multi_reduction <maximumf>, %96, %cst_33 [1] : vector<8x16xf32> to vector<8xf32>
    %98 = vector.shape_cast %97 : vector<8xf32> to vector<8x1xf32>
    %99 = vector.broadcast %98 : vector<8x1xf32> to vector<8x16xf32>
    %100 = arith.subf %96, %99 : vector<8x16xf32>
    %101 = math.exp %100 : vector<8x16xf32>
    %cst_34 = arith.constant dense<0.000000e+00> : vector<8xf32>
    %102 = vector.multi_reduction <add>, %101, %cst_34 [1] : vector<8x16xf32> to vector<8xf32>
    %103 = vector.shape_cast %102 : vector<8xf32> to vector<8x1xf32>
    %104 = vector.broadcast %103 : vector<8x1xf32> to vector<8x16xf32>
    %105 = arith.divf %101, %104 : vector<8x16xf32>
    %cst_35 = arith.constant dense<0.000000e+00> : vector<8x128xf32>
    %106 = tpu.matmul %105, %93, %cst_35 {dimension_numbers = #tpu.dot_dimension_numbers<[1], [0], [0], [1], [0, 0, 1, 1], [], []>} : vector<8x16xf32>, vector<16x128xf32>, vector<8x128xf32> -> vector<8x128xf32>
    %107 = vector.extract_strided_slice %68 {offsets = [128, 0], sizes = [128, 32], strides = [1, 1]} : vector<256x32xf32> to vector<128x32xf32>
    %cst_36 = arith.constant dense<0.000000e+00> : vector<8x32xf32>
    %108 = tpu.matmul %106, %107, %cst_36 {dimension_numbers = #tpu.dot_dimension_numbers<[1], [0], [0], [1], [0, 0, 1, 1], [], []>} : vector<8x128xf32>, vector<128x32xf32>, vector<8x32xf32> -> vector<8x32xf32>
    %109 = arith.addf %90, %108 : vector<8x32xf32>
    %c0_37 = arith.constant 0 : index
    %c0_38 = arith.constant 0 : index
    %110 = vector.load %arg10[%c0_37, %c0_38] : memref<16x32xf32, #tpu.memory_space<vmem>>, vector<8x32xf32>
    tpu.vector_store %arg10[%c0_37, %c0_38], %109 {strides = array<i32>} : memref<16x32xf32, #tpu.memory_space<vmem>>, vector<8x32xf32>,
    %111 = vector.extract_strided_slice %67 {offsets = [8, 0], sizes = [8, 256], strides = [1, 1]} : vector<16x256xf32> to vector<8x256xf32>
    %112 = vector.extract_strided_slice %63 {offsets = [16, 0], sizes = [16, 512], strides = [1, 1]} : vector<32x512xf32> to vector<16x512xf32>
    %cst_39 = arith.constant 0.000000e+00 : f32
    %113 = vector.broadcast %cst_39 : f32 to vector<8x32xf32>
    %114 = vector.extract_strided_slice %111 {offsets = [0, 0], sizes = [8, 128], strides = [1, 1]} : vector<8x256xf32> to vector<8x128xf32>
    %115 = vector.extract_strided_slice %112 {offsets = [0, 0], sizes = [16, 128], strides = [1, 1]} : vector<16x512xf32> to vector<16x128xf32>
    %116 = vector.extract_strided_slice %112 {offsets = [0, 256], sizes = [16, 128], strides = [1, 1]} : vector<16x512xf32> to vector<16x128xf32>
    %cst_40 = arith.constant dense<0.000000e+00> : vector<8x16xf32>
    %117 = tpu.matmul %114, %115, %cst_40 {dimension_numbers = #tpu.dot_dimension_numbers<[1], [1], [0], [0], [0, 0, 1, 0], [], []>} : vector<8x128xf32>, vector<16x128xf32>, vector<8x16xf32> -> vector<8x16xf32>
    %cst_41 = arith.constant 2.500000e-01 : f32
    %118 = vector.broadcast %cst_41 : f32 to vector<8x16xf32>
    %119 = arith.mulf %117, %118 : vector<8x16xf32>
    %cst_42 = arith.constant dense<0xFF800000> : vector<8xf32>
    %120 = vector.multi_reduction <maximumf>, %119, %cst_42 [1] : vector<8x16xf32> to vector<8xf32>
    %121 = vector.shape_cast %120 : vector<8xf32> to vector<8x1xf32>
    %122 = vector.broadcast %121 : vector<8x1xf32> to vector<8x16xf32>
    %123 = arith.subf %119, %122 : vector<8x16xf32>
    %124 = math.exp %123 : vector<8x16xf32>
    %cst_43 = arith.constant dense<0.000000e+00> : vector<8xf32>
    %125 = vector.multi_reduction <add>, %124, %cst_43 [1] : vector<8x16xf32> to vector<8xf32>
    %126 = vector.shape_cast %125 : vector<8xf32> to vector<8x1xf32>
    %127 = vector.broadcast %126 : vector<8x1xf32> to vector<8x16xf32>
    %128 = arith.divf %124, %127 : vector<8x16xf32>
    %cst_44 = arith.constant dense<0.000000e+00> : vector<8x128xf32>
    %129 = tpu.matmul %128, %116, %cst_44 {dimension_numbers = #tpu.dot_dimension_numbers<[1], [0], [0], [1], [0, 0, 1, 1], [], []>} : vector<8x16xf32>, vector<16x128xf32>, vector<8x128xf32> -> vector<8x128xf32>
    %130 = vector.extract_strided_slice %68 {offsets = [0, 0], sizes = [128, 32], strides = [1, 1]} : vector<256x32xf32> to vector<128x32xf32>
    %cst_45 = arith.constant dense<0.000000e+00> : vector<8x32xf32>
    %131 = tpu.matmul %129, %130, %cst_45 {dimension_numbers = #tpu.dot_dimension_numbers<[1], [0], [0], [1], [0, 0, 1, 1], [], []>} : vector<8x128xf32>, vector<128x32xf32>, vector<8x32xf32> -> vector<8x32xf32>
    %132 = arith.addf %113, %131 : vector<8x32xf32>
    %133 = vector.extract_strided_slice %111 {offsets = [0, 128], sizes = [8, 128], strides = [1, 1]} : vector<8x256xf32> to vector<8x128xf32>
    %134 = vector.extract_strided_slice %112 {offsets = [0, 128], sizes = [16, 128], strides = [1, 1]} : vector<16x512xf32> to vector<16x128xf32>
    %135 = vector.extract_strided_slice %112 {offsets = [0, 384], sizes = [16, 128], strides = [1, 1]} : vector<16x512xf32> to vector<16x128xf32>
    %cst_46 = arith.constant dense<0.000000e+00> : vector<8x16xf32>
    %136 = tpu.matmul %133, %134, %cst_46 {dimension_numbers = #tpu.dot_dimension_numbers<[1], [1], [0], [0], [0, 0, 1, 0], [], []>} : vector<8x128xf32>, vector<16x128xf32>, vector<8x16xf32> -> vector<8x16xf32>
    %cst_47 = arith.constant 2.500000e-01 : f32
    %137 = vector.broadcast %cst_47 : f32 to vector<8x16xf32>
    %138 = arith.mulf %136, %137 : vector<8x16xf32>
    %cst_48 = arith.constant dense<0xFF800000> : vector<8xf32>
    %139 = vector.multi_reduction <maximumf>, %138, %cst_48 [1] : vector<8x16xf32> to vector<8xf32>
    %140 = vector.shape_cast %139 : vector<8xf32> to vector<8x1xf32>
    %141 = vector.broadcast %140 : vector<8x1xf32> to vector<8x16xf32>
    %142 = arith.subf %138, %141 : vector<8x16xf32>
    %143 = math.exp %142 : vector<8x16xf32>
    %cst_49 = arith.constant dense<0.000000e+00> : vector<8xf32>
    %144 = vector.multi_reduction <add>, %143, %cst_49 [1] : vector<8x16xf32> to vector<8xf32>
    %145 = vector.shape_cast %144 : vector<8xf32> to vector<8x1xf32>
    %146 = vector.broadcast %145 : vector<8x1xf32> to vector<8x16xf32>
    %147 = arith.divf %143, %146 : vector<8x16xf32>
    %cst_50 = arith.constant dense<0.000000e+00> : vector<8x128xf32>
    %148 = tpu.matmul %147, %135, %cst_50 {dimension_numbers = #tpu.dot_dimension_numbers<[1], [0], [0], [1], [0, 0, 1, 1], [], []>} : vector<8x16xf32>, vector<16x128xf32>, vector<8x128xf32> -> vector<8x128xf32>
    %149 = vector.extract_strided_slice %68 {offsets = [128, 0], sizes = [128, 32], strides = [1, 1]} : vector<256x32xf32> to vector<128x32xf32>
    %cst_51 = arith.constant dense<0.000000e+00> : vector<8x32xf32>
    %150 = tpu.matmul %148, %149, %cst_51 {dimension_numbers = #tpu.dot_dimension_numbers<[1], [0], [0], [1], [0, 0, 1, 1], [], []>} : vector<8x128xf32>, vector<128x32xf32>, vector<8x32xf32> -> vector<8x32xf32>
    %151 = arith.addf %132, %150 : vector<8x32xf32>
    %c8 = arith.constant 8 : index
    %c0_52 = arith.constant 0 : index
    %152 = vector.load %arg10[%c8, %c0_52] : memref<16x32xf32, #tpu.memory_space<vmem>>, vector<8x32xf32>
    tpu.vector_store %arg10[%c8, %c0_52], %151 {strides = array<i32>} : memref<16x32xf32, #tpu.memory_space<vmem>>, vector<8x32xf32>,
    %c0_53 = arith.constant 0 : index
    %c0_54 = arith.constant 0 : index
    %153 = vector.load %arg10[%c0_53, %c0_54] : memref<16x32xf32, #tpu.memory_space<vmem>>, vector<16x32xf32>
    %154 = vector.broadcast %13 : vector<1x32xf32> to vector<16x32xf32>
    %155 = arith.addf %153, %154 : vector<16x32xf32>
    %156 = arith.addf %3, %155 : vector<16x32xf32>
    %cst_55 = arith.constant dense<0.000000e+00> : vector<16xf32>
    %157 = vector.multi_reduction <add>, %156, %cst_55 [1] : vector<16x32xf32> to vector<16xf32>
    %158 = vector.shape_cast %157 : vector<16xf32> to vector<16x1xf32>
    %cst_56 = arith.constant 3.200000e+01 : f32
    %159 = vector.broadcast %cst_56 : f32 to vector<16x1xf32>
    %160 = arith.divf %158, %159 : vector<16x1xf32>
    %161 = vector.broadcast %160 : vector<16x1xf32> to vector<16x32xf32>
    %162 = arith.subf %156, %161 : vector<16x32xf32>
    %163 = arith.mulf %162, %162 : vector<16x32xf32>
    %cst_57 = arith.constant dense<0.000000e+00> : vector<16xf32>
    %164 = vector.multi_reduction <add>, %163, %cst_57 [1] : vector<16x32xf32> to vector<16xf32>
    %165 = vector.shape_cast %164 : vector<16xf32> to vector<16x1xf32>
    %cst_58 = arith.constant 3.200000e+01 : f32
    %166 = vector.broadcast %cst_58 : f32 to vector<16x1xf32>
    %167 = arith.divf %165, %166 : vector<16x1xf32>
    %168 = vector.broadcast %160 : vector<16x1xf32> to vector<16x32xf32>
    %169 = arith.subf %156, %168 : vector<16x32xf32>
    %cst_59 = arith.constant 9.99999974E-6 : f32
    %170 = vector.broadcast %cst_59 : f32 to vector<16x1xf32>
    %171 = arith.addf %167, %170 : vector<16x1xf32>
    %172 = math.rsqrt %171 : vector<16x1xf32>
    %173 = vector.broadcast %172 : vector<16x1xf32> to vector<16x32xf32>
    %174 = arith.mulf %169, %173 : vector<16x32xf32>
    %175 = vector.broadcast %9 : vector<1x32xf32> to vector<16x32xf32>
    %176 = arith.mulf %174, %175 : vector<16x32xf32>
    %177 = vector.broadcast %10 : vector<1x32xf32> to vector<16x32xf32>
    %178 = arith.addf %176, %177 : vector<16x32xf32>
    %c0_60 = arith.constant 0 : index
    %c0_61 = arith.constant 0 : index
    %179 = vector.load %arg7[%c0_60, %c0_61] : memref<32x32xf32, #tpu.memory_space<vmem>>, vector<32x32xf32>
    %cst_62 = arith.constant dense<0.000000e+00> : vector<16x32xf32>
    %180 = tpu.matmul %178, %179, %cst_62 {dimension_numbers = #tpu.dot_dimension_numbers<[1], [0], [0], [1], [0, 0, 1, 1], [], []>} : vector<16x32xf32>, vector<32x32xf32>, vector<16x32xf32> -> vector<16x32xf32>
    %181 = vector.broadcast %14 : vector<1x32xf32> to vector<16x32xf32>
    %182 = arith.addf %180, %181 : vector<16x32xf32>
    %cst_63 = arith.constant 5.000000e-01 : f32
    %183 = vector.broadcast %cst_63 : f32 to vector<16x32xf32>
    %184 = arith.mulf %183, %182 : vector<16x32xf32>
    %cst_64 = arith.constant 0.707106769 : f32
    %185 = vector.broadcast %cst_64 : f32 to vector<16x32xf32>
    %186 = arith.mulf %182, %185 : vector<16x32xf32>
    %187 = math.erf %186 : vector<16x32xf32>
    %cst_65 = arith.constant 1.000000e+00 : f32
    %188 = vector.broadcast %cst_65 : f32 to vector<16x32xf32>
    %189 = arith.addf %188, %187 : vector<16x32xf32>
    %190 = arith.mulf %184, %189 : vector<16x32xf32>
    %c0_66 = arith.constant 0 : index
    %c0_67 = arith.constant 0 : index
    %191 = vector.load %arg8[%c0_66, %c0_67] : memref<32x32xf32, #tpu.memory_space<vmem>>, vector<32x32xf32>
    %cst_68 = arith.constant dense<0.000000e+00> : vector<16x32xf32>
    %192 = tpu.matmul %190, %191, %cst_68 {dimension_numbers = #tpu.dot_dimension_numbers<[1], [0], [0], [1], [0, 0, 1, 1], [], []>} : vector<16x32xf32>, vector<32x32xf32>, vector<16x32xf32> -> vector<16x32xf32>
    %193 = vector.broadcast %15 : vector<1x32xf32> to vector<16x32xf32>
    %194 = arith.addf %192, %193 : vector<16x32xf32>
    %195 = arith.addf %156, %194 : vector<16x32xf32>
    %196 = vector.shape_cast %195 : vector<16x32xf32> to vector<2x8x32xf32>
    %c0_69 = arith.constant 0 : index
    %c0_70 = arith.constant 0 : index
    %c0_71 = arith.constant 0 : index
    %197 = vector.load %arg9[%c0_69, %c0_70, %c0_71] : memref<2x8x32xf32, #tpu.memory_space<vmem>>, vector<2x8x32xf32>
    tpu.vector_store %arg9[%c0_69, %c0_70, %c0_71], %196 {strides = array<i32>} : memref<2x8x32xf32, #tpu.memory_space<vmem>>, vector<2x8x32xf32>,
    return
  }
  func.func @transform_0(%arg0: i32) -> (i32, i32, i32) {
    %c0_i32 = arith.constant 0 : i32
    %c0_i32_0 = arith.constant 0 : i32
    %c0_i32_1 = arith.constant 0 : i32
    return %arg0, %c0_i32, %c0_i32_0 : i32, i32, i32
  }
  func.func @transform_1(%arg0: i32) -> (i32, i32, i32) {
    %c0_i32 = arith.constant 0 : i32
    %c0_i32_0 = arith.constant 0 : i32
    %c0_i32_1 = arith.constant 0 : i32
    return %arg0, %c0_i32, %c0_i32_0 : i32, i32, i32
  }
  func.func @transform_2(%arg0: i32) -> (i32, i32) {
    %c0_i32 = arith.constant 0 : i32
    %c0_i32_0 = arith.constant 0 : i32
    %c0_i32_1 = arith.constant 0 : i32
    return %c0_i32, %c0_i32_0 : i32, i32
  }
  func.func @transform_3(%arg0: i32) -> (i32, i32) {
    %c0_i32 = arith.constant 0 : i32
    %c0_i32_0 = arith.constant 0 : i32
    %c0_i32_1 = arith.constant 0 : i32
    return %c0_i32, %c0_i32_0 : i32, i32
  }
  func.func @transform_4(%arg0: i32) -> (i32, i32) {
    %c0_i32 = arith.constant 0 : i32
    %c0_i32_0 = arith.constant 0 : i32
    %c0_i32_1 = arith.constant 0 : i32
    return %c0_i32, %c0_i32_0 : i32, i32
  }
  func.func @transform_5(%arg0: i32) -> (i32, i32) {
    %c0_i32 = arith.constant 0 : i32
    %c0_i32_0 = arith.constant 0 : i32
    %c0_i32_1 = arith.constant 0 : i32
    return %c0_i32, %c0_i32_0 : i32, i32
  }
  func.func @transform_6(%arg0: i32) -> (i32, i32) {
    %c0_i32 = arith.constant 0 : i32
    %c0_i32_0 = arith.constant 0 : i32
    %c0_i32_1 = arith.constant 0 : i32
    return %c0_i32, %c0_i32_0 : i32, i32
  }
  func.func @transform_7(%arg0: i32) -> (i32, i32) {
    %c0_i32 = arith.constant 0 : i32
    %c0_i32_0 = arith.constant 0 : i32
    %c0_i32_1 = arith.constant 0 : i32
    return %c0_i32, %c0_i32_0 : i32, i32
  }
  func.func @transform_8(%arg0: i32) -> (i32, i32, i32) {
    %c0_i32 = arith.constant 0 : i32
    %c0_i32_0 = arith.constant 0 : i32
    %c0_i32_1 = arith.constant 0 : i32
    return %arg0, %c0_i32, %c0_i32_0 : i32, i32, i32
  }
}

</mosaic_0001>

<bundles_post_ra>
// kernel: tpu_custom_call.1
= control target key start
LH: loop header
LB: loop body
LE: loop exit
PB: predicated region body
PF: predicated region fallthrough
CT: control target
= control target key end

     0   :  { %13 = vsyncpa [#allocation4], 0  ;;  %s2925_s0 = inlined_call_operand.vmem [shape: f32[2,16,32], index: 0, kind: input, shape index: {}]   ;;  %s2926_s1 = inlined_call_operand.hbm [shape: f32[2,8,32], index: 1, kind: input, shape index: {}]   ;;  %s2927_s2 = inlined_call_operand.vmem [shape: f32[11,512], index: 2, kind: input, shape index: {}]   ;;  %s2928_s3 = inlined_call_operand.vmem [shape: f32[32,256], index: 3, kind: input, shape index: {}]   ;;  %s2929_s4 = inlined_call_operand.vmem [shape: f32[32,512], index: 4, kind: input, shape index: {}]   ;;  %s2930_s5 = inlined_call_operand.vmem [shape: f32[256,32], index: 5, kind: input, shape index: {}]   ;;  %s2931_s6 = inlined_call_operand.vmem [shape: f32[32,32], index: 6, kind: input, shape index: {}]   ;;  %s2932_s7 = inlined_call_operand.hbm [shape: f32[32,32], index: 7, kind: input, shape index: {}]   ;;  %s2933_s8 = inlined_call_operand.hbm [shape: f32[2,8,32], index: 8, kind: output, shape index: {}]  }
   0x1   :  { %14 = vsyncpa [#allocation7], 0 }
   0x2   :  { %15 = vsyncpa [#allocation5], 0  ;;  %s2311_s27 = smov [#allocation3]   ;;  %s2239_s9 = scalar_lea.hbm %s2926_s1, 256 }
   0x3   :  { %s23_s28 = sshll.u32 %s2311_s27, 4  ;;  %p2240_p0 = scmp.ne.s32.totalorder %s2926_s1, %s2239_s9  ;;  %s24_s28 = int_to_ptr.vmem [resolvable:$true] %s23_s28 }
   0x4   :  { %p2243_p1 = scmp.lt.u32.totalorder %s2239_s9, %s2926_s1 }
   0x6   :  { %p2245_p2 = pnand %p2243_p1, %p2240_p0 }
   0x8   :  { %2248 = shalt.err (!%p2245_p2)
}
   0x9   :  { %s2249_s14 = scalar_lea.vmem %s24_s28, 256  ;;  %p2254_p4 = scmp.lt.s32.totalorder %s24_s28, %s24_s28 }
   0xa   :  { %p2250_p3 = scmp.ne.s32.totalorder %s24_s28, %s2249_s14  ;;  %p2255_p5 = scmp.lt.s32.totalorder %s2249_s14, %s2249_s14 }
   0xc   :  { %p2256_p6 = por %p2255_p5, %p2254_p4 }
   0xe   :  { %p2257_p7 = pnand %p2256_p6, %p2250_p3 }
  0x10   :  { %2260 = shalt.err (!%p2257_p7)
}
  0x11   :  { %s2312_s15 = smov 128   ;;  %s2313_s16 = smov 8  }
  0x12   :  { %29 = dma.hbm_to_vmem [thread:$0]  %s2926_s1, 256, %s24_s28, [#allocation4], %s2312_s15, %s2312_s15, %s2313_s16  }
  0x13   :  { %s2314_s19 = smov [#allocation6]   ;;  %s2261_s23 = scalar_lea.hbm %s2932_s7, 512 }
  0x14   :  { %s45_s20 = sshll.u32 %s2314_s19, 4  ;;  %p2262_p8 = scmp.ne.s32.totalorder %s2932_s7, %s2261_s23  ;;  %s46_s20 = int_to_ptr.vmem [resolvable:$true] %s45_s20 }
  0x15   :  { %p2265_p9 = scmp.lt.u32.totalorder %s2261_s23, %s2932_s7 }
  0x17   :  { %p2267_p10 = pnand %p2265_p9, %p2262_p8 }
  0x19   :  { %2270 = shalt.err (!%p2267_p10)
}
  0x1a   :  { %s2271_s29 = scalar_lea.vmem %s46_s20, 512  ;;  %p2276_p12 = scmp.lt.s32.totalorder %s46_s20, %s46_s20 }
  0x1b   :  { %p2272_p11 = scmp.ne.s32.totalorder %s46_s20, %s2271_s29  ;;  %p2277_p13 = scmp.lt.s32.totalorder %s2271_s29, %s2271_s29 }
  0x1d   :  { %p2278_p0 = por %p2277_p13, %p2276_p12 }
  0x1f   :  { %p2279_p1 = pnand %p2278_p0, %p2272_p11 }
  0x21   :  { %2282 = shalt.err (!%p2279_p1)
}
  0x22   :  { %51 = dma.hbm_to_vmem [thread:$0]  %s2932_s7, 512, %s46_s20, [#allocation7], %s2312_s15, %s2312_s15, %s2313_s16  }
  0x23   :  { %2305 = dma.done.wait [#allocation4], 256  }
  0x24   :  { %2306 = vsyncadd [#allocation4], 4294967040 }
  0x25   :  { %2307 = dma.done.wait [#allocation7], 512  }
  0x26   :  { %2308 = vsyncadd [#allocation7], 4294966784  ;;  %vm69_vm0 = vcmask 261120   ;;  %v58_v0 = vld [vmem:[%s2925_s0] sm:$0xff]  ;;  %v60_v1 = vld [vmem:[%s2925_s0 + $0x10] sm:$0xff]  ;;  %v2315_v61 = vmov 0.0  }
  0x27   :  { %v59_v2 = vld [vmem:[%s2925_s0 + $0x8] sm:$0xff]  ;;  %v70_v3 = vsel %vm69_vm0, %v58_v0, 0.0  ;;  %v76_v4 = vsel %vm69_vm0, %v60_v1, 0.0  ;;  %v61_v5 = vld [vmem:[%s2925_s0 + $0x18] sm:$0xff]  ;;  %v2410_v8 = vld [vmem:[#allocation3] sm:$0xff]  ;;  %285 = vmatprep.mubr.f32.mxu0 %v2315_v61  ;;  %374 = vmatprep.mubr.f32.mxu1 %v2315_v61  ;;  %vm2317_vm1 = vmmov 0  }
  0x28   :  { %71 = vadd.xlane.f32.xlu0 %v70_v3  ;;  %77 = vadd.xlane.f32.xlu1 %v76_v4  ;;  %v73_v6 = vsel %vm69_vm0, %v59_v2, 0.0  ;;  %v79_v7 = vsel %vm69_vm0, %v61_v5, 0.0  ;;  %v139_v9 = vsel %vm69_vm0, %v2410_v8, 0.0  ;;  %v2439_v34 = vld [vmem:[#allocation3 + $0x8] sm:$0xff]  ;;  %v178_v37 = vld [vmem:[%s2929_s4 + $0x8] sm:$0xff]  ;;  %v177_v42 = vld [vmem:[%s2929_s4] sm:$0xff]  ;;  %v123_v3 = vlaneseq }
  0x29   :  { %v142_v36 = vsel %vm69_vm0, %v2439_v34, 0.0  ;;  %v182_v38 = vld [vmem:[%s2929_s4 + $0x28] sm:$0xff]  ;;  %v180_v39 = vld [vmem:[%s2929_s4 + $0x18] sm:$0xff]  ;;  %v181_v43 = vld [vmem:[%s2929_s4 + $0x20] sm:$0xff]  ;;  %vm601_vm2 = vcmask 130048  }
  0x2a   :  { %v2031_v40 = vpack.c.bf16 %v182_v38, %v178_v37  ;;  %v184_v41 = vld [vmem:[%s2929_s4 + $0x38] sm:$0xff]  ;;  %v2033_v45 = vpack.c.bf16 %v181_v43, %v177_v42  ;;  %v179_v46 = vld [vmem:[%s2929_s4 + $0x10] sm:$0xff]  ;;  %v186_v49 = vld [vmem:[%s2929_s4 + $0x48] sm:$0xff] }
  0x2b   :  { %v2039_v44 = vpack.c.bf16 %v184_v41, %v180_v39  ;;  %v183_v47 = vld [vmem:[%s2929_s4 + $0x30] sm:$0xff]  ;;  %v190_v50 = vld [vmem:[%s2929_s4 + $0x68] sm:$0xff]  ;;  %v188_v51 = vld [vmem:[%s2929_s4 + $0x58] sm:$0xff] }
  0x2c   :  { %74 = vadd.xlane.f32.xlu0 %v73_v6  ;;  %80 = vadd.xlane.f32.xlu1 %v79_v7  ;;  %v2041_v48 = vpack.c.bf16 %v183_v47, %v179_v46  ;;  %v2035_v52 = vpack.c.bf16 %v190_v50, %v186_v49  ;;  %v192_v53 = vld [vmem:[%s2929_s4 + $0x78] sm:$0xff]  ;;  %v185_v54 = vld [vmem:[%s2929_s4 + $0x40] sm:$0xff]  ;;  %v187_v58 = vld [vmem:[%s2929_s4 + $0x50] sm:$0xff] }
  0x2d   :  { %2032 = vmatprep.subr.bf16.mxu0 %v2031_v40  ;;  %2040 = vmatprep.subr.bf16.mxu1 %v2039_v44  ;;  %v189_v55 = vld [vmem:[%s2929_s4 + $0x60] sm:$0xff]  ;;  %v2043_v56 = vpack.c.bf16 %v192_v53, %v188_v51  ;;  %v191_v59 = vld [vmem:[%s2929_s4 + $0x70] sm:$0xff]  ;;  %v400_v62 = vld [vmem:[%s2928_s3 + $0x8] sm:$0xff] }
  0x2e   :  { %2034 = vmatpush1.bf16.msra.mxu0 %v2033_v45  ;;  %2042 = vmatpush1.bf16.msra.mxu1 %v2041_v48  ;;  %v2037_v57 = vpack.c.bf16 %v189_v55, %v185_v54  ;;  %v2045_v60 = vpack.c.bf16 %v191_v59, %v187_v58  ;;  %v402_v63 = vld [vmem:[%s2928_s3 + $0x18] sm:$0xff]  ;;  %v403_v48 = vld [vmem:[%s2928_s3 + $0x20] sm:$0xff]  ;;  %v405_v49 = vld [vmem:[%s2928_s3 + $0x30] sm:$0xff] }
  0x2f   :  { %2036 = vmatprep.subr.bf16.mxu0 %v2035_v52  ;;  %2044 = vmatprep.subr.bf16.mxu1 %v2043_v56  ;;  %v406_v39 = vld [vmem:[%s2928_s3 + $0x38] sm:$0xff]  ;;  %v2053_v54 = vpack.c.bf16 %v405_v49, %v403_v48 }
  0x30   :  { %140 = vadd.xlane.f32.xlu0 %v139_v9 }
  0x32   :  { %2038 = vmatpush1.bf16.msra.mxu0 %v2037_v57  ;;  %2046 = vmatpush1.bf16.msra.mxu1 %v2045_v60 }
  0xb5   :  { %v72_v10 = vpop.xlane.xlu0 %71  ;;  %v78_v11 = vpop.xlane.xlu1 %77 }
  0xb6   :  { %v83_v12 = vmul.f32 0.03125, %v72_v10  ;;  %v85_v13 = vmul.f32 0.03125, %v78_v11  ;;  %v2500_v10 = vshrl.u32 %v123_v3, 7 }
  0xb8   :  { %v2414_v14 = vsub.f32 %v58_v0, %v83_v12  ;;  %v2416_v15 = vsub.f32 %v60_v1, %v85_v13  ;;  %v2047_v0 = vpack.c.bf16 %v402_v63, %v400_v62  ;;  %v173_v56 = vsub.s32 3, %v2500_v10 }
  0xb9   :  { %v75_v16 = vpop.xlane.xlu0 %74  ;;  %v81_v17 = vpop.xlane.xlu1 %80 }
  0xba   :  { %v84_v18 = vmul.f32 0.03125, %v75_v16  ;;  %v86_v19 = vmul.f32 0.03125, %v81_v17  ;;  %v91_v20 = vmul.f32 %v2414_v14, %v2414_v14  ;;  %v93_v21 = vmul.f32 %v2416_v15, %v2416_v15  ;;  %2048 = vmatprep.subr.bf16.mxu0 %v2047_v0 }
  0xbb   :  { %v2316_v0 = vmov 0.0|0.0  }
  0xbc   :  { %v2422_v22 = vsub.f32 %v59_v2, %v84_v18  ;;  %v2424_v23 = vsub.f32 %v61_v5, %v86_v19  ;;  %v95_v24 = vsel %vm69_vm0, %v91_v20, 0.0  ;;  %v101_v27 = vsel %vm69_vm0, %v93_v21, 0.0  ;;  %v2506_v20 = vld [vmem:[%s2927_s2] sm:$0xff]  ;;  %2055 = vmatprep.subr.bf16.mxu1 %v2316_v0 }
  0xbd   :  { %96 = vadd.xlane.f32.xlu1 %v95_v24  ;;  %v141_v25 = vpop.xlane.xlu0 %140  ;;  %v125_v19 = vsub.s32 0, %v2500_v10  ;;  %v174_v60 = vrot.slane %v2506_v20, %v173_v56 }
  0xbe   :  { %v145_v26 = vmul.f32 0.03125, %v141_v25  ;;  %v92_v28 = vmul.f32 %v2422_v22, %v2422_v22  ;;  %v94_v29 = vmul.f32 %v2424_v23, %v2424_v23  ;;  %v133_v25 = vsub.s32 1, %v2500_v10 }
  0xc0   :  { %v2433_v30 = vsub.f32 %v2410_v8, %v145_v26  ;;  %v98_v31 = vsel %vm69_vm0, %v92_v28, 0.0  ;;  %v104_v32 = vsel %vm69_vm0, %v94_v29, 0.0  ;;  %v126_v28 = vrot.slane %v2506_v20, %v125_v19 }
  0xc1   :  { %102 = vadd.xlane.f32.xlu1 %v101_v27  ;;  %99 = vadd.xlane.f32.xlu0 %v98_v31 }
  0xc2   :  { %v149_v33 = vmul.f32 %v2433_v30, %v2433_v30 }
  0xc4   :  { %v151_v35 = vsel %vm69_vm0, %v149_v33, 0.0  ;;  %v134_v33 = vrot.slane %v2506_v20, %v133_v25 }
  0xc5   :  { %105 = vadd.xlane.f32.xlu0 %v104_v32  ;;  %152 = vadd.xlane.f32.xlu1 %v151_v35  ;;  %v399_v35 = vld [vmem:[%s2928_s3] sm:$0xff] }
  0xc9   :  { %143 = vadd.xlane.f32.xlu0 %v142_v36  ;;  %v401_v36 = vld [vmem:[%s2928_s3 + $0x10] sm:$0xff] }
  0xca   :  { %v2049_v44 = vpack.c.bf16 %v401_v36, %v399_v35 }
 0x14a   :  { %v97_v1 = vpop.xlane.xlu1 %96 }
 0x14b   :  { %v107_v2 = vmul.f32 0.03125, %v97_v1 }
 0x14d   :  { %v111_v4 = vadd.f32 1e-05, %v107_v2 }
 0x14e   :  { %v103_v5 = vpop.xlane.xlu1 %102  ;;  %v100_v6 = vpop.xlane.xlu0 %99 }
 0x14f   :  { %2203 = vrsqrt.f32 %v111_v4  ;;  %v109_v7 = vmul.f32 0.03125, %v103_v5  ;;  %v108_v9 = vmul.f32 0.03125, %v100_v6 }
 0x151   :  { %v113_v11 = vadd.f32 1e-05, %v109_v7  ;;  %v112_v12 = vadd.f32 1e-05, %v108_v9  ;;  %v195_v9 = vsub.s32 7, %v2500_v10 }
 0x152   :  { %v153_v13 = vpop.xlane.xlu1 %152  ;;  %v106_v16 = vpop.xlane.xlu0 %105 }
 0x153   :  { %2205 = vrsqrt.f32 %v113_v11  ;;  %v157_v17 = vmul.f32 0.03125, %v153_v13  ;;  %v110_v18 = vmul.f32 0.03125, %v106_v16  ;;  %v66_v11 = vld [vmem:[%s2927_s2 + $0x10] sm:$0xff]  ;;  %v65_v16 = vld [vmem:[%s2927_s2 + $0x8] sm:$0xff] }
 0x154   :  { %2207 = vrsqrt.f32 %v112_v12 }
 0x155   :  { %v114_v21 = vadd.f32 1e-05, %v110_v18  ;;  %v159_v24 = vadd.f32 1e-05, %v157_v17  ;;  %v67_v17 = vld [vmem:[%s2927_s2 + $0x18] sm:$0xff] }
 0x156   :  { %v144_v26 = vpop.xlane.xlu0 %143 }
 0x157   :  { %v146_v27 = vmul.f32 0.03125, %v144_v26  ;;  %2209 = vrsqrt.f32 %v114_v21  ;;  %v204_v26 = vrot.slane %v66_v11, %v195_v9 }
 0x158   :  { %2211 = vrsqrt.f32 %v159_v24  ;;  %v196_v24 = vrot.slane %v2506_v20, %v195_v9 }
 0x159   :  { %v2204_v29 = vpop.eup %2203  ;;  %v2513_v31 = vsub.f32 %v2439_v34, %v146_v27  ;;  %v200_v27 = vrot.slane %v65_v16, %v195_v9 }
 0x15a   :  { %v119_v32 = vmul.f32 %v2204_v29, %v2414_v14  ;;  %v404_v14 = vld [vmem:[%s2928_s3 + $0x28] sm:$0xff] }
 0x15b   :  { %v150_v37 = vmul.f32 %v2513_v31, %v2513_v31  ;;  %v2051_v47 = vpack.c.bf16 %v406_v39, %v404_v14 }
 0x15c   :  { %v127_v38 = vmul.f32 %v126_v28, %v119_v32 }
 0x15d   :  { %v2206_v40 = vpop.eup %2205  ;;  %v154_v41 = vsel %vm69_vm0, %v150_v37, 0.0 }
 0x15e   :  { %v2208_v42 = vpop.eup %2207  ;;  %v135_v43 = vadd.f32 %v134_v33, %v127_v38  ;;  %155 = vadd.xlane.f32.xlu1 %v154_v41  ;;  %v121_v46 = vmul.f32 %v2206_v40, %v2416_v15  ;;  %v167_v15 = vsub.s32 2, %v2500_v10 }
 0x15f   :  { %v120_v45 = vmul.f32 %v2208_v42, %v2422_v22 }
 0x160   :  { %1691 = vmatmul.mubr.msk.f32.vlgmr.msra.gmra.mrb[0].mxu0 %vm69_vm0, %v135_v43  ;;  %1695 = vmatmul.mubr.msk.f32.vlgmr.msra.gmra.mrb[0].mxu1 %vm69_vm0, %v135_v43  ;;  %v129_v52 = vmul.f32 %v126_v28, %v121_v46  ;;  %v168_v57 = vrot.slane %v2506_v20, %v167_v15 }
 0x161   :  { %291 = vmatprep.mubr.f32.mxu0 %v2315_v61  ;;  %380 = vmatprep.mubr.f32.mxu1 %v2315_v61  ;;  %v128_v22 = vmul.f32 %v126_v28, %v120_v45  ;;  %v2210_v50 = vpop.eup %2209 }
 0x162   :  { %2050 = vmatpush1.bf16.msra.mxu0 %v2049_v44  ;;  %v122_v53 = vmul.f32 %v2210_v50, %v2424_v23  ;;  %v2212_v55 = vpop.eup %2211  ;;  %v137_v23 = vadd.f32 %v134_v33, %v129_v52 }
 0x163   :  { %v136_v51 = vadd.f32 %v134_v33, %v128_v22  ;;  %2052 = vmatprep.subr.bf16.mxu0 %v2051_v47  ;;  %v163_v58 = vmul.f32 %v2212_v55, %v2433_v30 }
 0x164   :  { %v130_v59 = vmul.f32 %v126_v28, %v122_v53  ;;  %v208_v28 = vrot.slane %v67_v17, %v195_v9 }
 0x165   :  { %1692 = vmatmul.mubr.msk.f32.gmra.mrb[2].mxu0 %vm69_vm0, %v136_v51  ;;  %1696 = vmatmul.mubr.msk.f32.gmra.mrb[2].mxu1 %vm69_vm0, %v136_v51  ;;  %v169_v62 = vmul.f32 %v168_v57, %v163_v58  ;;  %v409_v51 = vsub.s32 6, %v2500_v10 }
 0x166   :  { %297 = vmatprep.mubr.f32.mxu0 %v2315_v61  ;;  %386 = vmatprep.mubr.f32.mxu1 %v2315_v61  ;;  %v138_v63 = vadd.f32 %v134_v33, %v130_v59 }
 0x167   :  { %2054 = vmatpush1.bf16.msra.mxu0 %v2053_v54  ;;  %v175_v30 = vadd.f32 %v174_v60, %v169_v62  ;;  %v410_v59 = vrot.slane %v2506_v20, %v409_v51 }
 0x168   :  { %2061 = vmatprep.subr.bf16.mxu0 %v2316_v0 }
 0x169   :  { %1693 = vmatmul.mubr.msk.f32.gmra.mrb[4].mxu0 %vm69_vm0, %v137_v23  ;;  %1697 = vmatmul.mubr.msk.f32.gmra.mrb[4].mxu1 %vm69_vm0, %v137_v23 }
 0x16a   :  { %303 = vmatprep.mubr.f32.mxu0 %v2315_v61  ;;  %392 = vmatprep.mubr.f32.mxu1 %v2315_v61 }
 0x16d   :  { %1694 = vmatmul.mubr.msk.f32.gmra.mrb[6].mxu0 %vm69_vm0, %v138_v63  ;;  %1698 = vmatmul.mubr.msk.f32.gmra.mrb[6].mxu1 %vm69_vm0, %v138_v63  ;;  %v2600_v63 = vrot.slane %v65_v16, %v409_v51 }
 0x16e   :  { %485 = vmatprep.mubr.f32.mxu0 %v2315_v61  ;;  %1817 = vmatprep.mubr.msk.f32.mxu1 %vm2317_vm1, %v2315_v61 }
 0x171   :  { %1699 = vmatmul.mubr.msk.f32.vlgmr.msra.gmra.mrb[8].mxu0 %vm69_vm0, %v175_v30 }
 0x172   :  { %491 = vmatprep.mubr.f32.mxu0 %v2315_v61 }
 0x1eb   :  { %v156_v1 = vpop.xlane.xlu1 %155 }
 0x1ec   :  { %v158_v2 = vmul.f32 0.03125, %v156_v1 }
 0x1ee   :  { %v160_v3 = vadd.f32 1e-05, %v158_v2 }
 0x1f0   :  { %2213 = vrsqrt.f32 %v160_v3 }
 0x1fa   :  { %v2214_v4 = vpop.eup %2213 }
 0x1fb   :  { %v164_v5 = vmul.f32 %v2214_v4, %v2513_v31 }
 0x1fd   :  { %v170_v6 = vmul.f32 %v168_v57, %v164_v5 }
 0x1ff   :  { %v176_v7 = vadd.f32 %v174_v60, %v170_v6 }
 0x201   :  { %1700 = vmatmul.mubr.msk.f32.gmra.mrb[10].mxu0 %vm69_vm0, %v176_v7 }
 0x202   :  { %1831 = vmatprep.mubr.msk.f32.mxu0 %vm2317_vm1, %v2315_v61 }
 0x233   :  { %v287_v12 = vpop.f32.mrb[0].mxu0  ;;  %v376_v13 = vpop.f32.mrb[0].mxu1 }
 0x234   :  { %v289_v18 = vpop.f32.mrb[1].mxu0  ;;  %v378_v21 = vpop.f32.mrb[1].mxu1  ;;  %v288_v32 = vadd.f32 %v287_v12, %v196_v24  ;;  %v377_v33 = vadd.f32 %v376_v13, %v204_v26 }
 0x235   :  { %v290_v14 = vadd.f32 %v289_v18, %v200_v27  ;;  %v379_v39 = vadd.f32 %v378_v21, %v208_v28 }
 0x238   :  { %v293_v29 = vpop.f32.mrb[2].mxu0  ;;  %v382_v31 = vpop.f32.mrb[2].mxu1 }
 0x239   :  { %v294_v35 = vadd.f32 %v293_v29, %v196_v24  ;;  %v383_v36 = vadd.f32 %v382_v31, %v204_v26  ;;  %v295_v37 = vpop.f32.mrb[3].mxu0  ;;  %v384_v38 = vpop.f32.mrb[3].mxu1 }
 0x23a   :  { %v296_v40 = vadd.f32 %v295_v37, %v200_v27  ;;  %v385_v41 = vadd.f32 %v384_v38, %v208_v28 }
 0x23b   :  { %v2056_v42 = vpack.c.bf16 %v294_v35, %v288_v32  ;;  %v2059_v43 = vpack.c.bf16 %v383_v36, %v377_v33 }
 0x23c   :  { %v2062_v44 = vpack.c.bf16 %v296_v40, %v290_v14  ;;  %v2065_v45 = vpack.c.bf16 %v385_v41, %v379_v39  ;;  %v299_v46 = vpop.f32.mrb[4].mxu0  ;;  %v388_v47 = vpop.f32.mrb[4].mxu1 }
 0x23d   :  { %v300_v48 = vadd.f32 %v299_v46, %v196_v24  ;;  %v2586_v49 = vadd.f32 %v388_v47, %v204_v26  ;;  %v301_v22 = vpop.f32.mrb[5].mxu0  ;;  %v390_v50 = vpop.f32.mrb[5].mxu1  ;;  %2057 = vmatpush3.bf16.xpose.msra.mxu1 %v2056_v42 }
 0x23e   :  { %v2589_v52 = vadd.f32 %v301_v22, %v200_v27  ;;  %v2591_v53 = vadd.f32 %v390_v50, %v208_v28  ;;  %2063 = vmatpush3.bf16.xpose.msra.mxu0 %v2062_v44  ;;  %2058 = vmatprep.subr.bf16.mxu1 %v2316_v0 }
 0x23f   :  { %2064 = vmatprep.subr.bf16.mxu0 %v2316_v0 }
 0x240   :  { %v305_v54 = vpop.f32.mrb[6].mxu0  ;;  %v394_v55 = vpop.f32.mrb[6].mxu1 }
 0x241   :  { %v306_v56 = vadd.f32 %v305_v54, %v196_v24  ;;  %v395_v57 = vadd.f32 %v394_v55, %v204_v26  ;;  %v307_v58 = vpop.f32.mrb[7].mxu0  ;;  %v396_v23 = vpop.f32.mrb[7].mxu1 }
 0x242   :  { %v2596_v60 = vadd.f32 %v307_v58, %v200_v27  ;;  %v2598_v62 = vadd.f32 %v396_v23, %v208_v28  ;;  %v514_v58 = vld [vmem:[%s2930_s5 + $0x80] sm:$0xff]  ;;  %v515_v23 = vld [vmem:[%s2930_s5 + $0x88] sm:$0xff] }
 0x243   :  { %v2116_v30 = vpack.c.bf16 %v306_v56, %v300_v48  ;;  %v2119_v1 = vpack.c.bf16 %v395_v57, %v2586_v49 }
 0x244   :  { %v2122_v2 = vpack.c.bf16 %v2596_v60, %v2589_v52  ;;  %v2125_v3 = vpack.c.bf16 %v2598_v62, %v2591_v53  ;;  %v487_v4 = vpop.f32.mrb[8].mxu0  ;;  %v522_v62 = vld [vmem:[%s2930_s5 + $0xc0] sm:$0xff] }
 0x245   :  { %v488_v5 = vadd.f32 %v487_v4, %v410_v59  ;;  %v489_v6 = vpop.f32.mrb[9].mxu0  ;;  %v516_v4 = vld [vmem:[%s2930_s5 + $0x90] sm:$0xff] }
 0x246   :  { %v490_v7 = vadd.f32 %v489_v6, %v2600_v63  ;;  %v519_v6 = vld [vmem:[%s2930_s5 + $0xa8] sm:$0xff] }
 0x247   :  { %1818 = vmatmul.mubr.f32.vlgmr.msra.gmra.mrb[8].mxu1 %v488_v5  ;;  %v517_v5 = vld [vmem:[%s2930_s5 + $0x98] sm:$0xff] }
 0x248   :  { %2060 = vmatpush3.bf16.msra.mxu1 %v2059_v43  ;;  %1832 = vmatmul.mubr.f32.vlgmr.msra.gmra.mrb[12].mxu0 %v490_v7  ;;  %v2654_v52 = vpack.c.bf16 %v517_v5, %v516_v4 }
 0x249   :  { %2066 = vmatpush3.bf16.msra.mxu0 %v2065_v45  ;;  %1824 = vmatprep.mubr.msk.f32.mxu1 %vm2317_vm1, %v2315_v61 }
 0x24a   :  { %2115 = vmatprep.subr.bf16.mxu1 %v2316_v0  ;;  %1838 = vmatprep.mubr.msk.f32.mxu0 %vm2317_vm1, %v2315_v61 }
 0x24b   :  { %2067 = vmatprep.subr.bf16.mxu0 %v2316_v0 }
 0x2d4   :  { %v493_v9 = vpop.f32.mrb[10].mxu0 }
 0x2d5   :  { %v2614_v11 = vpop.f32.mrb[11].mxu0  ;;  %v494_v35 = vadd.f32 %v493_v9, %v410_v59  ;;  %v521_v9 = vld [vmem:[%s2930_s5 + $0xb8] sm:$0xff] }
 0x2d6   :  { %v496_v60 = vadd.f32 %v2614_v11, %v2600_v63  ;;  %v520_v63 = vld [vmem:[%s2930_s5 + $0xb0] sm:$0xff] }
 0x2d7   :  { %v2684_v53 = vpack.c.bf16 %v521_v9, %v520_v63 }
 0x31a   :  { %v596_v12 = vpop.f32.mrb[8].mxu1 }
 0x31b   :  { %v600_v13 = vmul.f32 0.25, %v596_v12  ;;  %v1819_v16 = vpop.f32.mrb[9].mxu1  ;;  %v752_v17 = vpop.f32.mrb[12].mxu0  ;;  %v524_v12 = vld [vmem:[%s2930_s5 + $0xd0] sm:$0xff] }
 0x31c   :  { %v1833_v18 = vpop.f32.mrb[13].mxu0  ;;  %v756_v40 = vmul.f32 0.25, %v752_v17  ;;  %v526_v17 = vld [vmem:[%s2930_s5 + $0xe0] sm:$0xff] }
 0x31d   :  { %v602_v21 = vsel %vm601_vm2, %v600_v13, -inf  ;;  %v527_v18 = vld [vmem:[%s2930_s5 + $0xe8] sm:$0xff] }
 0x31e   :  { %603 = vmax.xlane.f32.xlu0 %v602_v21  ;;  %v757_v42 = vsel %vm601_vm2, %v756_v40, -inf  ;;  %v2714_v21 = vpack.c.bf16 %v527_v18, %v526_v17 }
 0x3ab   :  { %v604_v24 = vpop.xlane.xlu0 %603 }
 0x3ac   :  { %v605_v26 = vsub.f32 %v600_v13, %v604_v24  ;;  %v525_v13 = vld [vmem:[%s2930_s5 + $0xd8] sm:$0xff]  ;;  %v528_v24 = vld [vmem:[%s2930_s5 + $0xf0] sm:$0xff] }
 0x3ad   :  { %v2704_v16 = vpack.c.bf16 %v525_v13, %v524_v12 }
 0x3ae   :  { %v606_v27 = vmul.f32 1.442695, %v605_v26  ;;  %v529_v26 = vld [vmem:[%s2930_s5 + $0xf8] sm:$0xff] }
 0x3b0   :  { %2215 = vpow2.f32 %v606_v27  ;;  %v2725_v27 = vpack.c.bf16 %v529_v26, %v528_v24 }
 0x3ba   :  { %v2216_v28 = vpop.eup %2215 }
 0x3bb   :  { %v608_v29 = vsel %vm601_vm2, %v2216_v28, 0.0 }
 0x3bc   :  { %609 = vadd.xlane.f32.xlu1 %v608_v29  ;;  %v499_v29 = vld [vmem:[%s2930_s5 + $0x8] sm:$0xff] }
 0x449   :  { %v610_v31 = vpop.xlane.xlu1 %609 }
 0x44a   :  { %2217 = vrcp.f32 %v610_v31 }
 0x454   :  { %v2218_v32 = vpop.eup %2217 }
 0x455   :  { %v612_v33 = vmul.f32 %v2218_v32, %v2216_v28  ;;  %v498_v28 = vld [vmem:[%s2930_s5] sm:$0xff] }
 0x457   :  { %1825 = vmatmul.mubr.msk.f32.vlgmr.msra.gmra.mrb[10].mxu1 %vm601_vm2, %v612_v33  ;;  %v2737_v33 = vpack.c.bf16 %v499_v29, %v498_v28  ;;  %v1477_v29 = vsub.s32 5, %v2500_v10 }
 0x458   :  { %2117 = vmatpush3.bf16.xpose.msra.mxu1 %v2116_v30  ;;  %1915 = vmatprep.mubr.msk.f32.mxu1 %vm2317_vm1, %v2315_v61  ;;  %v2643_v30 = vpack.c.bf16 %v515_v23, %v514_v58  ;;  %v511_v58 = vld [vmem:[%s2930_s5 + $0x68] sm:$0xff] }
 0x459   :  { %2118 = vmatprep.subr.bf16.mxu1 %v2316_v0 }
 0x45f   :  { %1916 = vmatmul.mubr.f32.vlgmr.msra.gmra.mrb[12].mxu1 %v494_v35  ;;  %v500_v35 = vld [vmem:[%s2930_s5 + $0x10] sm:$0xff] }
 0x460   :  { %2120 = vmatpush3.bf16.msra.mxu1 %v2119_v1  ;;  %1922 = vmatprep.mubr.msk.f32.mxu1 %vm2317_vm1, %v2315_v61 }
 0x461   :  { %2121 = vmatprep.subr.bf16.mxu1 %v2316_v0 }
 0x52a   :  { %v2625_v36 = vpop.f32.mrb[10].mxu1 }
 0x52b   :  { %v1826_v37 = vpop.f32.mrb[11].mxu1 }
 0x52c   :  { %v501_v37 = vld [vmem:[%s2930_s5 + $0x18] sm:$0xff] }
 0x532   :  { %v1048_v38 = vpop.f32.mrb[12].mxu1 }
 0x533   :  { %v1052_v14 = vmul.f32 0.25, %v1048_v38  ;;  %v1917_v39 = vpop.f32.mrb[13].mxu1 }
 0x534   :  { %v2746_v39 = vpack.c.bf16 %v501_v37, %v500_v35  ;;  %v1478_v37 = vrot.slane %v2506_v20, %v1477_v29 }
 0x535   :  { %v1053_v41 = vsel %vm601_vm2, %v1052_v14, -inf }
 0x536   :  { %1054 = vmax.xlane.f32.xlu0 %v1053_v41  ;;  %v503_v41 = vld [vmem:[%s2930_s5 + $0x28] sm:$0xff] }
 0x53a   :  { %758 = vmax.xlane.f32.xlu0 %v757_v42 }
 0x5c3   :  { %v1055_v43 = vpop.xlane.xlu0 %1054 }
 0x5c4   :  { %v1056_v44 = vsub.f32 %v1052_v14, %v1055_v43 }
 0x5c6   :  { %v1057_v45 = vmul.f32 1.442695, %v1056_v44 }
 0x5c7   :  { %v759_v46 = vpop.xlane.xlu0 %758 }
 0x5c8   :  { %2219 = vpow2.f32 %v1057_v45  ;;  %v760_v47 = vsub.f32 %v756_v40, %v759_v46  ;;  %v502_v40 = vld [vmem:[%s2930_s5 + $0x20] sm:$0xff] }
 0x5c9   :  { %v2758_v45 = vpack.c.bf16 %v503_v41, %v502_v40 }
 0x5ca   :  { %v761_v48 = vmul.f32 1.442695, %v760_v47  ;;  %v504_v47 = vld [vmem:[%s2930_s5 + $0x30] sm:$0xff] }
 0x5cc   :  { %2221 = vpow2.f32 %v761_v48  ;;  %v505_v48 = vld [vmem:[%s2930_s5 + $0x38] sm:$0xff] }
 0x5d2   :  { %v2220_v49 = vpop.eup %2219 }
 0x5d3   :  { %v1059_v22 = vsel %vm601_vm2, %v2220_v49, 0.0 }
 0x5d4   :  { %1060 = vadd.xlane.f32.xlu1 %v1059_v22  ;;  %v506_v22 = vld [vmem:[%s2930_s5 + $0x40] sm:$0xff] }
 0x5d6   :  { %v2222_v50 = vpop.eup %2221 }
 0x5d7   :  { %v763_v51 = vsel %vm601_vm2, %v2222_v50, 0.0 }
 0x5d8   :  { %764 = vadd.xlane.f32.xlu0 %v763_v51 }
 0x661   :  { %v1061_v54 = vpop.xlane.xlu1 %1060 }
 0x662   :  { %2223 = vrcp.f32 %v1061_v54  ;;  %v508_v54 = vld [vmem:[%s2930_s5 + $0x50] sm:$0xff] }
 0x665   :  { %v765_v55 = vpop.xlane.xlu0 %764 }
 0x666   :  { %2225 = vrcp.f32 %v765_v55  ;;  %v509_v55 = vld [vmem:[%s2930_s5 + $0x58] sm:$0xff] }
 0x66c   :  { %v2224_v56 = vpop.eup %2223 }
 0x66d   :  { %v1063_v57 = vmul.f32 %v2224_v56, %v2220_v49  ;;  %v2769_v49 = vpack.c.bf16 %v505_v48, %v504_v47  ;;  %v2789_v56 = vpack.c.bf16 %v509_v55, %v508_v54  ;;  %v1481_v47 = vld [vmem:[%s2931_s6] sm:$0xff] }
 0x66f   :  { %1923 = vmatmul.mubr.msk.f32.vlgmr.msra.gmra.mrb[14].mxu1 %vm601_vm2, %v1063_v57  ;;  %v510_v57 = vld [vmem:[%s2930_s5 + $0x60] sm:$0xff] }
 0x670   :  { %v2226_v59 = vpop.eup %2225  ;;  %2123 = vmatpush3.bf16.xpose.msra.mxu1 %v2122_v2  ;;  %1929 = vmatprep.mubr.msk.f32.mxu1 %vm2317_vm1, %v2315_v61  ;;  %v518_v2 = vld [vmem:[%s2930_s5 + $0xa0] sm:$0xff]  ;;  %v2799_v23 = vpack.c.bf16 %v511_v58, %v510_v57 }
 0x671   :  { %v767_v1 = vmul.f32 %v2226_v59, %v2222_v50  ;;  %2124 = vmatprep.subr.bf16.mxu1 %v2316_v0  ;;  %v2671_v7 = vpack.c.bf16 %v519_v6, %v518_v2  ;;  %v507_v50 = vld [vmem:[%s2930_s5 + $0x48] sm:$0xff]  ;;  %v512_v59 = vld [vmem:[%s2930_s5 + $0x70] sm:$0xff] }
 0x672   :  { %v2779_v51 = vpack.c.bf16 %v507_v50, %v506_v22  ;;  %v1484_v22 = vld [vmem:[%s2931_s6 + $0x18] sm:$0xff] }
 0x673   :  { %1839 = vmatmul.mubr.msk.f32.vlgmr.msra.gmra.mrb[14].mxu0 %vm601_vm2, %v767_v1  ;;  %v513_v1 = vld [vmem:[%s2930_s5 + $0x78] sm:$0xff] }
 0x674   :  { %2069 = vmatpush3.bf16.msra.mxu0 %v2643_v30  ;;  %1873 = vmatprep.mubr.msk.f32.mxu0 %vm2317_vm1, %v2315_v61  ;;  %v2809_v4 = vpack.c.bf16 %v513_v1, %v512_v59  ;;  %v1580_v59 = vld [vmem:[#allocation6] sm:$0xff]  ;;  %v1581_v1 = vld [vmem:[#allocation6 + $0x8] sm:$0xff] }
 0x675   :  { %2070 = vmatprep.subr.bf16.mxu0 %v2316_v0 }
 0x677   :  { %1930 = vmatmul.mubr.f32.vlgmr.msra.gmra.mrb[16].mxu1 %v496_v60 }
 0x678   :  { %2126 = vmatpush3.bf16.msra.mxu1 %v2125_v3  ;;  %2072 = vmatpush3.bf16.msra.mxu0 %v2654_v52  ;;  %v523_v3 = vld [vmem:[%s2930_s5 + $0xc8] sm:$0xff] }
 0x679   :  { %2073 = vmatprep.subr.bf16.mxu0 %v2316_v0  ;;  %1936 = vmatprep.mubr.msk.f32.mxu1 %vm2317_vm1, %v2315_v61  ;;  %v2694_v11 = vpack.c.bf16 %v523_v3, %v522_v62  ;;  %v2819_v3 = vld [vmem:[%s2927_s2 + $0x20] sm:$0x7] }
 0x67a   :  { %2127 = vmatprep.subr.bf16.mxu1 %v2316_v0 }
 0x67c   :  { %2075 = vmatpush3.bf16.msra.mxu0 %v2671_v7 }
 0x67d   :  { %2076 = vmatprep.subr.bf16.mxu0 %v2316_v0 }
 0x680   :  { %2078 = vmatpush3.bf16.msra.mxu0 %v2684_v53 }
 0x681   :  { %2079 = vmatprep.subr.bf16.mxu0 %v2316_v0 }
 0x684   :  { %2081 = vmatpush3.bf16.msra.mxu0 %v2694_v11 }
 0x685   :  { %2082 = vmatprep.subr.bf16.mxu0 %v2316_v0 }
 0x688   :  { %2084 = vmatpush3.bf16.msra.mxu0 %v2704_v16 }
 0x689   :  { %2085 = vmatprep.subr.bf16.mxu0 %v2316_v0 }
 0x68c   :  { %2087 = vmatpush3.bf16.msra.mxu0 %v2714_v21 }
 0x68d   :  { %2088 = vmatprep.subr.bf16.mxu0 %v2316_v0 }
 0x690   :  { %2090 = vmatpush3.bf16.msra.mxu0 %v2725_v27 }
 0x691   :  { %2091 = vmatprep.subr.bf16.mxu0 %v2316_v0 }
 0x742   :  { %v2735_v31 = vpop.f32.mrb[14].mxu1 }
 0x743   :  { %v1924_v32 = vpop.f32.mrb[15].mxu1 }
 0x746   :  { %v837_v38 = vpop.f32.mrb[14].mxu0 }
 0x747   :  { %v1840_v14 = vpop.f32.mrb[15].mxu0  ;;  %1874 = vmatmul.mubr.f32.vlgmr.msra.gmra.mrb[16].mxu0 %v837_v38 }
 0x748   :  { %2093 = vmatpush3.bf16.msra.mxu0 %v2737_v33  ;;  %1908 = vmatprep.mubr.msk.f32.mxu0 %vm2317_vm1, %v2315_v61 }
 0x749   :  { %2094 = vmatprep.subr.bf16.mxu0 %v2316_v0 }
 0x74a   :  { %v1203_v42 = vpop.f32.mrb[16].mxu1 }
 0x74b   :  { %v1207_v43 = vmul.f32 0.25, %v1203_v42  ;;  %v1931_v44 = vpop.f32.mrb[17].mxu1 }
 0x74c   :  { %2096 = vmatpush3.bf16.msra.mxu0 %v2746_v39 }
 0x74d   :  { %v1208_v46 = vsel %vm601_vm2, %v1207_v43, -inf  ;;  %2097 = vmatprep.subr.bf16.mxu0 %v2316_v0 }
 0x74e   :  { %1209 = vmax.xlane.f32.xlu1 %v1208_v46 }
 0x750   :  { %2099 = vmatpush3.bf16.msra.mxu0 %v2758_v45 }
 0x751   :  { %2100 = vmatprep.subr.bf16.mxu0 %v2316_v0 }
 0x754   :  { %2102 = vmatpush3.bf16.msra.mxu0 %v2769_v49 }
 0x755   :  { %2103 = vmatprep.subr.bf16.mxu0 %v2316_v0 }
 0x758   :  { %2105 = vmatpush3.bf16.msra.mxu0 %v2779_v51 }
 0x759   :  { %2106 = vmatprep.subr.bf16.mxu0 %v2316_v0 }
 0x75c   :  { %2108 = vmatpush3.bf16.msra.mxu0 %v2789_v56 }
 0x75d   :  { %2109 = vmatprep.subr.bf16.mxu0 %v2316_v0 }
 0x760   :  { %2111 = vmatpush3.bf16.msra.mxu0 %v2799_v23 }
 0x761   :  { %2112 = vmatprep.subr.bf16.mxu0 %v2316_v0 }
 0x764   :  { %2114 = vmatpush3.bf16.msra.mxu0 %v2809_v4 }
 0x767   :  { %1909 = vmatmul.mubr.f32.vlgmr.msra.gmra.mrb[16].mxu0 %v2625_v36  ;;  %v2824_v36 = vrot.slane %v2819_v3, %v125_v19 }
 0x7db   :  { %v1210_v5 = vpop.xlane.xlu1 %1209 }
 0x7dc   :  { %v1211_v60 = vsub.f32 %v1207_v43, %v1210_v5  ;;  %v1582_v5 = vld [vmem:[#allocation6 + $0x10] sm:$0xff] }
 0x7de   :  { %v1212_v2 = vmul.f32 1.442695, %v1211_v60  ;;  %v1583_v60 = vld [vmem:[#allocation6 + $0x18] sm:$0xff] }
 0x7e0   :  { %2227 = vpow2.f32 %v1212_v2  ;;  %v2187_v2 = vpack.c.bf16 %v1583_v60, %v1582_v5 }
 0x7ea   :  { %v2228_v6 = vpop.eup %2227 }
 0x7eb   :  { %v1214_v63 = vsel %vm601_vm2, %v2228_v6, 0.0 }
 0x7ec   :  { %1215 = vadd.xlane.f32.xlu1 %v1214_v63 }
 0x83a   :  { %v977_v9 = vpop.f32.mrb[16].mxu0 }
 0x83b   :  { %981 = vst.msk [vmem:[#allocation2] sm:$0xff] %vm69_vm0, %v977_v9  ;;  %v1910_v62 = vpop.f32.mrb[17].mxu0 }
 0x842   :  { %v1433_v12 = vld [vmem:[#allocation2] sm:$0xff] }
 0x843   :  { %v1439_v13 = vadd.f32 %v2824_v36, %v1433_v12 }
 0x845   :  { %v2828_v17 = vadd.f32 %v1439_v13, %v2410_v8 }
 0x847   :  { %v1443_v18 = vsel %vm69_vm0, %v2828_v17, 0.0 }
 0x848   :  { %1444 = vadd.xlane.f32.xlu0 %v1443_v18 }
 0x879   :  { %v1216_v24 = vpop.xlane.xlu1 %1215 }
 0x87a   :  { %2229 = vrcp.f32 %v1216_v24 }
 0x884   :  { %v2230_v26 = vpop.eup %2229 }
 0x885   :  { %v1218_v28 = vmul.f32 %v2230_v26, %v2228_v6  ;;  %v1488_v6 = vrot.slane %v2819_v3, %v133_v25  ;;  %v1587_v25 = vrot.slane %v2819_v3, %v167_v15 }
 0x887   :  { %1937 = vmatmul.mubr.msk.f32.vlgmr.msra.gmra.mrb[18].mxu1 %vm601_vm2, %v1218_v28 }
 0x888   :  { %2129 = vmatpush3.bf16.msra.mxu1 %v2643_v30  ;;  %1971 = vmatprep.mubr.msk.f32.mxu1 %vm2317_vm1, %v2315_v61 }
 0x889   :  { %2130 = vmatprep.subr.bf16.mxu1 %v2316_v0 }
 0x88c   :  { %2132 = vmatpush3.bf16.msra.mxu1 %v2654_v52 }
 0x88d   :  { %2133 = vmatprep.subr.bf16.mxu1 %v2316_v0 }
 0x890   :  { %2135 = vmatpush3.bf16.msra.mxu1 %v2671_v7 }
 0x891   :  { %2136 = vmatprep.subr.bf16.mxu1 %v2316_v0 }
 0x894   :  { %2138 = vmatpush3.bf16.msra.mxu1 %v2684_v53 }
 0x895   :  { %2139 = vmatprep.subr.bf16.mxu1 %v2316_v0 }
 0x898   :  { %2141 = vmatpush3.bf16.msra.mxu1 %v2694_v11 }
 0x899   :  { %2142 = vmatprep.subr.bf16.mxu1 %v2316_v0 }
 0x89c   :  { %2144 = vmatpush3.bf16.msra.mxu1 %v2704_v16 }
 0x89d   :  { %2145 = vmatprep.subr.bf16.mxu1 %v2316_v0 }
 0x8a0   :  { %2147 = vmatpush3.bf16.msra.mxu1 %v2714_v21 }
 0x8a1   :  { %2148 = vmatprep.subr.bf16.mxu1 %v2316_v0 }
 0x8a4   :  { %2150 = vmatpush3.bf16.msra.mxu1 %v2725_v27 }
 0x8a5   :  { %2151 = vmatprep.subr.bf16.mxu1 %v2316_v0 }
 0x8d5   :  { %v1445_v8 = vpop.xlane.xlu0 %1444 }
 0x8d6   :  { %v1449_v19 = vmul.f32 0.03125, %v1445_v8 }
 0x8d8   :  { %v1451_v30 = vsub.f32 %v2828_v17, %v1449_v19 }
 0x8da   :  { %v1453_v52 = vmul.f32 %v1451_v30, %v1451_v30 }
 0x8dc   :  { %v1455_v7 = vsel %vm69_vm0, %v1453_v52, 0.0 }
 0x8dd   :  { %1456 = vadd.xlane.f32.xlu0 %v1455_v7 }
 0x95a   :  { %v1288_v53 = vpop.f32.mrb[18].mxu1 }
 0x95b   :  { %v1938_v11 = vpop.f32.mrb[19].mxu1  ;;  %1972 = vmatmul.mubr.f32.vlgmr.msra.gmra.mrb[20].mxu1 %v1288_v53 }
 0x95c   :  { %2153 = vmatpush3.bf16.msra.mxu1 %v2737_v33  ;;  %2006 = vmatprep.mubr.msk.f32.mxu1 %vm2317_vm1, %v2315_v61  ;;  %v1471_v61 = vsub.s32 4, %v2500_v10 }
 0x95d   :  { %2154 = vmatprep.subr.bf16.mxu1 %v2316_v0 }
 0x95e   :  { %v1472_v32 = vrot.slane %v2506_v20, %v1471_v61 }
 0x960   :  { %2156 = vmatpush3.bf16.msra.mxu1 %v2746_v39 }
 0x961   :  { %2157 = vmatprep.subr.bf16.mxu1 %v2316_v0 }
 0x964   :  { %2159 = vmatpush3.bf16.msra.mxu1 %v2758_v45 }
 0x965   :  { %2160 = vmatprep.subr.bf16.mxu1 %v2316_v0 }
 0x968   :  { %2162 = vmatpush3.bf16.msra.mxu1 %v2769_v49  ;;  %v1483_v49 = vld [vmem:[%s2931_s6 + $0x10] sm:$0xff] }
 0x969   :  { %2163 = vmatprep.subr.bf16.mxu1 %v2316_v0  ;;  %v2179_v50 = vpack.c.bf16 %v1484_v22, %v1483_v49 }
 0x96a   :  { %v1457_v16 = vpop.xlane.xlu0 %1456 }
 0x96b   :  { %v1461_v21 = vmul.f32 0.03125, %v1457_v16 }
 0x96c   :  { %2165 = vmatpush3.bf16.msra.mxu1 %v2779_v51 }
 0x96d   :  { %v1463_v27 = vadd.f32 1e-05, %v1461_v21  ;;  %2166 = vmatprep.subr.bf16.mxu1 %v2316_v0 }
 0x96f   :  { %2231 = vrsqrt.f32 %v1463_v27 }
 0x970   :  { %2168 = vmatpush3.bf16.msra.mxu1 %v2789_v56 }
 0x971   :  { %2169 = vmatprep.subr.bf16.mxu1 %v2316_v0 }
 0x974   :  { %2171 = vmatpush3.bf16.msra.mxu1 %v2799_v23 }
 0x975   :  { %2172 = vmatprep.subr.bf16.mxu1 %v2316_v0 }
 0x978   :  { %2174 = vmatpush3.bf16.msra.mxu1 %v2809_v4  ;;  %v2183_v4 = vpack.c.bf16 %v1581_v1, %v1580_v59 }
 0x979   :  { %v2232_v33 = vpop.eup %2231 }
 0x97a   :  { %v1467_v35 = vmul.f32 %v2232_v33, %v1451_v30 }
 0x97b   :  { %2007 = vmatmul.mubr.f32.vlgmr.msra.gmra.mrb[20].mxu1 %v2735_v31 }
 0x97c   :  { %v1473_v38 = vmul.f32 %v1472_v32, %v1467_v35 }
 0x97e   :  { %v1479_v14 = vadd.f32 %v1478_v37, %v1473_v38 }
 0x980   :  { %2017 = vmatprep.mubr.msk.f32.mxu0 %vm69_vm0, %v1479_v14 }
 0xa4e   :  { %v1428_v39 = vpop.f32.mrb[20].mxu1 }
 0xa4f   :  { %1432 = vst.msk [vmem:[#allocation2 + $0x8] sm:$0xff] %vm69_vm0, %v1428_v39  ;;  %v2008_v0 = vpop.f32.mrb[21].mxu1 }
 0xa56   :  { %v1434_v40 = vld [vmem:[#allocation2 + $0x8] sm:$0xff] }
 0xa57   :  { %v1440_v41 = vadd.f32 %v2824_v36, %v1434_v40 }
 0xa59   :  { %v2879_v42 = vadd.f32 %v1440_v41, %v2439_v34  ;;  %v1482_v34 = vld [vmem:[%s2931_s6 + $0x8] sm:$0xff]  ;;  %s2318_s6 = smov [#allocation8]  }
 0xa5a   :  { %v2175_v48 = vpack.c.bf16 %v1482_v34, %v1481_v47  ;;  %s1678_s21 = sshll.u32 %s2318_s6, 4  ;;  %s1679_s21 = int_to_ptr.vmem [resolvable:$true] %s1678_s21 }
 0xa5b   :  { %v1446_v43 = vsel %vm69_vm0, %v2879_v42, 0.0  ;;  %s2283_s22 = scalar_lea.vmem %s1679_s21, 256  ;;  %p2288_p3 = scmp.lt.s32.totalorder %s1679_s21, %s1679_s21 }
 0xa5c   :  { %1447 = vadd.xlane.f32.xlu1 %v1446_v43  ;;  %2176 = vmatprep.subr.bf16.mxu0 %v2175_v48  ;;  %p2284_p2 = scmp.ne.s32.totalorder %s1679_s21, %s2283_s22  ;;  %p2289_p4 = scmp.lt.s32.totalorder %s2283_s22, %s2283_s22 }
 0xa5d   :  { %2178 = vmatpush3.bf16.msra.mxu0 %v2175_v48 }
 0xa5e   :  { %2180 = vmatprep.subr.bf16.mxu0 %v2179_v50  ;;  %p2290_p5 = por %p2289_p4, %p2288_p3 }
 0xa60   :  { %p2291_p6 = pnand %p2290_p5, %p2284_p2 }
 0xa61   :  { %2182 = vmatpush3.bf16.msra.mxu0 %v2179_v50 }
 0xa62   :  { %2184 = vmatprep.subr.bf16.mxu0 %v2183_v4 }
 0xae9   :  { %v1448_v20 = vpop.xlane.xlu1 %1447 }
 0xaea   :  { %v1450_v31 = vmul.f32 0.03125, %v1448_v20 }
 0xaec   :  { %v1452_v44 = vsub.f32 %v2879_v42, %v1450_v31 }
 0xaee   :  { %v1454_v45 = vmul.f32 %v1452_v44, %v1452_v44 }
 0xaf0   :  { %v1458_v46 = vsel %vm69_vm0, %v1454_v45, 0.0 }
 0xaf1   :  { %1459 = vadd.xlane.f32.xlu1 %v1458_v46 }
 0xb7e   :  { %v1460_v51 = vpop.xlane.xlu1 %1459 }
 0xb7f   :  { %v1462_v54 = vmul.f32 0.03125, %v1460_v51 }
 0xb81   :  { %v1464_v55 = vadd.f32 1e-05, %v1462_v54 }
 0xb83   :  { %2233 = vrsqrt.f32 %v1464_v55 }
 0xb8d   :  { %v2234_v56 = vpop.eup %2233 }
 0xb8e   :  { %v1468_v57 = vmul.f32 %v2234_v56, %v1452_v44 }
 0xb90   :  { %v1474_v58 = vmul.f32 %v1472_v32, %v1468_v57 }
 0xb92   :  { %v1480_v23 = vadd.f32 %v1478_v37, %v1474_v58 }
 0xb94   :  { %2018 = vmatmul.mubr.msk.f32.vlgmr.msra.gmra.mrb[18].mxu0 %vm69_vm0, %v1480_v23 }
 0xb95   :  { %2186 = vmatpush3.bf16.msra.mxu0 %v2183_v4 }
 0xb96   :  { %2188 = vmatprep.subr.bf16.mxu0 %v2187_v2 }
 0xb99   :  { %2190 = vmatpush3.bf16.msra.mxu0 %v2187_v2 }
 0xc67   :  { %v2019_v63 = vpop.f32.mrb[18].mxu0 }
 0xc68   :  { %v1567_v9 = vadd.f32 %v2019_v63, %v1488_v6  ;;  %v1561_v62 = vpop.f32.mrb[19].mxu0 }
 0xc69   :  { %v1562_v36 = vadd.f32 %v1561_v62, %v1488_v6 }
 0xc6a   :  { %v1573_v12 = vmul.f32 0.70710677, %v1567_v9  ;;  %v1571_v19 = vmul.f32 0.5, %v1567_v9 }
 0xc6b   :  { %v1572_v13 = vmul.f32 0.70710677, %v1562_v36  ;;  %v1570_v28 = vmul.f32 0.5, %v1562_v36 }
 0xc6c   :  { %2235 = verf.f32 %v1573_v12 }
 0xc6d   :  { %2237 = verf.f32 %v1572_v13 }
 0xc76   :  { %v2236_v18 = vpop.eup %2235 }
 0xc77   :  { %v2238_v24 = vpop.eup %2237  ;;  %v1577_v26 = vadd.f32 1.0, %v2236_v18 }
 0xc78   :  { %v1576_v8 = vadd.f32 1.0, %v2238_v24 }
 0xc79   :  { %v1579_v52 = vmul.f32 %v1577_v26, %v1571_v19 }
 0xc7a   :  { %v1578_v30 = vmul.f32 %v1576_v8, %v1570_v28 }
 0xc7c   :  { %2028 = vmatprep.mubr.msk.f32.mxu0 %vm69_vm0, %v1578_v30 }
 0xc7d   :  { %2029 = vmatmul.mubr.msk.f32.vlgmr.msra.gmra.mrb[20].mxu0 %vm69_vm0, %v1579_v52 }
 0xd50   :  { %v2030_v7 = vpop.f32.mrb[20].mxu0 }
 0xd51   :  { %v1666_v53 = vadd.f32 %v2030_v7, %v1587_v25  ;;  %v1660_v11 = vpop.f32.mrb[21].mxu0 }
 0xd52   :  { %v1661_v16 = vadd.f32 %v1660_v11, %v1587_v25 }
 0xd53   :  { %v1670_v21 = vadd.f32 %v1666_v53, %v2879_v42 }
 0xd54   :  { %v1669_v27 = vadd.f32 %v1661_v16, %v2828_v17 }
 0xd55   :  { %1672 = vst.msk [vmem:[#allocation8 + $0x8] sm:$0xff] %vm69_vm0, %v1670_v21 }
 0xd56   :  { %1671 = vst.msk [vmem:[#allocation8] sm:$0xff] %vm69_vm0, %v1669_v27 }
 0xd57   :  { %2294 = shalt.err (!%p2291_p6)
}
 0xd58   :  { %s2295_s25 = scalar_lea.hbm %s2933_s8, 256 }
 0xd59   :  { %p2296_p7 = scmp.ne.s32.totalorder %s2933_s8, %s2295_s25  ;;  %p2299_p8 = scmp.lt.u32.totalorder %s2295_s25, %s2933_s8 }
 0xd5b   :  { %p2301_p9 = pnand %p2299_p8, %p2296_p7 }
 0xd5d   :  { %2304 = shalt.err (!%p2301_p9)
}
 0xd5e   :  { %1684 = dma.vmem_to_hbm [thread:$0]  %s1679_s21, 256, %s2933_s8, [#allocation5], %s2312_s15, %s2312_s15, %s2313_s16  }
 0xd5f   :  { %2309 = dma.done.wait [#allocation5], 256  }
 0xd60   :  { %2310 = vsyncadd [#allocation5], 4294967040 }
 0xd61   :  { %1688 = vsyncpa [#allocation4], 1 }
 0xd62   :  { %1689 = vsyncpa [#allocation7], 1 }
 0xd63   :  { %1690 = vsyncpa [#allocation5], 1 }

// kernel: tpu_custom_call.1
= control target key start
LH: loop header
LB: loop body
LE: loop exit
PB: predicated region body
PF: predicated region fallthrough
CT: control target
= control target key end

     0   :  { %13 = vsyncpa [#allocation4], 0  ;;  %s2925_s0 = inlined_call_operand.vmem [shape: f32[2,16,32], index: 0, kind: input, shape index: {}]   ;;  %s2926_s1 = inlined_call_operand.hbm [shape: f32[2,8,32], index: 1, kind: input, shape index: {}]   ;;  %s2927_s2 = inlined_call_operand.vmem [shape: f32[11,512], index: 2, kind: input, shape index: {}]   ;;  %s2928_s3 = inlined_call_operand.vmem [shape: f32[32,256], index: 3, kind: input, shape index: {}]   ;;  %s2929_s4 = inlined_call_operand.vmem [shape: f32[32,512], index: 4, kind: input, shape index: {}]   ;;  %s2930_s5 = inlined_call_operand.vmem [shape: f32[256,32], index: 5, kind: input, shape index: {}]   ;;  %s2931_s6 = inlined_call_operand.vmem [shape: f32[32,32], index: 6, kind: input, shape index: {}]   ;;  %s2932_s7 = inlined_call_operand.hbm [shape: f32[32,32], index: 7, kind: input, shape index: {}]   ;;  %s2933_s8 = inlined_call_operand.hbm [shape: f32[2,8,32], index: 8, kind: output, shape index: {}]  }
   0x1   :  { %14 = vsyncpa [#allocation7], 0 }
   0x2   :  { %15 = vsyncpa [#allocation5], 0  ;;  %s2311_s27 = smov [#allocation3]   ;;  %s2239_s9 = scalar_lea.hbm %s2926_s1, 256 }
   0x3   :  { %s23_s28 = sshll.u32 %s2311_s27, 4  ;;  %p2240_p0 = scmp.ne.s32.totalorder %s2926_s1, %s2239_s9  ;;  %s24_s28 = int_to_ptr.vmem [resolvable:$true] %s23_s28 }
   0x4   :  { %p2243_p1 = scmp.lt.u32.totalorder %s2239_s9, %s2926_s1 }
   0x6   :  { %p2245_p2 = pnand %p2243_p1, %p2240_p0 }
   0x8   :  { %2248 = shalt.err (!%p2245_p2)
}
   0x9   :  { %s2249_s14 = scalar_lea.vmem %s24_s28, 256  ;;  %p2254_p4 = scmp.lt.s32.totalorder %s24_s28, %s24_s28 }
   0xa   :  { %p2250_p3 = scmp.ne.s32.totalorder %s24_s28, %s2249_s14  ;;  %p2255_p5 = scmp.lt.s32.totalorder %s2249_s14, %s2249_s14 }
   0xc   :  { %p2256_p6 = por %p2255_p5, %p2254_p4 }
   0xe   :  { %p2257_p7 = pnand %p2256_p6, %p2250_p3 }
  0x10   :  { %2260 = shalt.err (!%p2257_p7)
}
  0x11   :  { %s2312_s15 = smov 128   ;;  %s2313_s16 = smov 8  }
  0x12   :  { %29 = dma.hbm_to_vmem [thread:$0]  %s2926_s1, 256, %s24_s28, [#allocation4], %s2312_s15, %s2312_s15, %s2313_s16  }
  0x13   :  { %s2314_s19 = smov [#allocation6]   ;;  %s2261_s23 = scalar_lea.hbm %s2932_s7, 512 }
  0x14   :  { %s45_s20 = sshll.u32 %s2314_s19, 4  ;;  %p2262_p8 = scmp.ne.s32.totalorder %s2932_s7, %s2261_s23  ;;  %s46_s20 = int_to_ptr.vmem [resolvable:$true] %s45_s20 }
  0x15   :  { %p2265_p9 = scmp.lt.u32.totalorder %s2261_s23, %s2932_s7 }
  0x17   :  { %p2267_p10 = pnand %p2265_p9, %p2262_p8 }
  0x19   :  { %2270 = shalt.err (!%p2267_p10)
}
  0x1a   :  { %s2271_s29 = scalar_lea.vmem %s46_s20, 512  ;;  %p2276_p12 = scmp.lt.s32.totalorder %s46_s20, %s46_s20 }
  0x1b   :  { %p2272_p11 = scmp.ne.s32.totalorder %s46_s20, %s2271_s29  ;;  %p2277_p13 = scmp.lt.s32.totalorder %s2271_s29, %s2271_s29 }
  0x1d   :  { %p2278_p0 = por %p2277_p13, %p2276_p12 }
  0x1f   :  { %p2279_p1 = pnand %p2278_p0, %p2272_p11 }
  0x21   :  { %2282 = shalt.err (!%p2279_p1)
}
  0x22   :  { %51 = dma.hbm_to_vmem [thread:$0]  %s2932_s7, 512, %s46_s20, [#allocation7], %s2312_s15, %s2312_s15, %s2313_s16  }
  0x23   :  { %2305 = dma.done.wait [#allocation4], 256  }
  0x24   :  { %2306 = vsyncadd [#allocation4], 4294967040 }
  0x25   :  { %2307 = dma.done.wait [#allocation7], 512  }
  0x26   :  { %2308 = vsyncadd [#allocation7], 4294966784  ;;  %vm69_vm0 = vcmask 261120   ;;  %v58_v0 = vld [vmem:[%s2925_s0] sm:$0xff]  ;;  %v60_v1 = vld [vmem:[%s2925_s0 + $0x10] sm:$0xff]  ;;  %v2315_v61 = vmov 0.0  }
  0x27   :  { %v59_v2 = vld [vmem:[%s2925_s0 + $0x8] sm:$0xff]  ;;  %v70_v3 = vsel %vm69_vm0, %v58_v0, 0.0  ;;  %v76_v4 = vsel %vm69_vm0, %v60_v1, 0.0  ;;  %v61_v5 = vld [vmem:[%s2925_s0 + $0x18] sm:$0xff]  ;;  %v2410_v8 = vld [vmem:[#allocation3] sm:$0xff]  ;;  %285 = vmatprep.mubr.f32.mxu0 %v2315_v61  ;;  %374 = vmatprep.mubr.f32.mxu1 %v2315_v61  ;;  %vm2317_vm1 = vmmov 0  }
  0x28   :  { %71 = vadd.xlane.f32.xlu0 %v70_v3  ;;  %77 = vadd.xlane.f32.xlu1 %v76_v4  ;;  %v73_v6 = vsel %vm69_vm0, %v59_v2, 0.0  ;;  %v79_v7 = vsel %vm69_vm0, %v61_v5, 0.0  ;;  %v139_v9 = vsel %vm69_vm0, %v2410_v8, 0.0  ;;  %v2439_v34 = vld [vmem:[#allocation3 + $0x8] sm:$0xff]  ;;  %v178_v37 = vld [vmem:[%s2929_s4 + $0x8] sm:$0xff]  ;;  %v177_v42 = vld [vmem:[%s2929_s4] sm:$0xff]  ;;  %v123_v3 = vlaneseq }
  0x29   :  { %v142_v36 = vsel %vm69_vm0, %v2439_v34, 0.0  ;;  %v182_v38 = vld [vmem:[%s2929_s4 + $0x28] sm:$0xff]  ;;  %v180_v39 = vld [vmem:[%s2929_s4 + $0x18] sm:$0xff]  ;;  %v181_v43 = vld [vmem:[%s2929_s4 + $0x20] sm:$0xff]  ;;  %vm601_vm2 = vcmask 130048  }
  0x2a   :  { %v2031_v40 = vpack.c.bf16 %v182_v38, %v178_v37  ;;  %v184_v41 = vld [vmem:[%s2929_s4 + $0x38] sm:$0xff]  ;;  %v2033_v45 = vpack.c.bf16 %v181_v43, %v177_v42  ;;  %v179_v46 = vld [vmem:[%s2929_s4 + $0x10] sm:$0xff]  ;;  %v186_v49 = vld [vmem:[%s2929_s4 + $0x48] sm:$0xff] }
  0x2b   :  { %v2039_v44 = vpack.c.bf16 %v184_v41, %v180_v39  ;;  %v183_v47 = vld [vmem:[%s2929_s4 + $0x30] sm:$0xff]  ;;  %v190_v50 = vld [vmem:[%s2929_s4 + $0x68] sm:$0xff]  ;;  %v188_v51 = vld [vmem:[%s2929_s4 + $0x58] sm:$0xff] }
  0x2c   :  { %74 = vadd.xlane.f32.xlu0 %v73_v6  ;;  %80 = vadd.xlane.f32.xlu1 %v79_v7  ;;  %v2041_v48 = vpack.c.bf16 %v183_v47, %v179_v46  ;;  %v2035_v52 = vpack.c.bf16 %v190_v50, %v186_v49  ;;  %v192_v53 = vld [vmem:[%s2929_s4 + $0x78] sm:$0xff]  ;;  %v185_v54 = vld [vmem:[%s2929_s4 + $0x40] sm:$0xff]  ;;  %v187_v58 = vld [vmem:[%s2929_s4 + $0x50] sm:$0xff] }
  0x2d   :  { %2032 = vmatprep.subr.bf16.mxu0 %v2031_v40  ;;  %2040 = vmatprep.subr.bf16.mxu1 %v2039_v44  ;;  %v189_v55 = vld [vmem:[%s2929_s4 + $0x60] sm:$0xff]  ;;  %v2043_v56 = vpack.c.bf16 %v192_v53, %v188_v51  ;;  %v191_v59 = vld [vmem:[%s2929_s4 + $0x70] sm:$0xff]  ;;  %v400_v62 = vld [vmem:[%s2928_s3 + $0x8] sm:$0xff] }
  0x2e   :  { %2034 = vmatpush1.bf16.msra.mxu0 %v2033_v45  ;;  %2042 = vmatpush1.bf16.msra.mxu1 %v2041_v48  ;;  %v2037_v57 = vpack.c.bf16 %v189_v55, %v185_v54  ;;  %v2045_v60 = vpack.c.bf16 %v191_v59, %v187_v58  ;;  %v402_v63 = vld [vmem:[%s2928_s3 + $0x18] sm:$0xff]  ;;  %v403_v48 = vld [vmem:[%s2928_s3 + $0x20] sm:$0xff]  ;;  %v405_v49 = vld [vmem:[%s2928_s3 + $0x30] sm:$0xff] }
  0x2f   :  { %2036 = vmatprep.subr.bf16.mxu0 %v2035_v52  ;;  %2044 = vmatprep.subr.bf16.mxu1 %v2043_v56  ;;  %v406_v39 = vld [vmem:[%s2928_s3 + $0x38] sm:$0xff]  ;;  %v2053_v54 = vpack.c.bf16 %v405_v49, %v403_v48 }
  0x30   :  { %140 = vadd.xlane.f32.xlu0 %v139_v9 }
  0x32   :  { %2038 = vmatpush1.bf16.msra.mxu0 %v2037_v57  ;;  %2046 = vmatpush1.bf16.msra.mxu1 %v2045_v60 }
  0xb5   :  { %v72_v10 = vpop.xlane.xlu0 %71  ;;  %v78_v11 = vpop.xlane.xlu1 %77 }
  0xb6   :  { %v83_v12 = vmul.f32 0.03125, %v72_v10  ;;  %v85_v13 = vmul.f32 0.03125, %v78_v11  ;;  %v2500_v10 = vshrl.u32 %v123_v3, 7 }
  0xb8   :  { %v2414_v14 = vsub.f32 %v58_v0, %v83_v12  ;;  %v2416_v15 = vsub.f32 %v60_v1, %v85_v13  ;;  %v2047_v0 = vpack.c.bf16 %v402_v63, %v400_v62  ;;  %v173_v56 = vsub.s32 3, %v2500_v10 }
  0xb9   :  { %v75_v16 = vpop.xlane.xlu0 %74  ;;  %v81_v17 = vpop.xlane.xlu1 %80 }
  0xba   :  { %v84_v18 = vmul.f32 0.03125, %v75_v16  ;;  %v86_v19 = vmul.f32 0.03125, %v81_v17  ;;  %v91_v20 = vmul.f32 %v2414_v14, %v2414_v14  ;;  %v93_v21 = vmul.f32 %v2416_v15, %v2416_v15  ;;  %2048 = vmatprep.subr.bf16.mxu0 %v2047_v0 }
  0xbb   :  { %v2316_v0 = vmov 0.0|0.0  }
  0xbc   :  { %v2422_v22 = vsub.f32 %v59_v2, %v84_v18  ;;  %v2424_v23 = vsub.f32 %v61_v5, %v86_v19  ;;  %v95_v24 = vsel %vm69_vm0, %v91_v20, 0.0  ;;  %v101_v27 = vsel %vm69_vm0, %v93_v21, 0.0  ;;  %v2506_v20 = vld [vmem:[%s2927_s2] sm:$0xff]  ;;  %2055 = vmatprep.subr.bf16.mxu1 %v2316_v0 }
  0xbd   :  { %96 = vadd.xlane.f32.xlu1 %v95_v24  ;;  %v141_v25 = vpop.xlane.xlu0 %140  ;;  %v125_v19 = vsub.s32 0, %v2500_v10  ;;  %v174_v60 = vrot.slane %v2506_v20, %v173_v56 }
  0xbe   :  { %v145_v26 = vmul.f32 0.03125, %v141_v25  ;;  %v92_v28 = vmul.f32 %v2422_v22, %v2422_v22  ;;  %v94_v29 = vmul.f32 %v2424_v23, %v2424_v23  ;;  %v133_v25 = vsub.s32 1, %v2500_v10 }
  0xc0   :  { %v2433_v30 = vsub.f32 %v2410_v8, %v145_v26  ;;  %v98_v31 = vsel %vm69_vm0, %v92_v28, 0.0  ;;  %v104_v32 = vsel %vm69_vm0, %v94_v29, 0.0  ;;  %v126_v28 = vrot.slane %v2506_v20, %v125_v19 }
  0xc1   :  { %102 = vadd.xlane.f32.xlu1 %v101_v27  ;;  %99 = vadd.xlane.f32.xlu0 %v98_v31 }
  0xc2   :  { %v149_v33 = vmul.f32 %v2433_v30, %v2433_v30 }
  0xc4   :  { %v151_v35 = vsel %vm69_vm0, %v149_v33, 0.0  ;;  %v134_v33 = vrot.slane %v2506_v20, %v133_v25 }
  0xc5   :  { %105 = vadd.xlane.f32.xlu0 %v104_v32  ;;  %152 = vadd.xlane.f32.xlu1 %v151_v35  ;;  %v399_v35 = vld [vmem:[%s2928_s3] sm:$0xff] }
  0xc9   :  { %143 = vadd.xlane.f32.xlu0 %v142_v36  ;;  %v401_v36 = vld [vmem:[%s2928_s3 + $0x10] sm:$0xff] }
  0xca   :  { %v2049_v44 = vpack.c.bf16 %v401_v36, %v399_v35 }
 0x14a   :  { %v97_v1 = vpop.xlane.xlu1 %96 }
 0x14b   :  { %v107_v2 = vmul.f32 0.03125, %v97_v1 }
 0x14d   :  { %v111_v4 = vadd.f32 1e-05, %v107_v2 }
 0x14e   :  { %v103_v5 = vpop.xlane.xlu1 %102  ;;  %v100_v6 = vpop.xlane.xlu0 %99 }
 0x14f   :  { %2203 = vrsqrt.f32 %v111_v4  ;;  %v109_v7 = vmul.f32 0.03125, %v103_v5  ;;  %v108_v9 = vmul.f32 0.03125, %v100_v6 }
 0x151   :  { %v113_v11 = vadd.f32 1e-05, %v109_v7  ;;  %v112_v12 = vadd.f32 1e-05, %v108_v9  ;;  %v195_v9 = vsub.s32 7, %v2500_v10 }
 0x152   :  { %v153_v13 = vpop.xlane.xlu1 %152  ;;  %v106_v16 = vpop.xlane.xlu0 %105 }
 0x153   :  { %2205 = vrsqrt.f32 %v113_v11  ;;  %v157_v17 = vmul.f32 0.03125, %v153_v13  ;;  %v110_v18 = vmul.f32 0.03125, %v106_v16  ;;  %v66_v11 = vld [vmem:[%s2927_s2 + $0x10] sm:$0xff]  ;;  %v65_v16 = vld [vmem:[%s2927_s2 + $0x8] sm:$0xff] }
 0x154   :  { %2207 = vrsqrt.f32 %v112_v12 }
 0x155   :  { %v114_v21 = vadd.f32 1e-05, %v110_v18  ;;  %v159_v24 = vadd.f32 1e-05, %v157_v17  ;;  %v67_v17 = vld [vmem:[%s2927_s2 + $0x18] sm:$0xff] }
 0x156   :  { %v144_v26 = vpop.xlane.xlu0 %143 }
 0x157   :  { %v146_v27 = vmul.f32 0.03125, %v144_v26  ;;  %2209 = vrsqrt.f32 %v114_v21  ;;  %v204_v26 = vrot.slane %v66_v11, %v195_v9 }
 0x158   :  { %2211 = vrsqrt.f32 %v159_v24  ;;  %v196_v24 = vrot.slane %v2506_v20, %v195_v9 }
 0x159   :  { %v2204_v29 = vpop.eup %2203  ;;  %v2513_v31 = vsub.f32 %v2439_v34, %v146_v27  ;;  %v200_v27 = vrot.slane %v65_v16, %v195_v9 }
 0x15a   :  { %v119_v32 = vmul.f32 %v2204_v29, %v2414_v14  ;;  %v404_v14 = vld [vmem:[%s2928_s3 + $0x28] sm:$0xff] }
 0x15b   :  { %v150_v37 = vmul.f32 %v2513_v31, %v2513_v31  ;;  %v2051_v47 = vpack.c.bf16 %v406_v39, %v404_v14 }
 0x15c   :  { %v127_v38 = vmul.f32 %v126_v28, %v119_v32 }
 0x15d   :  { %v2206_v40 = vpop.eup %2205  ;;  %v154_v41 = vsel %vm69_vm0, %v150_v37, 0.0 }
 0x15e   :  { %v2208_v42 = vpop.eup %2207  ;;  %v135_v43 = vadd.f32 %v134_v33, %v127_v38  ;;  %155 = vadd.xlane.f32.xlu1 %v154_v41  ;;  %v121_v46 = vmul.f32 %v2206_v40, %v2416_v15  ;;  %v167_v15 = vsub.s32 2, %v2500_v10 }
 0x15f   :  { %v120_v45 = vmul.f32 %v2208_v42, %v2422_v22 }
 0x160   :  { %1691 = vmatmul.mubr.msk.f32.vlgmr.msra.gmra.mrb[0].mxu0 %vm69_vm0, %v135_v43  ;;  %1695 = vmatmul.mubr.msk.f32.vlgmr.msra.gmra.mrb[0].mxu1 %vm69_vm0, %v135_v43  ;;  %v129_v52 = vmul.f32 %v126_v28, %v121_v46  ;;  %v168_v57 = vrot.slane %v2506_v20, %v167_v15 }
 0x161   :  { %291 = vmatprep.mubr.f32.mxu0 %v2315_v61  ;;  %380 = vmatprep.mubr.f32.mxu1 %v2315_v61  ;;  %v128_v22 = vmul.f32 %v126_v28, %v120_v45  ;;  %v2210_v50 = vpop.eup %2209 }
 0x162   :  { %2050 = vmatpush1.bf16.msra.mxu0 %v2049_v44  ;;  %v122_v53 = vmul.f32 %v2210_v50, %v2424_v23  ;;  %v2212_v55 = vpop.eup %2211  ;;  %v137_v23 = vadd.f32 %v134_v33, %v129_v52 }
 0x163   :  { %v136_v51 = vadd.f32 %v134_v33, %v128_v22  ;;  %2052 = vmatprep.subr.bf16.mxu0 %v2051_v47  ;;  %v163_v58 = vmul.f32 %v2212_v55, %v2433_v30 }
 0x164   :  { %v130_v59 = vmul.f32 %v126_v28, %v122_v53  ;;  %v208_v28 = vrot.slane %v67_v17, %v195_v9 }
 0x165   :  { %1692 = vmatmul.mubr.msk.f32.gmra.mrb[2].mxu0 %vm69_vm0, %v136_v51  ;;  %1696 = vmatmul.mubr.msk.f32.gmra.mrb[2].mxu1 %vm69_vm0, %v136_v51  ;;  %v169_v62 = vmul.f32 %v168_v57, %v163_v58  ;;  %v409_v51 = vsub.s32 6, %v2500_v10 }
 0x166   :  { %297 = vmatprep.mubr.f32.mxu0 %v2315_v61  ;;  %386 = vmatprep.mubr.f32.mxu1 %v2315_v61  ;;  %v138_v63 = vadd.f32 %v134_v33, %v130_v59 }
 0x167   :  { %2054 = vmatpush1.bf16.msra.mxu0 %v2053_v54  ;;  %v175_v30 = vadd.f32 %v174_v60, %v169_v62  ;;  %v410_v59 = vrot.slane %v2506_v20, %v409_v51 }
 0x168   :  { %2061 = vmatprep.subr.bf16.mxu0 %v2316_v0 }
 0x169   :  { %1693 = vmatmul.mubr.msk.f32.gmra.mrb[4].mxu0 %vm69_vm0, %v137_v23  ;;  %1697 = vmatmul.mubr.msk.f32.gmra.mrb[4].mxu1 %vm69_vm0, %v137_v23 }
 0x16a   :  { %303 = vmatprep.mubr.f32.mxu0 %v2315_v61  ;;  %392 = vmatprep.mubr.f32.mxu1 %v2315_v61 }
 0x16d   :  { %1694 = vmatmul.mubr.msk.f32.gmra.mrb[6].mxu0 %vm69_vm0, %v138_v63  ;;  %1698 = vmatmul.mubr.msk.f32.gmra.mrb[6].mxu1 %vm69_vm0, %v138_v63  ;;  %v2600_v63 = vrot.slane %v65_v16, %v409_v51 }
 0x16e   :  { %485 = vmatprep.mubr.f32.mxu0 %v2315_v61  ;;  %1817 = vmatprep.mubr.msk.f32.mxu1 %vm2317_vm1, %v2315_v61 }
 0x171   :  { %1699 = vmatmul.mubr.msk.f32.vlgmr.msra.gmra.mrb[8].mxu0 %vm69_vm0, %v175_v30 }
 0x172   :  { %491 = vmatprep.mubr.f32.mxu0 %v2315_v61 }
 0x1eb   :  { %v156_v1 = vpop.xlane.xlu1 %155 }
 0x1ec   :  { %v158_v2 = vmul.f32 0.03125, %v156_v1 }
 0x1ee   :  { %v160_v3 = vadd.f32 1e-05, %v158_v2 }
 0x1f0   :  { %2213 = vrsqrt.f32 %v160_v3 }
 0x1fa   :  { %v2214_v4 = vpop.eup %2213 }
 0x1fb   :  { %v164_v5 = vmul.f32 %v2214_v4, %v2513_v31 }
 0x1fd   :  { %v170_v6 = vmul.f32 %v168_v57, %v164_v5 }
 0x1ff   :  { %v176_v7 = vadd.f32 %v174_v60, %v170_v6 }
 0x201   :  { %1700 = vmatmul.mubr.msk.f32.gmra.mrb[10].mxu0 %vm69_vm0, %v176_v7 }
 0x202   :  { %1831 = vmatprep.mubr.msk.f32.mxu0 %vm2317_vm1, %v2315_v61 }
 0x233   :  { %v287_v12 = vpop.f32.mrb[0].mxu0  ;;  %v376_v13 = vpop.f32.mrb[0].mxu1 }
 0x234   :  { %v289_v18 = vpop.f32.mrb[1].mxu0  ;;  %v378_v21 = vpop.f32.mrb[1].mxu1  ;;  %v288_v32 = vadd.f32 %v287_v12, %v196_v24  ;;  %v377_v33 = vadd.f32 %v376_v13, %v204_v26 }
 0x235   :  { %v290_v14 = vadd.f32 %v289_v18, %v200_v27  ;;  %v379_v39 = vadd.f32 %v378_v21, %v208_v28 }
 0x238   :  { %v293_v29 = vpop.f32.mrb[2].mxu0  ;;  %v382_v31 = vpop.f32.mrb[2].mxu1 }
 0x239   :  { %v294_v35 = vadd.f32 %v293_v29, %v196_v24  ;;  %v383_v36 = vadd.f32 %v382_v31, %v204_v26  ;;  %v295_v37 = vpop.f32.mrb[3].mxu0  ;;  %v384_v38 = vpop.f32.mrb[3].mxu1 }
 0x23a   :  { %v296_v40 = vadd.f32 %v295_v37, %v200_v27  ;;  %v385_v41 = vadd.f32 %v384_v38, %v208_v28 }
 0x23b   :  { %v2056_v42 = vpack.c.bf16 %v294_v35, %v288_v32  ;;  %v2059_v43 = vpack.c.bf16 %v383_v36, %v377_v33 }
 0x23c   :  { %v2062_v44 = vpack.c.bf16 %v296_v40, %v290_v14  ;;  %v2065_v45 = vpack.c.bf16 %v385_v41, %v379_v39  ;;  %v299_v46 = vpop.f32.mrb[4].mxu0  ;;  %v388_v47 = vpop.f32.mrb[4].mxu1 }
 0x23d   :  { %v300_v48 = vadd.f32 %v299_v46, %v196_v24  ;;  %v2586_v49 = vadd.f32 %v388_v47, %v204_v26  ;;  %v301_v22 = vpop.f32.mrb[5].mxu0  ;;  %v390_v50 = vpop.f32.mrb[5].mxu1  ;;  %2057 = vmatpush3.bf16.xpose.msra.mxu1 %v2056_v42 }
 0x23e   :  { %v2589_v52 = vadd.f32 %v301_v22, %v200_v27  ;;  %v2591_v53 = vadd.f32 %v390_v50, %v208_v28  ;;  %2063 = vmatpush3.bf16.xpose.msra.mxu0 %v2062_v44  ;;  %2058 = vmatprep.subr.bf16.mxu1 %v2316_v0 }
 0x23f   :  { %2064 = vmatprep.subr.bf16.mxu0 %v2316_v0 }
 0x240   :  { %v305_v54 = vpop.f32.mrb[6].mxu0  ;;  %v394_v55 = vpop.f32.mrb[6].mxu1 }
 0x241   :  { %v306_v56 = vadd.f32 %v305_v54, %v196_v24  ;;  %v395_v57 = vadd.f32 %v394_v55, %v204_v26  ;;  %v307_v58 = vpop.f32.mrb[7].mxu0  ;;  %v396_v23 = vpop.f32.mrb[7].mxu1 }
 0x242   :  { %v2596_v60 = vadd.f32 %v307_v58, %v200_v27  ;;  %v2598_v62 = vadd.f32 %v396_v23, %v208_v28  ;;  %v514_v58 = vld [vmem:[%s2930_s5 + $0x80] sm:$0xff]  ;;  %v515_v23 = vld [vmem:[%s2930_s5 + $0x88] sm:$0xff] }
 0x243   :  { %v2116_v30 = vpack.c.bf16 %v306_v56, %v300_v48  ;;  %v2119_v1 = vpack.c.bf16 %v395_v57, %v2586_v49 }
 0x244   :  { %v2122_v2 = vpack.c.bf16 %v2596_v60, %v2589_v52  ;;  %v2125_v3 = vpack.c.bf16 %v2598_v62, %v2591_v53  ;;  %v487_v4 = vpop.f32.mrb[8].mxu0  ;;  %v522_v62 = vld [vmem:[%s2930_s5 + $0xc0] sm:$0xff] }
 0x245   :  { %v488_v5 = vadd.f32 %v487_v4, %v410_v59  ;;  %v489_v6 = vpop.f32.mrb[9].mxu0  ;;  %v516_v4 = vld [vmem:[%s2930_s5 + $0x90] sm:$0xff] }
 0x246   :  { %v490_v7 = vadd.f32 %v489_v6, %v2600_v63  ;;  %v519_v6 = vld [vmem:[%s2930_s5 + $0xa8] sm:$0xff] }
 0x247   :  { %1818 = vmatmul.mubr.f32.vlgmr.msra.gmra.mrb[8].mxu1 %v488_v5  ;;  %v517_v5 = vld [vmem:[%s2930_s5 + $0x98] sm:$0xff] }
 0x248   :  { %2060 = vmatpush3.bf16.msra.mxu1 %v2059_v43  ;;  %1832 = vmatmul.mubr.f32.vlgmr.msra.gmra.mrb[12].mxu0 %v490_v7  ;;  %v2654_v52 = vpack.c.bf16 %v517_v5, %v516_v4 }
 0x249   :  { %2066 = vmatpush3.bf16.msra.mxu0 %v2065_v45  ;;  %1824 = vmatprep.mubr.msk.f32.mxu1 %vm2317_vm1, %v2315_v61 }
 0x24a   :  { %2115 = vmatprep.subr.bf16.mxu1 %v2316_v0  ;;  %1838 = vmatprep.mubr.msk.f32.mxu0 %vm2317_vm1, %v2315_v61 }
 0x24b   :  { %2067 = vmatprep.subr.bf16.mxu0 %v2316_v0 }
 0x2d4   :  { %v493_v9 = vpop.f32.mrb[10].mxu0 }
 0x2d5   :  { %v2614_v11 = vpop.f32.mrb[11].mxu0  ;;  %v494_v35 = vadd.f32 %v493_v9, %v410_v59  ;;  %v521_v9 = vld [vmem:[%s2930_s5 + $0xb8] sm:$0xff] }
 0x2d6   :  { %v496_v60 = vadd.f32 %v2614_v11, %v2600_v63  ;;  %v520_v63 = vld [vmem:[%s2930_s5 + $0xb0] sm:$0xff] }
 0x2d7   :  { %v2684_v53 = vpack.c.bf16 %v521_v9, %v520_v63 }
 0x31a   :  { %v596_v12 = vpop.f32.mrb[8].mxu1 }
 0x31b   :  { %v600_v13 = vmul.f32 0.25, %v596_v12  ;;  %v1819_v16 = vpop.f32.mrb[9].mxu1  ;;  %v752_v17 = vpop.f32.mrb[12].mxu0  ;;  %v524_v12 = vld [vmem:[%s2930_s5 + $0xd0] sm:$0xff] }
 0x31c   :  { %v1833_v18 = vpop.f32.mrb[13].mxu0  ;;  %v756_v40 = vmul.f32 0.25, %v752_v17  ;;  %v526_v17 = vld [vmem:[%s2930_s5 + $0xe0] sm:$0xff] }
 0x31d   :  { %v602_v21 = vsel %vm601_vm2, %v600_v13, -inf  ;;  %v527_v18 = vld [vmem:[%s2930_s5 + $0xe8] sm:$0xff] }
 0x31e   :  { %603 = vmax.xlane.f32.xlu0 %v602_v21  ;;  %v757_v42 = vsel %vm601_vm2, %v756_v40, -inf  ;;  %v2714_v21 = vpack.c.bf16 %v527_v18, %v526_v17 }
 0x3ab   :  { %v604_v24 = vpop.xlane.xlu0 %603 }
 0x3ac   :  { %v605_v26 = vsub.f32 %v600_v13, %v604_v24  ;;  %v525_v13 = vld [vmem:[%s2930_s5 + $0xd8] sm:$0xff]  ;;  %v528_v24 = vld [vmem:[%s2930_s5 + $0xf0] sm:$0xff] }
 0x3ad   :  { %v2704_v16 = vpack.c.bf16 %v525_v13, %v524_v12 }
 0x3ae   :  { %v606_v27 = vmul.f32 1.442695, %v605_v26  ;;  %v529_v26 = vld [vmem:[%s2930_s5 + $0xf8] sm:$0xff] }
 0x3b0   :  { %2215 = vpow2.f32 %v606_v27  ;;  %v2725_v27 = vpack.c.bf16 %v529_v26, %v528_v24 }
 0x3ba   :  { %v2216_v28 = vpop.eup %2215 }
 0x3bb   :  { %v608_v29 = vsel %vm601_vm2, %v2216_v28, 0.0 }
 0x3bc   :  { %609 = vadd.xlane.f32.xlu1 %v608_v29  ;;  %v499_v29 = vld [vmem:[%s2930_s5 + $0x8] sm:$0xff] }
 0x449   :  { %v610_v31 = vpop.xlane.xlu1 %609 }
 0x44a   :  { %2217 = vrcp.f32 %v610_v31 }
 0x454   :  { %v2218_v32 = vpop.eup %2217 }
 0x455   :  { %v612_v33 = vmul.f32 %v2218_v32, %v2216_v28  ;;  %v498_v28 = vld [vmem:[%s2930_s5] sm:$0xff] }
 0x457   :  { %1825 = vmatmul.mubr.msk.f32.vlgmr.msra.gmra.mrb[10].mxu1 %vm601_vm2, %v612_v33  ;;  %v2737_v33 = vpack.c.bf16 %v499_v29, %v498_v28  ;;  %v1477_v29 = vsub.s32 5, %v2500_v10 }
 0x458   :  { %2117 = vmatpush3.bf16.xpose.msra.mxu1 %v2116_v30  ;;  %1915 = vmatprep.mubr.msk.f32.mxu1 %vm2317_vm1, %v2315_v61  ;;  %v2643_v30 = vpack.c.bf16 %v515_v23, %v514_v58  ;;  %v511_v58 = vld [vmem:[%s2930_s5 + $0x68] sm:$0xff] }
 0x459   :  { %2118 = vmatprep.subr.bf16.mxu1 %v2316_v0 }
 0x45f   :  { %1916 = vmatmul.mubr.f32.vlgmr.msra.gmra.mrb[12].mxu1 %v494_v35  ;;  %v500_v35 = vld [vmem:[%s2930_s5 + $0x10] sm:$0xff] }
 0x460   :  { %2120 = vmatpush3.bf16.msra.mxu1 %v2119_v1  ;;  %1922 = vmatprep.mubr.msk.f32.mxu1 %vm2317_vm1, %v2315_v61 }
 0x461   :  { %2121 = vmatprep.subr.bf16.mxu1 %v2316_v0 }
 0x52a   :  { %v2625_v36 = vpop.f32.mrb[10].mxu1 }
 0x52b   :  { %v1826_v37 = vpop.f32.mrb[11].mxu1 }
 0x52c   :  { %v501_v37 = vld [vmem:[%s2930_s5 + $0x18] sm:$0xff] }
 0x532   :  { %v1048_v38 = vpop.f32.mrb[12].mxu1 }
 0x533   :  { %v1052_v14 = vmul.f32 0.25, %v1048_v38  ;;  %v1917_v39 = vpop.f32.mrb[13].mxu1 }
 0x534   :  { %v2746_v39 = vpack.c.bf16 %v501_v37, %v500_v35  ;;  %v1478_v37 = vrot.slane %v2506_v20, %v1477_v29 }
 0x535   :  { %v1053_v41 = vsel %vm601_vm2, %v1052_v14, -inf }
 0x536   :  { %1054 = vmax.xlane.f32.xlu0 %v1053_v41  ;;  %v503_v41 = vld [vmem:[%s2930_s5 + $0x28] sm:$0xff] }
 0x53a   :  { %758 = vmax.xlane.f32.xlu0 %v757_v42 }
 0x5c3   :  { %v1055_v43 = vpop.xlane.xlu0 %1054 }
 0x5c4   :  { %v1056_v44 = vsub.f32 %v1052_v14, %v1055_v43 }
 0x5c6   :  { %v1057_v45 = vmul.f32 1.442695, %v1056_v44 }
 0x5c7   :  { %v759_v46 = vpop.xlane.xlu0 %758 }
 0x5c8   :  { %2219 = vpow2.f32 %v1057_v45  ;;  %v760_v47 = vsub.f32 %v756_v40, %v759_v46  ;;  %v502_v40 = vld [vmem:[%s2930_s5 + $0x20] sm:$0xff] }
 0x5c9   :  { %v2758_v45 = vpack.c.bf16 %v503_v41, %v502_v40 }
 0x5ca   :  { %v761_v48 = vmul.f32 1.442695, %v760_v47  ;;  %v504_v47 = vld [vmem:[%s2930_s5 + $0x30] sm:$0xff] }
 0x5cc   :  { %2221 = vpow2.f32 %v761_v48  ;;  %v505_v48 = vld [vmem:[%s2930_s5 + $0x38] sm:$0xff] }
 0x5d2   :  { %v2220_v49 = vpop.eup %2219 }
 0x5d3   :  { %v1059_v22 = vsel %vm601_vm2, %v2220_v49, 0.0 }
 0x5d4   :  { %1060 = vadd.xlane.f32.xlu1 %v1059_v22  ;;  %v506_v22 = vld [vmem:[%s2930_s5 + $0x40] sm:$0xff] }
 0x5d6   :  { %v2222_v50 = vpop.eup %2221 }
 0x5d7   :  { %v763_v51 = vsel %vm601_vm2, %v2222_v50, 0.0 }
 0x5d8   :  { %764 = vadd.xlane.f32.xlu0 %v763_v51 }
 0x661   :  { %v1061_v54 = vpop.xlane.xlu1 %1060 }
 0x662   :  { %2223 = vrcp.f32 %v1061_v54  ;;  %v508_v54 = vld [vmem:[%s2930_s5 + $0x50] sm:$0xff] }
 0x665   :  { %v765_v55 = vpop.xlane.xlu0 %764 }
 0x666   :  { %2225 = vrcp.f32 %v765_v55  ;;  %v509_v55 = vld [vmem:[%s2930_s5 + $0x58] sm:$0xff] }
 0x66c   :  { %v2224_v56 = vpop.eup %2223 }
 0x66d   :  { %v1063_v57 = vmul.f32 %v2224_v56, %v2220_v49  ;;  %v2769_v49 = vpack.c.bf16 %v505_v48, %v504_v47  ;;  %v2789_v56 = vpack.c.bf16 %v509_v55, %v508_v54  ;;  %v1481_v47 = vld [vmem:[%s2931_s6] sm:$0xff] }
 0x66f   :  { %1923 = vmatmul.mubr.msk.f32.vlgmr.msra.gmra.mrb[14].mxu1 %vm601_vm2, %v1063_v57  ;;  %v510_v57 = vld [vmem:[%s2930_s5 + $0x60] sm:$0xff] }
 0x670   :  { %v2226_v59 = vpop.eup %2225  ;;  %2123 = vmatpush3.bf16.xpose.msra.mxu1 %v2122_v2  ;;  %1929 = vmatprep.mubr.msk.f32.mxu1 %vm2317_vm1, %v2315_v61  ;;  %v518_v2 = vld [vmem:[%s2930_s5 + $0xa0] sm:$0xff]  ;;  %v2799_v23 = vpack.c.bf16 %v511_v58, %v510_v57 }
 0x671   :  { %v767_v1 = vmul.f32 %v2226_v59, %v2222_v50  ;;  %2124 = vmatprep.subr.bf16.mxu1 %v2316_v0  ;;  %v2671_v7 = vpack.c.bf16 %v519_v6, %v518_v2  ;;  %v507_v50 = vld [vmem:[%s2930_s5 + $0x48] sm:$0xff]  ;;  %v512_v59 = vld [vmem:[%s2930_s5 + $0x70] sm:$0xff] }
 0x672   :  { %v2779_v51 = vpack.c.bf16 %v507_v50, %v506_v22  ;;  %v1484_v22 = vld [vmem:[%s2931_s6 + $0x18] sm:$0xff] }
 0x673   :  { %1839 = vmatmul.mubr.msk.f32.vlgmr.msra.gmra.mrb[14].mxu0 %vm601_vm2, %v767_v1  ;;  %v513_v1 = vld [vmem:[%s2930_s5 + $0x78] sm:$0xff] }
 0x674   :  { %2069 = vmatpush3.bf16.msra.mxu0 %v2643_v30  ;;  %1873 = vmatprep.mubr.msk.f32.mxu0 %vm2317_vm1, %v2315_v61  ;;  %v2809_v4 = vpack.c.bf16 %v513_v1, %v512_v59  ;;  %v1580_v59 = vld [vmem:[#allocation6] sm:$0xff]  ;;  %v1581_v1 = vld [vmem:[#allocation6 + $0x8] sm:$0xff] }
 0x675   :  { %2070 = vmatprep.subr.bf16.mxu0 %v2316_v0 }
 0x677   :  { %1930 = vmatmul.mubr.f32.vlgmr.msra.gmra.mrb[16].mxu1 %v496_v60 }
 0x678   :  { %2126 = vmatpush3.bf16.msra.mxu1 %v2125_v3  ;;  %2072 = vmatpush3.bf16.msra.mxu0 %v2654_v52  ;;  %v523_v3 = vld [vmem:[%s2930_s5 + $0xc8] sm:$0xff] }
 0x679   :  { %2073 = vmatprep.subr.bf16.mxu0 %v2316_v0  ;;  %1936 = vmatprep.mubr.msk.f32.mxu1 %vm2317_vm1, %v2315_v61  ;;  %v2694_v11 = vpack.c.bf16 %v523_v3, %v522_v62  ;;  %v2819_v3 = vld [vmem:[%s2927_s2 + $0x20] sm:$0x7] }
 0x67a   :  { %2127 = vmatprep.subr.bf16.mxu1 %v2316_v0 }
 0x67c   :  { %2075 = vmatpush3.bf16.msra.mxu0 %v2671_v7 }
 0x67d   :  { %2076 = vmatprep.subr.bf16.mxu0 %v2316_v0 }
 0x680   :  { %2078 = vmatpush3.bf16.msra.mxu0 %v2684_v53 }
 0x681   :  { %2079 = vmatprep.subr.bf16.mxu0 %v2316_v0 }
 0x684   :  { %2081 = vmatpush3.bf16.msra.mxu0 %v2694_v11 }
 0x685   :  { %2082 = vmatprep.subr.bf16.mxu0 %v2316_v0 }
 0x688   :  { %2084 = vmatpush3.bf16.msra.mxu0 %v2704_v16 }
 0x689   :  { %2085 = vmatprep.subr.bf16.mxu0 %v2316_v0 }
 0x68c   :  { %2087 = vmatpush3.bf16.msra.mxu0 %v2714_v21 }
 0x68d   :  { %2088 = vmatprep.subr.bf16.mxu0 %v2316_v0 }
 0x690   :  { %2090 = vmatpush3.bf16.msra.mxu0 %v2725_v27 }
 0x691   :  { %2091 = vmatprep.subr.bf16.mxu0 %v2316_v0 }
 0x742   :  { %v2735_v31 = vpop.f32.mrb[14].mxu1 }
 0x743   :  { %v1924_v32 = vpop.f32.mrb[15].mxu1 }
 0x746   :  { %v837_v38 = vpop.f32.mrb[14].mxu0 }
 0x747   :  { %v1840_v14 = vpop.f32.mrb[15].mxu0  ;;  %1874 = vmatmul.mubr.f32.vlgmr.msra.gmra.mrb[16].mxu0 %v837_v38 }
 0x748   :  { %2093 = vmatpush3.bf16.msra.mxu0 %v2737_v33  ;;  %1908 = vmatprep.mubr.msk.f32.mxu0 %vm2317_vm1, %v2315_v61 }
 0x749   :  { %2094 = vmatprep.subr.bf16.mxu0 %v2316_v0 }
 0x74a   :  { %v1203_v42 = vpop.f32.mrb[16].mxu1 }
 0x74b   :  { %v1207_v43 = vmul.f32 0.25, %v1203_v42  ;;  %v1931_v44 = vpop.f32.mrb[17].mxu1 }
 0x74c   :  { %2096 = vmatpush3.bf16.msra.mxu0 %v2746_v39 }
 0x74d   :  { %v1208_v46 = vsel %vm601_vm2, %v1207_v43, -inf  ;;  %2097 = vmatprep.subr.bf16.mxu0 %v2316_v0 }
 0x74e   :  { %1209 = vmax.xlane.f32.xlu1 %v1208_v46 }
 0x750   :  { %2099 = vmatpush3.bf16.msra.mxu0 %v2758_v45 }
 0x751   :  { %2100 = vmatprep.subr.bf16.mxu0 %v2316_v0 }
 0x754   :  { %2102 = vmatpush3.bf16.msra.mxu0 %v2769_v49 }
 0x755   :  { %2103 = vmatprep.subr.bf16.mxu0 %v2316_v0 }
 0x758   :  { %2105 = vmatpush3.bf16.msra.mxu0 %v2779_v51 }
 0x759   :  { %2106 = vmatprep.subr.bf16.mxu0 %v2316_v0 }
 0x75c   :  { %2108 = vmatpush3.bf16.msra.mxu0 %v2789_v56 }
 0x75d   :  { %2109 = vmatprep.subr.bf16.mxu0 %v2316_v0 }
 0x760   :  { %2111 = vmatpush3.bf16.msra.mxu0 %v2799_v23 }
 0x761   :  { %2112 = vmatprep.subr.bf16.mxu0 %v2316_v0 }
 0x764   :  { %2114 = vmatpush3.bf16.msra.mxu0 %v2809_v4 }
 0x767   :  { %1909 = vmatmul.mubr.f32.vlgmr.msra.gmra.mrb[16].mxu0 %v2625_v36  ;;  %v2824_v36 = vrot.slane %v2819_v3, %v125_v19 }
 0x7db   :  { %v1210_v5 = vpop.xlane.xlu1 %1209 }
 0x7dc   :  { %v1211_v60 = vsub.f32 %v1207_v43, %v1210_v5  ;;  %v1582_v5 = vld [vmem:[#allocation6 + $0x10] sm:$0xff] }
 0x7de   :  { %v1212_v2 = vmul.f32 1.442695, %v1211_v60  ;;  %v1583_v60 = vld [vmem:[#allocation6 + $0x18] sm:$0xff] }
 0x7e0   :  { %2227 = vpow2.f32 %v1212_v2  ;;  %v2187_v2 = vpack.c.bf16 %v1583_v60, %v1582_v5 }
 0x7ea   :  { %v2228_v6 = vpop.eup %2227 }
 0x7eb   :  { %v1214_v63 = vsel %vm601_vm2, %v2228_v6, 0.0 }
 0x7ec   :  { %1215 = vadd.xlane.f32.xlu1 %v1214_v63 }
 0x83a   :  { %v977_v9 = vpop.f32.mrb[16].mxu0 }
 0x83b   :  { %981 = vst.msk [vmem:[#allocation2] sm:$0xff] %vm69_vm0, %v977_v9  ;;  %v1910_v62 = vpop.f32.mrb[17].mxu0 }
 0x842   :  { %v1433_v12 = vld [vmem:[#allocation2] sm:$0xff] }
 0x843   :  { %v1439_v13 = vadd.f32 %v2824_v36, %v1433_v12 }
 0x845   :  { %v2828_v17 = vadd.f32 %v1439_v13, %v2410_v8 }
 0x847   :  { %v1443_v18 = vsel %vm69_vm0, %v2828_v17, 0.0 }
 0x848   :  { %1444 = vadd.xlane.f32.xlu0 %v1443_v18 }
 0x879   :  { %v1216_v24 = vpop.xlane.xlu1 %1215 }
 0x87a   :  { %2229 = vrcp.f32 %v1216_v24 }
 0x884   :  { %v2230_v26 = vpop.eup %2229 }
 0x885   :  { %v1218_v28 = vmul.f32 %v2230_v26, %v2228_v6  ;;  %v1488_v6 = vrot.slane %v2819_v3, %v133_v25  ;;  %v1587_v25 = vrot.slane %v2819_v3, %v167_v15 }
 0x887   :  { %1937 = vmatmul.mubr.msk.f32.vlgmr.msra.gmra.mrb[18].mxu1 %vm601_vm2, %v1218_v28 }
 0x888   :  { %2129 = vmatpush3.bf16.msra.mxu1 %v2643_v30  ;;  %1971 = vmatprep.mubr.msk.f32.mxu1 %vm2317_vm1, %v2315_v61 }
 0x889   :  { %2130 = vmatprep.subr.bf16.mxu1 %v2316_v0 }
 0x88c   :  { %2132 = vmatpush3.bf16.msra.mxu1 %v2654_v52 }
 0x88d   :  { %2133 = vmatprep.subr.bf16.mxu1 %v2316_v0 }
 0x890   :  { %2135 = vmatpush3.bf16.msra.mxu1 %v2671_v7 }
 0x891   :  { %2136 = vmatprep.subr.bf16.mxu1 %v2316_v0 }
 0x894   :  { %2138 = vmatpush3.bf16.msra.mxu1 %v2684_v53 }
 0x895   :  { %2139 = vmatprep.subr.bf16.mxu1 %v2316_v0 }
 0x898   :  { %2141 = vmatpush3.bf16.msra.mxu1 %v2694_v11 }
 0x899   :  { %2142 = vmatprep.subr.bf16.mxu1 %v2316_v0 }
 0x89c   :  { %2144 = vmatpush3.bf16.msra.mxu1 %v2704_v16 }
 0x89d   :  { %2145 = vmatprep.subr.bf16.mxu1 %v2316_v0 }
 0x8a0   :  { %2147 = vmatpush3.bf16.msra.mxu1 %v2714_v21 }
 0x8a1   :  { %2148 = vmatprep.subr.bf16.mxu1 %v2316_v0 }
 0x8a4   :  { %2150 = vmatpush3.bf16.msra.mxu1 %v2725_v27 }
 0x8a5   :  { %2151 = vmatprep.subr.bf16.mxu1 %v2316_v0 }
 0x8d5   :  { %v1445_v8 = vpop.xlane.xlu0 %1444 }
 0x8d6   :  { %v1449_v19 = vmul.f32 0.03125, %v1445_v8 }
 0x8d8   :  { %v1451_v30 = vsub.f32 %v2828_v17, %v1449_v19 }
 0x8da   :  { %v1453_v52 = vmul.f32 %v1451_v30, %v1451_v30 }
 0x8dc   :  { %v1455_v7 = vsel %vm69_vm0, %v1453_v52, 0.0 }
 0x8dd   :  { %1456 = vadd.xlane.f32.xlu0 %v1455_v7 }
 0x95a   :  { %v1288_v53 = vpop.f32.mrb[18].mxu1 }
 0x95b   :  { %v1938_v11 = vpop.f32.mrb[19].mxu1  ;;  %1972 = vmatmul.mubr.f32.vlgmr.msra.gmra.mrb[20].mxu1 %v1288_v53 }
 0x95c   :  { %2153 = vmatpush3.bf16.msra.mxu1 %v2737_v33  ;;  %2006 = vmatprep.mubr.msk.f32.mxu1 %vm2317_vm1, %v2315_v61  ;;  %v1471_v61 = vsub.s32 4, %v2500_v10 }
 0x95d   :  { %2154 = vmatprep.subr.bf16.mxu1 %v2316_v0 }
 0x95e   :  { %v1472_v32 = vrot.slane %v2506_v20, %v1471_v61 }
 0x960   :  { %2156 = vmatpush3.bf16.msra.mxu1 %v2746_v39 }
 0x961   :  { %2157 = vmatprep.subr.bf16.mxu1 %v2316_v0 }
 0x964   :  { %2159 = vmatpush3.bf16.msra.mxu1 %v2758_v45 }
 0x965   :  { %2160 = vmatprep.subr.bf16.mxu1 %v2316_v0 }
 0x968   :  { %2162 = vmatpush3.bf16.msra.mxu1 %v2769_v49  ;;  %v1483_v49 = vld [vmem:[%s2931_s6 + $0x10] sm:$0xff] }
 0x969   :  { %2163 = vmatprep.subr.bf16.mxu1 %v2316_v0  ;;  %v2179_v50 = vpack.c.bf16 %v1484_v22, %v1483_v49 }
 0x96a   :  { %v1457_v16 = vpop.xlane.xlu0 %1456 }
 0x96b   :  { %v1461_v21 = vmul.f32 0.03125, %v1457_v16 }
 0x96c   :  { %2165 = vmatpush3.bf16.msra.mxu1 %v2779_v51 }
 0x96d   :  { %v1463_v27 = vadd.f32 1e-05, %v1461_v21  ;;  %2166 = vmatprep.subr.bf16.mxu1 %v2316_v0 }
 0x96f   :  { %2231 = vrsqrt.f32 %v1463_v27 }
 0x970   :  { %2168 = vmatpush3.bf16.msra.mxu1 %v2789_v56 }
 0x971   :  { %2169 = vmatprep.subr.bf16.mxu1 %v2316_v0 }
 0x974   :  { %2171 = vmatpush3.bf16.msra.mxu1 %v2799_v23 }
 0x975   :  { %2172 = vmatprep.subr.bf16.mxu1 %v2316_v0 }
 0x978   :  { %2174 = vmatpush3.bf16.msra.mxu1 %v2809_v4  ;;  %v2183_v4 = vpack.c.bf16 %v1581_v1, %v1580_v59 }
 0x979   :  { %v2232_v33 = vpop.eup %2231 }
 0x97a   :  { %v1467_v35 = vmul.f32 %v2232_v33, %v1451_v30 }
 0x97b   :  { %2007 = vmatmul.mubr.f32.vlgmr.msra.gmra.mrb[20].mxu1 %v2735_v31 }
 0x97c   :  { %v1473_v38 = vmul.f32 %v1472_v32, %v1467_v35 }
 0x97e   :  { %v1479_v14 = vadd.f32 %v1478_v37, %v1473_v38 }
 0x980   :  { %2017 = vmatprep.mubr.msk.f32.mxu0 %vm69_vm0, %v1479_v14 }
 0xa4e   :  { %v1428_v39 = vpop.f32.mrb[20].mxu1 }
 0xa4f   :  { %1432 = vst.msk [vmem:[#allocation2 + $0x8] sm:$0xff] %vm69_vm0, %v1428_v39  ;;  %v2008_v0 = vpop.f32.mrb[21].mxu1 }
 0xa56   :  { %v1434_v40 = vld [vmem:[#allocation2 + $0x8] sm:$0xff] }
 0xa57   :  { %v1440_v41 = vadd.f32 %v2824_v36, %v1434_v40 }
 0xa59   :  { %v2879_v42 = vadd.f32 %v1440_v41, %v2439_v34  ;;  %v1482_v34 = vld [vmem:[%s2931_s6 + $0x8] sm:$0xff]  ;;  %s2318_s6 = smov [#allocation8]  }
 0xa5a   :  { %v2175_v48 = vpack.c.bf16 %v1482_v34, %v1481_v47  ;;  %s1678_s21 = sshll.u32 %s2318_s6, 4  ;;  %s1679_s21 = int_to_ptr.vmem [resolvable:$true] %s1678_s21 }
 0xa5b   :  { %v1446_v43 = vsel %vm69_vm0, %v2879_v42, 0.0  ;;  %s2283_s22 = scalar_lea.vmem %s1679_s21, 256  ;;  %p2288_p3 = scmp.lt.s32.totalorder %s1679_s21, %s1679_s21 }
 0xa5c   :  { %1447 = vadd.xlane.f32.xlu1 %v1446_v43  ;;  %2176 = vmatprep.subr.bf16.mxu0 %v2175_v48  ;;  %p2284_p2 = scmp.ne.s32.totalorder %s1679_s21, %s2283_s22  ;;  %p2289_p4 = scmp.lt.s32.totalorder %s2283_s22, %s2283_s22 }
 0xa5d   :  { %2178 = vmatpush3.bf16.msra.mxu0 %v2175_v48 }
 0xa5e   :  { %2180 = vmatprep.subr.bf16.mxu0 %v2179_v50  ;;  %p2290_p5 = por %p2289_p4, %p2288_p3 }
 0xa60   :  { %p2291_p6 = pnand %p2290_p5, %p2284_p2 }
 0xa61   :  { %2182 = vmatpush3.bf16.msra.mxu0 %v2179_v50 }
 0xa62   :  { %2184 = vmatprep.subr.bf16.mxu0 %v2183_v4 }
 0xae9   :  { %v1448_v20 = vpop.xlane.xlu1 %1447 }
 0xaea   :  { %v1450_v31 = vmul.f32 0.03125, %v1448_v20 }
 0xaec   :  { %v1452_v44 = vsub.f32 %v2879_v42, %v1450_v31 }
 0xaee   :  { %v1454_v45 = vmul.f32 %v1452_v44, %v1452_v44 }
 0xaf0   :  { %v1458_v46 = vsel %vm69_vm0, %v1454_v45, 0.0 }
 0xaf1   :  { %1459 = vadd.xlane.f32.xlu1 %v1458_v46 }
 0xb7e   :  { %v1460_v51 = vpop.xlane.xlu1 %1459 }
 0xb7f   :  { %v1462_v54 = vmul.f32 0.03125, %v1460_v51 }
 0xb81   :  { %v1464_v55 = vadd.f32 1e-05, %v1462_v54 }
 0xb83   :  { %2233 = vrsqrt.f32 %v1464_v55 }
 0xb8d   :  { %v2234_v56 = vpop.eup %2233 }
 0xb8e   :  { %v1468_v57 = vmul.f32 %v2234_v56, %v1452_v44 }
 0xb90   :  { %v1474_v58 = vmul.f32 %v1472_v32, %v1468_v57 }
 0xb92   :  { %v1480_v23 = vadd.f32 %v1478_v37, %v1474_v58 }
 0xb94   :  { %2018 = vmatmul.mubr.msk.f32.vlgmr.msra.gmra.mrb[18].mxu0 %vm69_vm0, %v1480_v23 }
 0xb95   :  { %2186 = vmatpush3.bf16.msra.mxu0 %v2183_v4 }
 0xb96   :  { %2188 = vmatprep.subr.bf16.mxu0 %v2187_v2 }
 0xb99   :  { %2190 = vmatpush3.bf16.msra.mxu0 %v2187_v2 }
 0xc67   :  { %v2019_v63 = vpop.f32.mrb[18].mxu0 }
 0xc68   :  { %v1567_v9 = vadd.f32 %v2019_v63, %v1488_v6  ;;  %v1561_v62 = vpop.f32.mrb[19].mxu0 }
 0xc69   :  { %v1562_v36 = vadd.f32 %v1561_v62, %v1488_v6 }
 0xc6a   :  { %v1573_v12 = vmul.f32 0.70710677, %v1567_v9  ;;  %v1571_v19 = vmul.f32 0.5, %v1567_v9 }
 0xc6b   :  { %v1572_v13 = vmul.f32 0.70710677, %v1562_v36  ;;  %v1570_v28 = vmul.f32 0.5, %v1562_v36 }
 0xc6c   :  { %2235 = verf.f32 %v1573_v12 }
 0xc6d   :  { %2237 = verf.f32 %v1572_v13 }
 0xc76   :  { %v2236_v18 = vpop.eup %2235 }
 0xc77   :  { %v2238_v24 = vpop.eup %2237  ;;  %v1577_v26 = vadd.f32 1.0, %v2236_v18 }
 0xc78   :  { %v1576_v8 = vadd.f32 1.0, %v2238_v24 }
 0xc79   :  { %v1579_v52 = vmul.f32 %v1577_v26, %v1571_v19 }
 0xc7a   :  { %v1578_v30 = vmul.f32 %v1576_v8, %v1570_v28 }
 0xc7c   :  { %2028 = vmatprep.mubr.msk.f32.mxu0 %vm69_vm0, %v1578_v30 }
 0xc7d   :  { %2029 = vmatmul.mubr.msk.f32.vlgmr.msra.gmra.mrb[20].mxu0 %vm69_vm0, %v1579_v52 }
 0xd50   :  { %v2030_v7 = vpop.f32.mrb[20].mxu0 }
 0xd51   :  { %v1666_v53 = vadd.f32 %v2030_v7, %v1587_v25  ;;  %v1660_v11 = vpop.f32.mrb[21].mxu0 }
 0xd52   :  { %v1661_v16 = vadd.f32 %v1660_v11, %v1587_v25 }
 0xd53   :  { %v1670_v21 = vadd.f32 %v1666_v53, %v2879_v42 }
 0xd54   :  { %v1669_v27 = vadd.f32 %v1661_v16, %v2828_v17 }
 0xd55   :  { %1672 = vst.msk [vmem:[#allocation8 + $0x8] sm:$0xff] %vm69_vm0, %v1670_v21 }
 0xd56   :  { %1671 = vst.msk [vmem:[#allocation8] sm:$0xff] %vm69_vm0, %v1669_v27 }
 0xd57   :  { %2294 = shalt.err (!%p2291_p6)
}
 0xd58   :  { %s2295_s25 = scalar_lea.hbm %s2933_s8, 256 }
 0xd59   :  { %p2296_p7 = scmp.ne.s32.totalorder %s2933_s8, %s2295_s25  ;;  %p2299_p8 = scmp.lt.u32.totalorder %s2295_s25, %s2933_s8 }
 0xd5b   :  { %p2301_p9 = pnand %p2299_p8, %p2296_p7 }
 0xd5d   :  { %2304 = shalt.err (!%p2301_p9)
}
 0xd5e   :  { %1684 = dma.vmem_to_hbm [thread:$0]  %s1679_s21, 256, %s2933_s8, [#allocation5], %s2312_s15, %s2312_s15, %s2313_s16  }
 0xd5f   :  { %2309 = dma.done.wait [#allocation5], 256  }
 0xd60   :  { %2310 = vsyncadd [#allocation5], 4294967040 }
 0xd61   :  { %1688 = vsyncpa [#allocation4], 1 }
 0xd62   :  { %1689 = vsyncpa [#allocation7], 1 }
 0xd63   :  { %1690 = vsyncpa [#allocation5], 1 }

</bundles_post_ra>
